<compile_context>
chip_gen: v7x
topology: tpu7x:2x2x1
jax: 0.10.0
libtpu: 0.0.40
codegen_flags: <defaults>
</compile_context>

<pallas_src>
import functools

import jax
import jax.numpy as jnp
from jax import lax
from jax.experimental import pallas as pl
from jax.experimental.pallas import tpu as pltpu


# Packed-bias row offsets (every slot start is 8-aligned).
_B_CORR, _N_CORR = 0, 64
_B_FLO, _N_FLO = 64, 64
_B_ME, _N_ME = 128, 61
_B_ZRQ, _N_ZRQ = 192, 192
_B_FH1, _N_FH1 = 384, 128
_B_O1, _N_O1 = 512, 64
_B_O2, _N_O2 = 576, 3
_B_TOTAL = 584


def _mm(w_ref, x_bf16):
    """W @ X on the MXU with f32 accumulation (W is a bf16 weight ref)."""
    return jnp.dot(w_ref[...], x_bf16, preferred_element_type=jnp.float32)


def update_block_kernel(
    # per-point tiles (channels on sublanes, points on lanes), f32
    net_ref, inp_ref, corr_ref, flow_ref,
    # bf16 weights
    w_cor_ref, w_flo_ref, w_me_ref,
    w_zr_h_ref, w_q_h_ref, w_x_ref,
    w_fh1_ref, w_o1_ref, w_o2_ref,
    # packed f32 biases
    bias_ref,
    # outputs
    net_out_ref, delta_out_ref,
):
    bf16 = jnp.bfloat16

    h = net_ref[...]        # (64, TN) f32
    inp = inp_ref[...]      # (64, TN) f32
    corr = corr_ref[...]    # (64, TN) f32
    flow = flow_ref[...]    # (3, TN)  f32

    b = bias_ref[...]       # (584, 1) f32
    b_cor = b[_B_CORR:_B_CORR + _N_CORR]
    b_flo = b[_B_FLO:_B_FLO + _N_FLO]
    b_me = b[_B_ME:_B_ME + _N_ME]
    b_zrq = b[_B_ZRQ:_B_ZRQ + _N_ZRQ]
    b_fh1 = b[_B_FH1:_B_FH1 + _N_FH1]
    b_o1 = b[_B_O1:_B_O1 + _N_O1]
    b_o2 = b[_B_O2:_B_O2 + _N_O2]

    # ---- MotionEncoder ----
    cor = jax.nn.relu(_mm(w_cor_ref, corr.astype(bf16)) + b_cor)        # (64, TN)
    flo = jax.nn.relu(_mm(w_flo_ref, flow.astype(bf16)) + b_flo)        # (64, TN)
    cor_flo = jnp.concatenate([cor, flo], axis=0).astype(bf16)          # (128, TN)
    mo61 = jax.nn.relu(_mm(w_me_ref, cor_flo) + b_me)                   # (61, TN)

    # ---- ConvGRU ----
    # x = cat([inp(64), mo61(61), flow(3)]); x-path gate weights are fused
    # along output channels as [z; r; q] -> (192, 128): one K=128 MXU pass.
    xcat = jnp.concatenate([inp, mo61, flow], axis=0).astype(bf16)      # (128, TN)
    xw = _mm(w_x_ref, xcat) + b_zrq                                     # (192, TN)
    zr_h = _mm(w_zr_h_ref, h.astype(bf16))                              # (128, TN)

    z = jax.nn.sigmoid(zr_h[:64] + xw[:64])
    r = jax.nn.sigmoid(zr_h[64:128] + xw[64:128])
    q = jnp.tanh(_mm(w_q_h_ref, (r * h).astype(bf16)) + xw[128:192])
    h_new = h + z * (q - h)                                             # (64, TN)
    net_out_ref[...] = h_new.astype(net_out_ref.dtype)

    # ---- FlowHead ----
    h_new_bf = h_new.astype(bf16)
    # Fused [setconv-stub ; conv1] projection: (128, 64) @ (64, TN).
    fh1 = _mm(w_fh1_ref, h_new_bf) + b_fh1                              # (128, TN)
    # TODO(synk): SetConv placeholder (graph aggregation omitted); ReLU applies
    # only to the setconv half (rows 0:64); conv1 half has no activation.
    row = lax.broadcasted_iota(jnp.int32, fh1.shape, 0)
    x2 = jnp.where(row < 64, jnp.maximum(fh1, 0.0), fh1)                # (128, TN)
    hid = jax.nn.relu(_mm(w_o1_ref, x2.astype(bf16)) + b_o1)            # (64, TN)
    delta = _mm(w_o2_ref, hid.astype(bf16)) + b_o2                      # (3, TN)
    delta_out_ref[...] = delta.astype(delta_out_ref.dtype)


def init_params(key):
    """Deterministic parameter init in PyTorch Conv1d weight convention (Cout, Cin)."""
    names_shapes = [
        ("me_corr_w", (64, 64)), ("me_corr_b", (64,)),
        ("me_flow_w", (64, 3)), ("me_flow_b", (64,)),
        ("me_conv_w", (61, 128)), ("me_conv_b", (61,)),
        ("gru_z_w", (64, 192)), ("gru_z_b", (64,)),
        ("gru_r_w", (64, 192)), ("gru_r_b", (64,)),
        ("gru_q_w", (64, 192)), ("gru_q_b", (64,)),
        ("fh_conv1_w", (64, 64)), ("fh_conv1_b", (64,)),
        ("fh_set_w", (64, 64)), ("fh_set_b", (64,)),
        ("fh_out1_w", (64, 128)), ("fh_out1_b", (64,)),
        ("fh_out2_w", (3, 64)), ("fh_out2_b", (3,)),
    ]
    keys = jax.random.split(key, len(names_shapes))
    params = {}
    for k, (name, shape) in zip(keys, names_shapes):
        params[name] = jax.random.normal(k, shape, jnp.float32) * 0.05
    return params


def _kernel_weights(params):
    """Fuse torch-convention (Cout, Cin) weights into kernel operands."""
    bf16, f32 = jnp.bfloat16, jnp.float32
    p = params

    # GRU weight columns over hx = [h(0:64), inp(64:128), mo61(128:189), flow(189:192)].
    wz, wr, wq = p["gru_z_w"], p["gru_r_w"], p["gru_q_w"]
    w_zr_h = jnp.concatenate([wz[:, :64], wr[:, :64]], axis=0)             # (128, 64)
    w_q_h = wq[:, :64]                                                     # (64, 64)
    w_x = jnp.concatenate([wz[:, 64:], wr[:, 64:], wq[:, 64:]], axis=0)    # (192, 128)

    # FlowHead out_conv[0] input = cat([setconv(0:64), conv1(64:128)]).
    w_fh1 = jnp.concatenate([p["fh_set_w"], p["fh_conv1_w"]], axis=0)      # (128, 64)

    weights = (
        p["me_corr_w"], p["me_flow_w"], p["me_conv_w"],                    # MotionEncoder
        w_zr_h, w_q_h, w_x,                                                # ConvGRU
        w_fh1, p["fh_out1_w"], p["fh_out2_w"],                             # FlowHead
    )
    weights = tuple(w.astype(bf16) for w in weights)

    # Pack all biases into one (584, 1) f32 column (8-aligned slots).
    def slot(vec, rows):
        buf = jnp.zeros((rows,), f32)
        return buf.at[: vec.shape[0]].set(vec.astype(f32))

    bias = jnp.concatenate([
        slot(p["me_corr_b"], 64),
        slot(p["me_flow_b"], 64),
        slot(p["me_conv_b"], 64),
        slot(jnp.concatenate([p["gru_z_b"], p["gru_r_b"], p["gru_q_b"]]), 192),
        slot(jnp.concatenate([p["fh_set_b"], p["fh_conv1_b"]]), 128),
        slot(p["fh_out1_b"], 64),
        slot(p["fh_out2_b"], 8),
    ]).reshape(-1, 1)
    assert bias.shape[0] == _B_TOTAL
    return weights, bias


@functools.partial(jax.jit, static_argnames=("tile_n",))
def update_block(net, inp, corr, flow, graph, params, *, tile_n=1024):
    """Pallas UpdateBlock forward.

    net, inp, corr: (B, 64, N)  float32  (PyTorch NCW layout)
    flow:           (B, N, 3)   float32
    graph:          unused (SetConv source unavailable)
    returns (net_new (B, 64, N), delta_flow (B, N, 3))
    """
    del graph  # TODO(synk): SetConv graph aggregation not implemented
    B, C, N = net.shape
    assert C == 64
    assert N % 128 == 0  # TODO(synk): no ragged-N handling

    # Pick the largest tile (multiple of 128) that divides N.
    tn = min(tile_n, N)
    while N % tn != 0:
        tn -= 128
    # v7x: keep >= 2 parallel grid steps so both TensorCores get work.
    if B == 1 and N // tn < 2 and tn % 256 == 0:
        tn //= 2

    flow_t = jnp.transpose(flow, (0, 2, 1)).astype(jnp.float32)   # (B, 3, N), tiny
    weights, bias = _kernel_weights(params)

    grid = (B, N // tn)
    pt = lambda c: pl.BlockSpec((None, c, tn), lambda b, n: (b, 0, n))
    full = lambda a: pl.BlockSpec(a.shape, lambda b, n: (0, 0))

    in_specs = ([pt(64), pt(64), pt(64), pt(3)]
                + [full(w) for w in weights]
                + [full(bias)])
    out_specs = (pt(64), pt(3))

    net_new, delta_t = pl.pallas_call(
        update_block_kernel,
        out_shape=(
            jax.ShapeDtypeStruct((B, 64, N), jnp.float32),
            jax.ShapeDtypeStruct((B, 3, N), jnp.float32),
        ),
        grid=grid,
        in_specs=in_specs,
        out_specs=out_specs,
        compiler_params=pltpu.CompilerParams(
            dimension_semantics=("parallel", "parallel"),
            vmem_limit_bytes=32 * 1024 * 1024,
        ),
    )(net, inp, corr, flow_t, *weights, bias)

    delta_flow = jnp.transpose(delta_t, (0, 2, 1))                 # (B, N, 3)
    return net_new, delta_flow


if __name__ == "__main__":
    key = jax.random.PRNGKey(0)
    kp, kn, ki, kc, kf, kg = jax.random.split(key, 6)

    B, N = 2, 512
    params = init_params(kp)

    net = jax.random.normal(kn, (B, 64, N), jnp.float32)
    inp = jax.random.normal(ki, (B, 64, N), jnp.float32)
    corr = jax.random.normal(kc, (B, 64, N), jnp.float32)
    flow = jax.random.normal(kf, (B, N, 3), jnp.float32)
    graph = jax.random.randint(kg, (B, N, 8), 0, N)  # accepted but unused (SetConv stub)

    net_new, delta_flow = update_block(net, inp, corr, flow, graph, params)
    jax.block_until_ready((net_new, delta_flow))

    assert net_new.shape == (B, 64, N)
    assert delta_flow.shape == (B, N, 3)
    assert bool(jnp.all(jnp.isfinite(net_new))) and bool(jnp.all(jnp.isfinite(delta_flow)))
    print("KERNEL_OK")
</pallas_src>

<mosaic_0001>
module attributes {stable_mosaic.version = 11 : i64} {
  func.func @update_block_kernel(%arg0: i32, %arg1: i32, %arg2: memref<1x64x512xf32, #tpu.memory_space<vmem>>, %arg3: memref<1x64x512xf32, #tpu.memory_space<vmem>>, %arg4: memref<1x64x512xf32, #tpu.memory_space<vmem>>, %arg5: memref<1x3x512xf32, #tpu.memory_space<vmem>>, %arg6: memref<64x64xbf16, #tpu.memory_space<vmem>>, %arg7: memref<64x3xbf16, #tpu.memory_space<vmem>>, %arg8: memref<61x128xbf16, #tpu.memory_space<vmem>>, %arg9: memref<128x64xbf16, #tpu.memory_space<vmem>>, %arg10: memref<64x64xbf16, #tpu.memory_space<vmem>>, %arg11: memref<192x128xbf16, #tpu.memory_space<vmem>>, %arg12: memref<128x64xbf16, #tpu.memory_space<vmem>>, %arg13: memref<64x128xbf16, #tpu.memory_space<vmem>>, %arg14: memref<3x64xbf16, #tpu.memory_space<vmem>>, %arg15: memref<584x1xf32, #tpu.memory_space<vmem>>, %arg16: memref<1x64x512xf32, #tpu.memory_space<vmem>>, %arg17: memref<1x3x512xf32, #tpu.memory_space<vmem>>) attributes {dimension_semantics = [#tpu.dimension_semantics<parallel>, #tpu.dimension_semantics<parallel>], iteration_bounds = array<i64: 2, 1>, scalar_prefetch = 0 : i64, scratch_operands = 0 : i64, tpu.core_type = #tpu.core_type<tc>, window_params = [{transform_indices = @transform_0, window_bounds = array<i64: 1, 64, 512>}, {transform_indices = @transform_1, window_bounds = array<i64: 1, 64, 512>}, {transform_indices = @transform_2, window_bounds = array<i64: 1, 64, 512>}, {transform_indices = @transform_3, window_bounds = array<i64: 1, 3, 512>}, {pipeline_mode = #tpu.pipeline_mode<synchronous>, transform_indices = @transform_4, window_bounds = array<i64: 64, 64>}, {pipeline_mode = #tpu.pipeline_mode<synchronous>, transform_indices = @transform_5, window_bounds = array<i64: 64, 3>}, {pipeline_mode = #tpu.pipeline_mode<synchronous>, transform_indices = @transform_6, window_bounds = array<i64: 61, 128>}, {pipeline_mode = #tpu.pipeline_mode<synchronous>, transform_indices = @transform_7, window_bounds = array<i64: 128, 64>}, {pipeline_mode = #tpu.pipeline_mode<synchronous>, transform_indices = @transform_8, window_bounds = array<i64: 64, 64>}, {pipeline_mode = #tpu.pipeline_mode<synchronous>, transform_indices = @transform_9, window_bounds = array<i64: 192, 128>}, {pipeline_mode = #tpu.pipeline_mode<synchronous>, transform_indices = @transform_10, window_bounds = array<i64: 128, 64>}, {pipeline_mode = #tpu.pipeline_mode<synchronous>, transform_indices = @transform_11, window_bounds = array<i64: 64, 128>}, {pipeline_mode = #tpu.pipeline_mode<synchronous>, transform_indices = @transform_12, window_bounds = array<i64: 3, 64>}, {pipeline_mode = #tpu.pipeline_mode<synchronous>, transform_indices = @transform_13, window_bounds = array<i64: 584, 1>}, {transform_indices = @transform_14, window_bounds = array<i64: 1, 64, 512>}, {transform_indices = @transform_15, window_bounds = array<i64: 1, 3, 512>}]} {
    %c0 = arith.constant 0 : index
    %c0_0 = arith.constant 0 : index
    %c0_1 = arith.constant 0 : index
    %0 = vector.load %arg2[%c0, %c0_0, %c0_1] : memref<1x64x512xf32, #tpu.memory_space<vmem>>, vector<1x64x512xf32>
    %1 = vector.shape_cast %0 : vector<1x64x512xf32> to vector<64x512xf32>
    %c0_2 = arith.constant 0 : index
    %c0_3 = arith.constant 0 : index
    %c0_4 = arith.constant 0 : index
    %2 = vector.load %arg3[%c0_2, %c0_3, %c0_4] : memref<1x64x512xf32, #tpu.memory_space<vmem>>, vector<1x64x512xf32>
    %3 = vector.shape_cast %2 : vector<1x64x512xf32> to vector<64x512xf32>
    %c0_5 = arith.constant 0 : index
    %c0_6 = arith.constant 0 : index
    %c0_7 = arith.constant 0 : index
    %4 = vector.load %arg4[%c0_5, %c0_6, %c0_7] : memref<1x64x512xf32, #tpu.memory_space<vmem>>, vector<1x64x512xf32>
    %5 = vector.shape_cast %4 : vector<1x64x512xf32> to vector<64x512xf32>
    %c0_8 = arith.constant 0 : index
    %c0_9 = arith.constant 0 : index
    %c0_10 = arith.constant 0 : index
    %6 = vector.load %arg5[%c0_8, %c0_9, %c0_10] : memref<1x3x512xf32, #tpu.memory_space<vmem>>, vector<1x3x512xf32>
    %7 = vector.shape_cast %6 : vector<1x3x512xf32> to vector<3x512xf32>
    %c0_11 = arith.constant 0 : index
    %c0_12 = arith.constant 0 : index
    %8 = vector.load %arg15[%c0_11, %c0_12] : memref<584x1xf32, #tpu.memory_space<vmem>>, vector<584x1xf32>
    %9 = vector.extract_strided_slice %8 {offsets = [0, 0], sizes = [64, 1], strides = [1, 1]} : vector<584x1xf32> to vector<64x1xf32>
    %10 = vector.extract_strided_slice %8 {offsets = [64, 0], sizes = [64, 1], strides = [1, 1]} : vector<584x1xf32> to vector<64x1xf32>
    %11 = vector.extract_strided_slice %8 {offsets = [128, 0], sizes = [61, 1], strides = [1, 1]} : vector<584x1xf32> to vector<61x1xf32>
    %12 = vector.extract_strided_slice %8 {offsets = [192, 0], sizes = [192, 1], strides = [1, 1]} : vector<584x1xf32> to vector<192x1xf32>
    %13 = vector.extract_strided_slice %8 {offsets = [384, 0], sizes = [128, 1], strides = [1, 1]} : vector<584x1xf32> to vector<128x1xf32>
    %14 = vector.extract_strided_slice %8 {offsets = [512, 0], sizes = [64, 1], strides = [1, 1]} : vector<584x1xf32> to vector<64x1xf32>
    %15 = vector.extract_strided_slice %8 {offsets = [576, 0], sizes = [3, 1], strides = [1, 1]} : vector<584x1xf32> to vector<3x1xf32>
    %16 = arith.truncf %5 : vector<64x512xf32> to vector<64x512xbf16>
    %c0_13 = arith.constant 0 : index
    %c0_14 = arith.constant 0 : index
    %17 = vector.load %arg6[%c0_13, %c0_14] : memref<64x64xbf16, #tpu.memory_space<vmem>>, vector<64x64xbf16>
    %cst = arith.constant dense<0.000000e+00> : vector<64x512xf32>
    %18 = tpu.matmul %17, %16, %cst {dimension_numbers = #tpu.dot_dimension_numbers<[1], [0], [0], [1], [0, 0, 1, 1], [], []>} : vector<64x64xbf16>, vector<64x512xbf16>, vector<64x512xf32> -> vector<64x512xf32>
    %19 = vector.broadcast %9 : vector<64x1xf32> to vector<64x512xf32>
    %20 = arith.addf %18, %19 : vector<64x512xf32>
    %cst_15 = arith.constant 0.000000e+00 : f32
    %21 = vector.broadcast %cst_15 : f32 to vector<64x512xf32>
    %22 = arith.maximumf %20, %21 : vector<64x512xf32>
    %23 = arith.truncf %7 : vector<3x512xf32> to vector<3x512xbf16>
    %c0_16 = arith.constant 0 : index
    %c0_17 = arith.constant 0 : index
    %24 = vector.load %arg7[%c0_16, %c0_17] : memref<64x3xbf16, #tpu.memory_space<vmem>>, vector<64x3xbf16>
    %cst_18 = arith.constant dense<0.000000e+00> : vector<64x512xf32>
    %25 = tpu.matmul %24, %23, %cst_18 {dimension_numbers = #tpu.dot_dimension_numbers<[1], [0], [0], [1], [0, 0, 1, 1], [], []>} : vector<64x3xbf16>, vector<3x512xbf16>, vector<64x512xf32> -> vector<64x512xf32>
    %26 = vector.broadcast %10 : vector<64x1xf32> to vector<64x512xf32>
    %27 = arith.addf %25, %26 : vector<64x512xf32>
    %cst_19 = arith.constant 0.000000e+00 : f32
    %28 = vector.broadcast %cst_19 : f32 to vector<64x512xf32>
    %29 = arith.maximumf %27, %28 : vector<64x512xf32>
    %30 = tpu.concatenate %22, %29 in 0 : vector<64x512xf32>, vector<64x512xf32> -> vector<128x512xf32>
    %31 = arith.truncf %30 : vector<128x512xf32> to vector<128x512xbf16>
    %c0_20 = arith.constant 0 : index
    %c0_21 = arith.constant 0 : index
    %32 = vector.load %arg8[%c0_20, %c0_21] : memref<61x128xbf16, #tpu.memory_space<vmem>>, vector<61x128xbf16>
    %cst_22 = arith.constant dense<0.000000e+00> : vector<61x512xf32>
    %33 = tpu.matmul %32, %31, %cst_22 {dimension_numbers = #tpu.dot_dimension_numbers<[1], [0], [0], [1], [0, 0, 1, 1], [], []>} : vector<61x128xbf16>, vector<128x512xbf16>, vector<61x512xf32> -> vector<61x512xf32>
    %34 = vector.broadcast %11 : vector<61x1xf32> to vector<61x512xf32>
    %35 = arith.addf %33, %34 : vector<61x512xf32>
    %cst_23 = arith.constant 0.000000e+00 : f32
    %36 = vector.broadcast %cst_23 : f32 to vector<61x512xf32>
    %37 = arith.maximumf %35, %36 : vector<61x512xf32>
    %38 = tpu.concatenate %3, %37, %7 in 0 : vector<64x512xf32>, vector<61x512xf32>, vector<3x512xf32> -> vector<128x512xf32>
    %39 = arith.truncf %38 : vector<128x512xf32> to vector<128x512xbf16>
    %c0_24 = arith.constant 0 : index
    %c0_25 = arith.constant 0 : index
    %40 = vector.load %arg11[%c0_24, %c0_25] : memref<192x128xbf16, #tpu.memory_space<vmem>>, vector<192x128xbf16>
    %cst_26 = arith.constant dense<0.000000e+00> : vector<192x512xf32>
    %41 = tpu.matmul %40, %39, %cst_26 {dimension_numbers = #tpu.dot_dimension_numbers<[1], [0], [0], [1], [0, 0, 1, 1], [], []>} : vector<192x128xbf16>, vector<128x512xbf16>, vector<192x512xf32> -> vector<192x512xf32>
    %42 = vector.broadcast %12 : vector<192x1xf32> to vector<192x512xf32>
    %43 = arith.addf %41, %42 : vector<192x512xf32>
    %44 = arith.truncf %1 : vector<64x512xf32> to vector<64x512xbf16>
    %c0_27 = arith.constant 0 : index
    %c0_28 = arith.constant 0 : index
    %45 = vector.load %arg9[%c0_27, %c0_28] : memref<128x64xbf16, #tpu.memory_space<vmem>>, vector<128x64xbf16>
    %cst_29 = arith.constant dense<0.000000e+00> : vector<128x512xf32>
    %46 = tpu.matmul %45, %44, %cst_29 {dimension_numbers = #tpu.dot_dimension_numbers<[1], [0], [0], [1], [0, 0, 1, 1], [], []>} : vector<128x64xbf16>, vector<64x512xbf16>, vector<128x512xf32> -> vector<128x512xf32>
    %47 = vector.extract_strided_slice %46 {offsets = [0, 0], sizes = [64, 512], strides = [1, 1]} : vector<128x512xf32> to vector<64x512xf32>
    %48 = vector.extract_strided_slice %43 {offsets = [0, 0], sizes = [64, 512], strides = [1, 1]} : vector<192x512xf32> to vector<64x512xf32>
    %49 = arith.addf %47, %48 : vector<64x512xf32>
    %50 = arith.negf %49 : vector<64x512xf32>
    %51 = math.exp %50 : vector<64x512xf32>
    %cst_30 = arith.constant 1.000000e+00 : f32
    %52 = vector.broadcast %cst_30 : f32 to vector<64x512xf32>
    %53 = arith.addf %52, %51 : vector<64x512xf32>
    %54 = arith.divf %52, %53 : vector<64x512xf32>
    %55 = vector.extract_strided_slice %46 {offsets = [64, 0], sizes = [64, 512], strides = [1, 1]} : vector<128x512xf32> to vector<64x512xf32>
    %56 = vector.extract_strided_slice %43 {offsets = [64, 0], sizes = [64, 512], strides = [1, 1]} : vector<192x512xf32> to vector<64x512xf32>
    %57 = arith.addf %55, %56 : vector<64x512xf32>
    %58 = arith.negf %57 : vector<64x512xf32>
    %59 = math.exp %58 : vector<64x512xf32>
    %cst_31 = arith.constant 1.000000e+00 : f32
    %60 = vector.broadcast %cst_31 : f32 to vector<64x512xf32>
    %61 = arith.addf %60, %59 : vector<64x512xf32>
    %62 = arith.divf %60, %61 : vector<64x512xf32>
    %63 = arith.mulf %62, %1 : vector<64x512xf32>
    %64 = arith.truncf %63 : vector<64x512xf32> to vector<64x512xbf16>
    %c0_32 = arith.constant 0 : index
    %c0_33 = arith.constant 0 : index
    %65 = vector.load %arg10[%c0_32, %c0_33] : memref<64x64xbf16, #tpu.memory_space<vmem>>, vector<64x64xbf16>
    %cst_34 = arith.constant dense<0.000000e+00> : vector<64x512xf32>
    %66 = tpu.matmul %65, %64, %cst_34 {dimension_numbers = #tpu.dot_dimension_numbers<[1], [0], [0], [1], [0, 0, 1, 1], [], []>} : vector<64x64xbf16>, vector<64x512xbf16>, vector<64x512xf32> -> vector<64x512xf32>
    %67 = vector.extract_strided_slice %43 {offsets = [128, 0], sizes = [64, 512], strides = [1, 1]} : vector<192x512xf32> to vector<64x512xf32>
    %68 = arith.addf %66, %67 : vector<64x512xf32>
    %69 = math.tanh %68 : vector<64x512xf32>
    %70 = arith.subf %69, %1 : vector<64x512xf32>
    %71 = arith.mulf %54, %70 : vector<64x512xf32>
    %72 = arith.addf %1, %71 : vector<64x512xf32>
    %c0_35 = arith.constant 0 : index
    %c0_36 = arith.constant 0 : index
    %c0_37 = arith.constant 0 : index
    %73 = vector.load %arg16[%c0_35, %c0_36, %c0_37] : memref<1x64x512xf32, #tpu.memory_space<vmem>>, vector<1x64x512xf32>
    %74 = vector.shape_cast %73 : vector<1x64x512xf32> to vector<64x512xf32>
    %75 = vector.shape_cast %72 : vector<64x512xf32> to vector<1x64x512xf32>
    tpu.vector_store %arg16[%c0_35, %c0_36, %c0_37], %75 {strides = array<i32>} : memref<1x64x512xf32, #tpu.memory_space<vmem>>, vector<1x64x512xf32>,
    %76 = arith.truncf %72 : vector<64x512xf32> to vector<64x512xbf16>
    %c0_38 = arith.constant 0 : index
    %c0_39 = arith.constant 0 : index
    %77 = vector.load %arg12[%c0_38, %c0_39] : memref<128x64xbf16, #tpu.memory_space<vmem>>, vector<128x64xbf16>
    %cst_40 = arith.constant dense<0.000000e+00> : vector<128x512xf32>
    %78 = tpu.matmul %77, %76, %cst_40 {dimension_numbers = #tpu.dot_dimension_numbers<[1], [0], [0], [1], [0, 0, 1, 1], [], []>} : vector<128x64xbf16>, vector<64x512xbf16>, vector<128x512xf32> -> vector<128x512xf32>
    %79 = vector.broadcast %13 : vector<128x1xf32> to vector<128x512xf32>
    %80 = arith.addf %78, %79 : vector<128x512xf32>
    %81 = tpu.iota {dimensions = array<i32: 0>} : vector<128x512xi32>
    %c64_i32 = arith.constant 64 : i32
    %82 = vector.broadcast %c64_i32 : i32 to vector<128x512xi32>
    %83 = arith.cmpi slt, %81, %82 : vector<128x512xi32>
    %cst_41 = arith.constant 0.000000e+00 : f32
    %84 = vector.broadcast %cst_41 : f32 to vector<128x512xf32>
    %85 = arith.maximumf %80, %84 : vector<128x512xf32>
    %86 = arith.select %83, %85, %80 : vector<128x512xi1>, vector<128x512xf32>
    %87 = arith.truncf %86 : vector<128x512xf32> to vector<128x512xbf16>
    %c0_42 = arith.constant 0 : index
    %c0_43 = arith.constant 0 : index
    %88 = vector.load %arg13[%c0_42, %c0_43] : memref<64x128xbf16, #tpu.memory_space<vmem>>, vector<64x128xbf16>
    %cst_44 = arith.constant dense<0.000000e+00> : vector<64x512xf32>
    %89 = tpu.matmul %88, %87, %cst_44 {dimension_numbers = #tpu.dot_dimension_numbers<[1], [0], [0], [1], [0, 0, 1, 1], [], []>} : vector<64x128xbf16>, vector<128x512xbf16>, vector<64x512xf32> -> vector<64x512xf32>
    %90 = vector.broadcast %14 : vector<64x1xf32> to vector<64x512xf32>
    %91 = arith.addf %89, %90 : vector<64x512xf32>
    %cst_45 = arith.constant 0.000000e+00 : f32
    %92 = vector.broadcast %cst_45 : f32 to vector<64x512xf32>
    %93 = arith.maximumf %91, %92 : vector<64x512xf32>
    %94 = arith.truncf %93 : vector<64x512xf32> to vector<64x512xbf16>
    %c0_46 = arith.constant 0 : index
    %c0_47 = arith.constant 0 : index
    %95 = vector.load %arg14[%c0_46, %c0_47] : memref<3x64xbf16, #tpu.memory_space<vmem>>, vector<3x64xbf16>
    %cst_48 = arith.constant dense<0.000000e+00> : vector<3x512xf32>
    %96 = tpu.matmul %95, %94, %cst_48 {dimension_numbers = #tpu.dot_dimension_numbers<[1], [0], [0], [1], [0, 0, 1, 1], [], []>} : vector<3x64xbf16>, vector<64x512xbf16>, vector<3x512xf32> -> vector<3x512xf32>
    %97 = vector.broadcast %15 : vector<3x1xf32> to vector<3x512xf32>
    %98 = arith.addf %96, %97 : vector<3x512xf32>
    %c0_49 = arith.constant 0 : index
    %c0_50 = arith.constant 0 : index
    %c0_51 = arith.constant 0 : index
    %99 = vector.load %arg17[%c0_49, %c0_50, %c0_51] : memref<1x3x512xf32, #tpu.memory_space<vmem>>, vector<1x3x512xf32>
    %100 = vector.shape_cast %99 : vector<1x3x512xf32> to vector<3x512xf32>
    %101 = vector.shape_cast %98 : vector<3x512xf32> to vector<1x3x512xf32>
    tpu.vector_store %arg17[%c0_49, %c0_50, %c0_51], %101 {strides = array<i32>} : memref<1x3x512xf32, #tpu.memory_space<vmem>>, vector<1x3x512xf32>,
    return
  }
  func.func @transform_0(%arg0: i32, %arg1: i32) -> (i32, i32, i32) {
    %c0_i32 = arith.constant 0 : i32
    %c0_i32_0 = arith.constant 0 : i32
    return %arg0, %c0_i32, %arg1 : i32, i32, i32
  }
  func.func @transform_1(%arg0: i32, %arg1: i32) -> (i32, i32, i32) {
    %c0_i32 = arith.constant 0 : i32
    %c0_i32_0 = arith.constant 0 : i32
    return %arg0, %c0_i32, %arg1 : i32, i32, i32
  }
  func.func @transform_2(%arg0: i32, %arg1: i32) -> (i32, i32, i32) {
    %c0_i32 = arith.constant 0 : i32
    %c0_i32_0 = arith.constant 0 : i32
    return %arg0, %c0_i32, %arg1 : i32, i32, i32
  }
  func.func @transform_3(%arg0: i32, %arg1: i32) -> (i32, i32, i32) {
    %c0_i32 = arith.constant 0 : i32
    %c0_i32_0 = arith.constant 0 : i32
    return %arg0, %c0_i32, %arg1 : i32, i32, i32
  }
  func.func @transform_4(%arg0: i32, %arg1: i32) -> (i32, i32) {
    %c0_i32 = arith.constant 0 : i32
    %c0_i32_0 = arith.constant 0 : i32
    %c0_i32_1 = arith.constant 0 : i32
    return %c0_i32, %c0_i32_0 : i32, i32
  }
  func.func @transform_5(%arg0: i32, %arg1: i32) -> (i32, i32) {
    %c0_i32 = arith.constant 0 : i32
    %c0_i32_0 = arith.constant 0 : i32
    %c0_i32_1 = arith.constant 0 : i32
    return %c0_i32, %c0_i32_0 : i32, i32
  }
  func.func @transform_6(%arg0: i32, %arg1: i32) -> (i32, i32) {
    %c0_i32 = arith.constant 0 : i32
    %c0_i32_0 = arith.constant 0 : i32
    %c0_i32_1 = arith.constant 0 : i32
    return %c0_i32, %c0_i32_0 : i32, i32
  }
  func.func @transform_7(%arg0: i32, %arg1: i32) -> (i32, i32) {
    %c0_i32 = arith.constant 0 : i32
    %c0_i32_0 = arith.constant 0 : i32
    %c0_i32_1 = arith.constant 0 : i32
    return %c0_i32, %c0_i32_0 : i32, i32
  }
  func.func @transform_8(%arg0: i32, %arg1: i32) -> (i32, i32) {
    %c0_i32 = arith.constant 0 : i32
    %c0_i32_0 = arith.constant 0 : i32
    %c0_i32_1 = arith.constant 0 : i32
    return %c0_i32, %c0_i32_0 : i32, i32
  }
  func.func @transform_9(%arg0: i32, %arg1: i32) -> (i32, i32) {
    %c0_i32 = arith.constant 0 : i32
    %c0_i32_0 = arith.constant 0 : i32
    %c0_i32_1 = arith.constant 0 : i32
    return %c0_i32, %c0_i32_0 : i32, i32
  }
  func.func @transform_10(%arg0: i32, %arg1: i32) -> (i32, i32) {
    %c0_i32 = arith.constant 0 : i32
    %c0_i32_0 = arith.constant 0 : i32
    %c0_i32_1 = arith.constant 0 : i32
    return %c0_i32, %c0_i32_0 : i32, i32
  }
  func.func @transform_11(%arg0: i32, %arg1: i32) -> (i32, i32) {
    %c0_i32 = arith.constant 0 : i32
    %c0_i32_0 = arith.constant 0 : i32
    %c0_i32_1 = arith.constant 0 : i32
    return %c0_i32, %c0_i32_0 : i32, i32
  }
  func.func @transform_12(%arg0: i32, %arg1: i32) -> (i32, i32) {
    %c0_i32 = arith.constant 0 : i32
    %c0_i32_0 = arith.constant 0 : i32
    %c0_i32_1 = arith.constant 0 : i32
    return %c0_i32, %c0_i32_0 : i32, i32
  }
  func.func @transform_13(%arg0: i32, %arg1: i32) -> (i32, i32) {
    %c0_i32 = arith.constant 0 : i32
    %c0_i32_0 = arith.constant 0 : i32
    %c0_i32_1 = arith.constant 0 : i32
    return %c0_i32, %c0_i32_0 : i32, i32
  }
  func.func @transform_14(%arg0: i32, %arg1: i32) -> (i32, i32, i32) {
    %c0_i32 = arith.constant 0 : i32
    %c0_i32_0 = arith.constant 0 : i32
    return %arg0, %c0_i32, %arg1 : i32, i32, i32
  }
  func.func @transform_15(%arg0: i32, %arg1: i32) -> (i32, i32, i32) {
    %c0_i32 = arith.constant 0 : i32
    %c0_i32_0 = arith.constant 0 : i32
    return %arg0, %c0_i32, %arg1 : i32, i32, i32
  }
}

</mosaic_0001>

<bundles_post_ra>
// kernel: update_block.1
= control target key start
LH: loop header
LB: loop body
LE: loop exit
PB: predicated region body
PF: predicated region fallthrough
CT: control target
= control target key end

     0   :  { %s6984_s0 = inlined_call_operand.vmem [shape: f32[2,64,512], index: 0, kind: input, shape index: {}]   ;;  %s6985_s1 = inlined_call_operand.vmem [shape: f32[2,64,512], index: 1, kind: input, shape index: {}]   ;;  %s6986_s2 = inlined_call_operand.vmem [shape: f32[2,64,512], index: 2, kind: input, shape index: {}]   ;;  %s6987_s3 = inlined_call_operand.vmem [shape: f32[2,3,512], index: 3, kind: input, shape index: {}]   ;;  %s6988_s4 = inlined_call_operand.vmem [shape: bf16[64,64], index: 4, kind: input, shape index: {}]   ;;  %s6989_s5 = inlined_call_operand.vmem [shape: bf16[64,3], index: 5, kind: input, shape index: {}]   ;;  %s6990_s6 = inlined_call_operand.vmem [shape: bf16[61,128], index: 6, kind: input, shape index: {}]   ;;  %s6991_s7 = inlined_call_operand.vmem [shape: bf16[128,64], index: 7, kind: input, shape index: {}]   ;;  %s6992_s8 = inlined_call_operand.vmem [shape: bf16[64,64], index: 8, kind: input, shape index: {}]   ;;  %s6993_s9 = inlined_call_operand.vmem [shape: bf16[192,128], index: 9, kind: input, shape index: {}]   ;;  %s6994_s10 = inlined_call_operand.vmem [shape: bf16[128,64], index: 10, kind: input, shape index: {}]   ;;  %s6995_s11 = inlined_call_operand.vmem [shape: bf16[64,128], index: 11, kind: input, shape index: {}]   ;;  %s6996_s12 = inlined_call_operand.vmem [shape: bf16[3,64], index: 12, kind: input, shape index: {}]   ;;  %s6997_s13 = inlined_call_operand.vmem [shape: f32[584,1], index: 13, kind: input, shape index: {}]   ;;  %s6998_s14 = inlined_call_operand.hbm [shape: f32[2,64,512], index: 14, kind: output, shape index: {0}]   ;;  %s6999_s15 = inlined_call_operand.vmem [shape: f32[2,3,512], index: 15, kind: output, shape index: {1}]  }
   0x1   :  { %7022 = sst [smem:[#allocation56_spill]] %s6986_s2 }
   0x2   :  { %7023 = sst [smem:[#allocation57_spill]] %s6987_s3 }
   0x3   :  { %7024 = sst [smem:[#allocation58_spill]] %s6988_s4 }
   0x4   :  { %21 = vsyncpa [#allocation3], 0 }
   0x5   :  { %23 = vsyncpa [#allocation3 + $0x1], 0  ;;  %s5581_s18 = smov 0   ;;  %s5583_s19 = smov 0  }
   0x6   :  { %s5585_s20 = smov 0   ;;  %s5587_s21 = smov 0  }
   0x7   :  { %s5589_s22 = smov 0   ;;  %s5591_s23 = smov 0  }
   0x8 LB: > { %7025 = sst [smem:[#allocation5_spill]] %s5474_s18  ;;  %s4562_s24 = sadd.s32 4294967295, %s5494_s23   ;;  %s5494_s23 = sphi %s5591_s23, %s29_s23   ;;  %s5490_s22 = sphi %s5589_s22, %s7140_s22   ;;  %s5486_s21 = sphi %s5587_s21, %s7139_s21   ;;  %s5482_s20 = sphi %s5585_s20, %s7138_s20   ;;  %s5478_s19 = sphi %s5583_s19, %s7142_s19   ;;  %s5474_s18 = sphi %s5581_s18, %s7141_s18  }
   0x9   : > { %7026 = sst [smem:[#allocation6_spill]] %s5482_s20  ;;  %s4563_s25 = sadd.s32 4294967294, %s5494_s23  }
   0xa   : > { %7027 = sst [smem:[#allocation7_spill]] %s5490_s22  ;;  %s41_s26 = sadd.s32 1, %s5490_s22 }
   0xb   : > { %s372_s27 = sadd.s32 1, %s5482_s20  ;;  %p43_p0 = scmp.ge.s32.totalorder %s41_s26, 2 }
   0xc   : > { %p382_p1 = scmp.ne.s32.totalorder %s5482_s20, %s5478_s19  ;;  %p383_p2 = scmp.eq.s32.totalorder %s4562_s24, 1 }
   0xd   : > { %p388_p3 = scmp.ne.s32.totalorder %s5478_s19, %s5474_s18  ;;  %s7144_s26 = smov (%p43_p0, %s41_s26), 0 }
   0xe   : > { %7028 = sst [smem:[#allocation8_spill]] %s7144_s26  ;;  %p5621_p4 = por %p383_p2, %p382_p1 }
   0xf   : > { %p389_p5 = scmp.eq.s32.totalorder %s4563_s25, 1  ;;  %s367_s29 = ssub.s32 %s5490_s22, %s7144_s26 }
  0x10   : > { %p4566_p6 = scmp.ge.s32.totalorder %s5494_s23, 1  ;;  %p370_p7 = scmp.eq.s32.totalorder %s367_s29, 0 }
  0x11   : > { %p5628_p8 = por %p389_p5, %p388_p3  ;;  %p517_p9 = scmp.lt.s32.totalorder %s5494_s23, 3 }
  0x12   : > { %s5634_s16 = scalar_select %p370_p7, %s5482_s20, %s372_s27  }
  0x13   : > { %p518_p10 = pnand %p4566_p6, %p517_p9 }
  0x14   : > { %7031 = sst [smem:[#allocation9_spill]] %s5634_s16 }
  0x15   : > { %521 = sbr.rel (%p518_p10) target bundleno = 2040 (0x7f8), region = 76 }
  0x1c   : > { %v757_v0 = vld [vmem:[%s6997_s13 + $0x10] sm:$0xff]  ;;  %v755_v1 = vld [vmem:[%s6997_s13] sm:$0xff]  ;;  %p606_p11 = scmp.lt.s32.totalorder %s5486_s21, 1  ;;  %v7005_v2 = vmov 0   ;;  %v758_v3 = vld [vmem:[%s6997_s13 + $0x18] sm:$0xff]  ;;  %s7032_s2 = sld [smem:[#allocation56_spill]] }
  0x1d   : > { %5011 = vset.pattern.permute.xlu1 %v7005_v2  ;;  %5010 = vset.pattern.permute.xlu0 %v7005_v2  ;;  %v756_v4 = vld [vmem:[%s6997_s13 + $0x8] sm:$0xff]  ;;  %v759_v9 = vld [vmem:[%s6997_s13 + $0x20] sm:$0xff]  ;;  %v762_v23 = vld [vmem:[%s6997_s13 + $0x38] sm:$0xff]  ;;  %vm1194_vm0 = vcmask 1040384   ;;  %s7033_s3 = sld [smem:[#allocation57_spill]]  ;;  %vm1195_vm1 = vcmask 1041408  }
  0x1e   : > { %864 = vperm.xlu1 %5011, %v757_v0   ;;  %854 = vperm.xlu0 %5010, %v755_v1   ;;  %s5646_s27 = scalar_select %p606_p11, %s5486_s21, 1  ;;  %v760_v5 = vld [vmem:[%s6997_s13 + $0x28] sm:$0xff]  ;;  %v761_v26 = vld [vmem:[%s6997_s13 + $0x30] sm:$0xff]  ;;  %v763_v47 = vld [vmem:[%s6997_s13 + $0x40] sm:$0xff]  ;;  %v5497_v61 = vmov 65535   ;;  %vm912_vm2 = vcmask 523264  }
  0x1f   : > { %957 = vmatprep.mubr.bf16.mxu0 %v7005_v2  ;;  %1030 = vmatprep.mubr.bf16.mxu1 %v7005_v2  ;;  %v764_v46 = vld [vmem:[%s6997_s13 + $0x48] sm:$0xff]  ;;  %v766_v57 = vld [vmem:[%s6997_s13 + $0x58] sm:$0xff]  ;;  %v765_v59 = vld [vmem:[%s6997_s13 + $0x50] sm:$0xff]  ;;  %v1196_v62 = vsel %vm1194_vm0, 4294967295, %v5497_v61  ;;  %s7034_s4 = sld [smem:[#allocation58_spill]]  ;;  %vm1181_vm3 = vcmask 23552  }
  0x20   : > { %s5657_s18 = sshll.u32 %s5646_s27, 8  ;;  %s7004_s17 = sshll.u32 %s5646_s27, 4  ;;  %v768_v0 = vld [vmem:[%s6997_s13 + $0x68] sm:$0xff]  ;;  %vm1678_vm4 = vcmask 1044480  }
  0x21   : > { %v808_v61 = vld [vmem:[%s6997_s13 + $0x1a8] sm:$0xff]  ;;  %s6042_s24 = scalar_lea.vmem %s6984_s0, %s5657_s18 }
  0x22   : > { %s5663_s16 = scalar_lea.vmem %s7032_s2, %s5657_s18  ;;  %869 = vperm.xlu1 %5011, %v758_v3   ;;  %859 = vperm.xlu0 %5010, %v756_v4   ;;  %v1197_v3 = vsel %vm1195_vm1, %v1196_v62, 0  ;;  %v807_v62 = vld [vmem:[%s6997_s13 + $0x1a0] sm:$0xff]  ;;  %s591_s2 = sand.u32 1, %s5478_s19  }
  0x23   : > { %v722_v6 = vld [vmem:[%s5663_s16 + $0x8] sm:$0xff]  ;;  %v724_v8 = vld [vmem:[%s5663_s16 + $0x18] sm:$0xff]  ;;  %v721_v12 = vld [vmem:[%s5663_s16] sm:$0xff]  ;;  %s6933_s20 = scalar_lea.sflag [#allocation3], %s591_s2 }
  0x24   : > { %v726_v7 = vld [vmem:[%s5663_s16 + $0x28] sm:$0xff]  ;;  %v728_v11 = vld [vmem:[%s5663_s16 + $0x38] sm:$0xff]  ;;  %v725_v13 = vld [vmem:[%s5663_s16 + $0x20] sm:$0xff] }
  0x25   : > { %v829_v10 = vpack.c.bf16 %v726_v7, %v722_v6  ;;  %v831_v14 = vpack.c.bf16 %v728_v11, %v724_v8  ;;  %v828_v15 = vpack.c.bf16 %v725_v13, %v721_v12  ;;  %v723_v16 = vld [vmem:[%s5663_s16 + $0x10] sm:$0xff]  ;;  %v730_v18 = vld [vmem:[%s5663_s16 + $0x48] sm:$0xff]  ;;  %v732_v21 = vld [vmem:[%s5663_s16 + $0x58] sm:$0xff] }
  0x26   : > { %v727_v17 = vld [vmem:[%s5663_s16 + $0x30] sm:$0xff]  ;;  %v734_v20 = vld [vmem:[%s5663_s16 + $0x68] sm:$0xff]  ;;  %v736_v22 = vld [vmem:[%s5663_s16 + $0x78] sm:$0xff]  ;;  %879 = vperm.xlu1 %5011, %v760_v5   ;;  %874 = vperm.xlu0 %5010, %v759_v9  }
  0x27   : > { %925 = vmatprep.subr.bf16.mxu0 %v829_v10  ;;  %v830_v19 = vpack.c.bf16 %v727_v17, %v723_v16  ;;  %998 = vmatprep.subr.bf16.mxu1 %v831_v14  ;;  %v833_v24 = vpack.c.bf16 %v734_v20, %v730_v18  ;;  %v835_v25 = vpack.c.bf16 %v736_v22, %v732_v21  ;;  %v729_v27 = vld [vmem:[%s5663_s16 + $0x40] sm:$0xff]  ;;  %v731_v29 = vld [vmem:[%s5663_s16 + $0x50] sm:$0xff]  ;;  %v738_v32 = vld [vmem:[%s5663_s16 + $0x88] sm:$0xff] }
  0x28   : > { %v733_v28 = vld [vmem:[%s5663_s16 + $0x60] sm:$0xff]  ;;  %926 = vmatpush1.bf16.msra.mxu0 %v828_v15  ;;  %v735_v31 = vld [vmem:[%s5663_s16 + $0x70] sm:$0xff]  ;;  %v742_v33 = vld [vmem:[%s5663_s16 + $0xa8] sm:$0xff] }
  0x29   : > { %v832_v30 = vpack.c.bf16 %v733_v28, %v729_v27  ;;  %999 = vmatpush1.bf16.msra.mxu1 %v830_v19  ;;  %927 = vmatprep.subr.bf16.mxu0 %v833_v24  ;;  %v834_v34 = vpack.c.bf16 %v735_v31, %v731_v29  ;;  %v837_v35 = vpack.c.bf16 %v742_v33, %v738_v32  ;;  %v740_v36 = vld [vmem:[%s5663_s16 + $0x98] sm:$0xff]  ;;  %v737_v38 = vld [vmem:[%s5663_s16 + $0x80] sm:$0xff]  ;;  %v739_v41 = vld [vmem:[%s5663_s16 + $0x90] sm:$0xff] }
  0x2a   : > { %v744_v37 = vld [vmem:[%s5663_s16 + $0xb8] sm:$0xff]  ;;  %1000 = vmatprep.subr.bf16.mxu1 %v835_v25  ;;  %v741_v40 = vld [vmem:[%s5663_s16 + $0xa0] sm:$0xff]  ;;  %v743_v42 = vld [vmem:[%s5663_s16 + $0xb0] sm:$0xff]  ;;  %889 = vperm.xlu1 %5011, %v762_v23  }
  0x2b   : > { %v839_v39 = vpack.c.bf16 %v744_v37, %v740_v36  ;;  %v746_v43 = vld [vmem:[%s5663_s16 + $0xc8] sm:$0xff]  ;;  %v748_v45 = vld [vmem:[%s5663_s16 + $0xd8] sm:$0xff]  ;;  %884 = vperm.xlu0 %5010, %v761_v26   ;;  %v836_v48 = vpack.c.bf16 %v741_v40, %v737_v38  ;;  %v838_v50 = vpack.c.bf16 %v743_v42, %v739_v41  ;;  %v745_v52 = vld [vmem:[%s5663_s16 + $0xc0] sm:$0xff] }
  0x2c   : > { %v750_v44 = vld [vmem:[%s5663_s16 + $0xe8] sm:$0xff]  ;;  %928 = vmatpush1.bf16.msra.mxu0 %v832_v30  ;;  %v752_v49 = vld [vmem:[%s5663_s16 + $0xf8] sm:$0xff]  ;;  %v749_v53 = vld [vmem:[%s5663_s16 + $0xe0] sm:$0xff] }
  0x2d   : > { %1001 = vmatpush1.bf16.msra.mxu1 %v834_v34  ;;  %929 = vmatprep.subr.bf16.mxu0 %v837_v35  ;;  %v841_v51 = vpack.c.bf16 %v750_v44, %v746_v43  ;;  %v747_v54 = vld [vmem:[%s5663_s16 + $0xd0] sm:$0xff]  ;;  %v843_v55 = vpack.c.bf16 %v752_v49, %v748_v45  ;;  %v840_v58 = vpack.c.bf16 %v749_v53, %v745_v52  ;;  %v5012_v63 = vld [vmem:[%s7034_s4] sm:$0xff]   ;;  %v770_v12 = vld [vmem:[%s6997_s13 + $0x78] sm:$0xff] }
  0x2e   : > { %1002 = vmatprep.subr.bf16.mxu1 %v839_v39  ;;  %v751_v56 = vld [vmem:[%s5663_s16 + $0xf0] sm:$0xff]  ;;  %1128 = vperm.xlu1 %5011, %v764_v46   ;;  %s5727_s16 = scalar_lea.vmem %s7033_s3, %s7004_s17  ;;  %v767_v5 = vld [vmem:[%s6997_s13 + $0x60] sm:$0xff]  ;;  %v5013_v18 = vld [vmem:[%s7034_s4 + $0x8] sm:$0xff]   ;;  %s5983_s17 = scalar_lea.vmem %s6985_s1, %s5657_s18 }
  0x2f   : > { %1123 = vperm.xlu0 %5010, %v763_v47   ;;  %v842_v60 = vpack.c.bf16 %v751_v56, %v747_v54  ;;  %v753_v1 = vld [vmem:[%s5727_s16] sm:$0x77]  ;;  %v754_v4 = vld [vmem:[%s5727_s16 + $0x8] sm:$0x77]  ;;  %v769_v14 = vld [vmem:[%s6997_s13 + $0x70] sm:$0xff]  ;;  %s6623_s3 = sshll.u32 %s591_s2, 8 }
  0x30   : > { %930 = vmatpush1.bf16.msra.mxu0 %v836_v48  ;;  %v5741_v6 = vcombine.high %v753_v1, %v753_v1  ;;  %v5743_v7 = vcombine.high %v754_v4, %v754_v4  ;;  %v1109_v8 = vpack.c.bf16 %v753_v1, %v753_v1  ;;  %v1111_v9 = vpack.c.bf16 %v754_v4, %v754_v4  ;;  %v772_v19 = vld [vmem:[%s6997_s13 + $0x88] sm:$0xff]  ;;  %v771_v20 = vld [vmem:[%s6997_s13 + $0x80] sm:$0xff]  ;;  %v774_v21 = vld [vmem:[%s6997_s13 + $0x98] sm:$0xff]  ;;  %s6653_s22 = scalar_lea.vmem [#allocation2], %s6623_s3 }
  0x31   : > { %1003 = vmatpush1.bf16.msra.mxu1 %v838_v50  ;;  %931 = vmatprep.subr.bf16.mxu0 %v841_v51  ;;  %v773_v22 = vld [vmem:[%s6997_s13 + $0x90] sm:$0xff]  ;;  %v776_v24 = vld [vmem:[%s6997_s13 + $0xa8] sm:$0xff]  ;;  %v775_v25 = vld [vmem:[%s6997_s13 + $0xa0] sm:$0xff] }
  0x32   : > { %1004 = vmatprep.subr.bf16.mxu1 %v843_v55  ;;  %1138 = vperm.xlu1 %5011, %v766_v57   ;;  %v1110_v10 = vpack.c.bf16 %v5741_v6, %v5741_v6  ;;  %v1112_v11 = vpack.c.bf16 %v5743_v7, %v5743_v7  ;;  %v1199_v13 = vand.u32 %v1197_v3, %v1109_v8  ;;  %v5014_v23 = vld [vmem:[%s7034_s4 + $0x10] sm:$0xff]   ;;  %v778_v27 = vld [vmem:[%s6997_s13 + $0xb8] sm:$0xff]  ;;  %v788_v29 = vld [vmem:[%s6997_s13 + $0x108] sm:$0xff] }
  0x33   : > { %1133 = vperm.xlu0 %5010, %v765_v59   ;;  %v1205_v17 = vand.u32 %v1197_v3, %v1111_v9  ;;  %v777_v26 = vld [vmem:[%s6997_s13 + $0xb0] sm:$0xff]  ;;  %v5015_v28 = vld [vmem:[%s7034_s4 + $0x18] sm:$0xff]   ;;  %v787_v30 = vld [vmem:[%s6997_s13 + $0x100] sm:$0xff] }
  0x34   : > { %932 = vmatpush1.bf16.msra.mxu0 %v840_v58  ;;  %v1202_v15 = vand.u32 %v1197_v3, %v1110_v10  ;;  %v1208_v16 = vand.u32 %v1197_v3, %v1112_v11  ;;  %v790_v31 = vld [vmem:[%s6997_s13 + $0x118] sm:$0xff]  ;;  %v789_v32 = vld [vmem:[%s6997_s13 + $0x110] sm:$0xff]  ;;  %v5018_v33 = vld [vmem:[%s6989_s5] sm:$0xff]  }
  0x35   : > { %1005 = vmatpush1.bf16.msra.mxu1 %v842_v60  ;;  %v792_v34 = vld [vmem:[%s6997_s13 + $0x128] sm:$0xff]  ;;  %v791_v35 = vld [vmem:[%s6997_s13 + $0x120] sm:$0xff]  ;;  %v794_v36 = vld [vmem:[%s6997_s13 + $0x138] sm:$0xff] }
  0x36   : > { %1148 = vperm.xlu1 %5011, %v768_v0   ;;  %1210 = vmatprep.subr.bf16.mxu0 %v1202_v15  ;;  %v793_v37 = vld [vmem:[%s6997_s13 + $0x130] sm:$0xff]  ;;  %v5019_v38 = vld [vmem:[%s6989_s5 + $0x8] sm:$0xff]   ;;  %v779_v40 = vld [vmem:[%s6997_s13 + $0xc0] sm:$0xff] }
  0x37   : > { %4582 = vmatmul.mubr.msk.bf16.vlgmr.msra.gmra.mrb[0].mxu0 %vm912_vm2, %v5012_v63  ;;  %1143 = vperm.xlu0 %5010, %v767_v5   ;;  %v780_v39 = vld [vmem:[%s6997_s13 + $0xc8] sm:$0xff]  ;;  %v782_v41 = vld [vmem:[%s6997_s13 + $0xd8] sm:$0xff]  ;;  %v781_v42 = vld [vmem:[%s6997_s13 + $0xd0] sm:$0xff] }
  0x38   : > { %4586 = vmatmul.mubr.msk.bf16.vlgmr.msra.gmra.mrb[0].mxu1 %vm912_vm2, %v5012_v63  ;;  %967 = vmatprep.mubr.bf16.mxu0 %v7005_v2  ;;  %v5020_v43 = vld [vmem:[%s6989_s5 + $0x10] sm:$0xff]   ;;  %v784_v44 = vld [vmem:[%s6997_s13 + $0xe8] sm:$0xff]  ;;  %v783_v45 = vld [vmem:[%s6997_s13 + $0xe0] sm:$0xff] }
  0x39   : > { %1040 = vmatprep.mubr.bf16.mxu1 %v7005_v2  ;;  %1283 = vmatprep.subr.bf16.mxu1 %v1208_v16  ;;  %v786_v46 = vld [vmem:[%s6997_s13 + $0xf8] sm:$0xff]  ;;  %v785_v47 = vld [vmem:[%s6997_s13 + $0xf0] sm:$0xff]  ;;  %v796_v49 = vld [vmem:[%s6997_s13 + $0x148] sm:$0xff] }
  0x3a   : > { %1158 = vperm.xlu1 %5011, %v770_v12   ;;  %1211 = vmatpush1.bf16.msra.mxu0 %v1199_v13  ;;  %v5021_v48 = vld [vmem:[%s6989_s5 + $0x18] sm:$0xff]   ;;  %v795_v50 = vld [vmem:[%s6997_s13 + $0x140] sm:$0xff]  ;;  %v797_v52 = vld [vmem:[%s6997_s13 + $0x150] sm:$0xff] }
  0x3b   : > { %1153 = vperm.xlu0 %5010, %v769_v14   ;;  %1284 = vmatpush1.bf16.msra.mxu1 %v1205_v17  ;;  %v798_v51 = vld [vmem:[%s6997_s13 + $0x158] sm:$0xff]  ;;  %v800_v53 = vld [vmem:[%s6997_s13 + $0x168] sm:$0xff]  ;;  %v799_v54 = vld [vmem:[%s6997_s13 + $0x160] sm:$0xff] }
  0x3c   : > { %v802_v55 = vld [vmem:[%s6997_s13 + $0x178] sm:$0xff]  ;;  %v801_v56 = vld [vmem:[%s6997_s13 + $0x170] sm:$0xff]  ;;  %v804_v57 = vld [vmem:[%s6997_s13 + $0x188] sm:$0xff] }
  0x3d   : > { %v803_v58 = vld [vmem:[%s6997_s13 + $0x180] sm:$0xff]  ;;  %v806_v59 = vld [vmem:[%s6997_s13 + $0x198] sm:$0xff]  ;;  %v805_v60 = vld [vmem:[%s6997_s13 + $0x190] sm:$0xff] }
  0x3e   : > { %1435 = vperm.xlu1 %5011, %v772_v19   ;;  %v810_v63 = vld [vmem:[%s6997_s13 + $0x1b8] sm:$0xff]  ;;  %v809_v0 = vld [vmem:[%s6997_s13 + $0x1b0] sm:$0xff]  ;;  %v812_v1 = vld [vmem:[%s6997_s13 + $0x1c8] sm:$0xff] }
  0x3f   : > { %4583 = vmatmul.mubr.msk.bf16.gmra.mrb[4].mxu0 %vm912_vm2, %v5013_v18  ;;  %1430 = vperm.xlu0 %5010, %v771_v20   ;;  %v811_v3 = vld [vmem:[%s6997_s13 + $0x1c0] sm:$0xff]  ;;  %v814_v4 = vld [vmem:[%s6997_s13 + $0x1d8] sm:$0xff]  ;;  %v813_v5 = vld [vmem:[%s6997_s13 + $0x1d0] sm:$0xff] }
  0x40   : > { %4587 = vmatmul.mubr.msk.bf16.gmra.mrb[4].mxu1 %vm912_vm2, %v5013_v18  ;;  %977 = vmatprep.mubr.bf16.mxu0 %v7005_v2  ;;  %v816_v8 = vld [vmem:[%s6997_s13 + $0x1e8] sm:$0xff]  ;;  %v815_v9 = vld [vmem:[%s6997_s13 + $0x1e0] sm:$0xff]  ;;  %v818_v10 = vld [vmem:[%s6997_s13 + $0x1f8] sm:$0xff] }
  0x41   : > { %1050 = vmatprep.mubr.bf16.mxu1 %v7005_v2  ;;  %v817_v11 = vld [vmem:[%s6997_s13 + $0x1f0] sm:$0xff]  ;;  %v820_v12 = vld [vmem:[%s6997_s13 + $0x208] sm:$0xff]  ;;  %v819_v13 = vld [vmem:[%s6997_s13 + $0x200] sm:$0xff] }
  0x42   : > { %1445 = vperm.xlu1 %5011, %v774_v21   ;;  %v822_v14 = vld [vmem:[%s6997_s13 + $0x218] sm:$0xff]  ;;  %v821_v15 = vld [vmem:[%s6997_s13 + $0x210] sm:$0xff]  ;;  %v824_v16 = vld [vmem:[%s6997_s13 + $0x228] sm:$0xff] }
  0x43   : > { %1440 = vperm.xlu0 %5010, %v773_v22   ;;  %v823_v17 = vld [vmem:[%s6997_s13 + $0x220] sm:$0xff]  ;;  %v826_v18 = vld [vmem:[%s6997_s13 + $0x238] sm:$0xff]  ;;  %v825_v19 = vld [vmem:[%s6997_s13 + $0x230] sm:$0xff] }
  0x44   : > { %v827_v20 = vld [vmem:[%s6997_s13 + $0x240] sm:$0xff] }
  0x46   : > { %1455 = vperm.xlu1 %5011, %v776_v24  }
  0x47   : > { %4584 = vmatmul.mubr.msk.bf16.gmra.mrb[8].mxu0 %vm912_vm2, %v5014_v23  ;;  %1450 = vperm.xlu0 %5010, %v775_v25  }
  0x48   : > { %4588 = vmatmul.mubr.msk.bf16.gmra.mrb[8].mxu1 %vm912_vm2, %v5014_v23  ;;  %987 = vmatprep.mubr.bf16.mxu0 %v7005_v2 }
  0x49   : > { %1060 = vmatprep.mubr.bf16.mxu1 %v7005_v2 }
  0x4a   : > { %1460 = vperm.xlu1 %5011, %v777_v26  }
  0x4b   : > { %1465 = vperm.xlu0 %5010, %v778_v27  }
  0x4e   : > { %1786 = vperm.xlu1 %5011, %v788_v29  }
  0x4f   : > { %4585 = vmatmul.mubr.msk.bf16.gmra.mrb[12].mxu0 %vm912_vm2, %v5015_v28  ;;  %1781 = vperm.xlu0 %5010, %v787_v30  }
  0x50   : > { %4589 = vmatmul.mubr.msk.bf16.gmra.mrb[12].mxu1 %vm912_vm2, %v5015_v28  ;;  %1242 = vmatprep.mubr.bf16.mxu0 %v7005_v2 }
  0x51   : > { %1315 = vmatprep.mubr.bf16.mxu1 %v7005_v2 }
  0x52   : > { %1796 = vperm.xlu1 %5011, %v790_v31  }
  0x53   : > { %1791 = vperm.xlu0 %5010, %v789_v32  }
  0x56   : > { %1806 = vperm.xlu1 %5011, %v792_v34  }
  0x57   : > { %4594 = vmatmul.mubr.msk.bf16.vlgmr.msra.gmra.mrb[16].mxu0 %vm1181_vm3, %v5018_v33  ;;  %1801 = vperm.xlu0 %5010, %v791_v35  }
  0x58   : > { %4598 = vmatmul.mubr.msk.bf16.vlgmr.msra.gmra.mrb[16].mxu1 %vm1181_vm3, %v5018_v33  ;;  %1252 = vmatprep.mubr.bf16.mxu0 %v7005_v2 }
  0x59   : > { %1325 = vmatprep.mubr.bf16.mxu1 %v7005_v2 }
  0x5a   : > { %1816 = vperm.xlu1 %5011, %v794_v36  }
  0x5b   : > { %1811 = vperm.xlu0 %5010, %v793_v37  }
  0x5e   : > { %1746 = vperm.xlu1 %5011, %v780_v39  }
  0x5f   : > { %4595 = vmatmul.mubr.msk.bf16.gmra.mrb[20].mxu0 %vm1181_vm3, %v5019_v38  ;;  %1741 = vperm.xlu0 %5010, %v779_v40  }
  0x60   : > { %4599 = vmatmul.mubr.msk.bf16.gmra.mrb[20].mxu1 %vm1181_vm3, %v5019_v38  ;;  %1262 = vmatprep.mubr.bf16.mxu0 %v7005_v2 }
  0x61   : > { %1335 = vmatprep.mubr.bf16.mxu1 %v7005_v2 }
  0x62   : > { %1756 = vperm.xlu1 %5011, %v782_v41  }
  0x63   : > { %1751 = vperm.xlu0 %5010, %v781_v42  }
  0x66   : > { %1766 = vperm.xlu1 %5011, %v784_v44  }
  0x67   : > { %4596 = vmatmul.mubr.msk.bf16.gmra.mrb[24].mxu0 %vm1181_vm3, %v5020_v43  ;;  %1761 = vperm.xlu0 %5010, %v783_v45  }
  0x68   : > { %4600 = vmatmul.mubr.msk.bf16.gmra.mrb[24].mxu1 %vm1181_vm3, %v5020_v43  ;;  %1272 = vmatprep.mubr.bf16.mxu0 %v7005_v2 }
  0x69   : > { %1345 = vmatprep.mubr.bf16.mxu1 %v7005_v2 }
  0x6a   : > { %1776 = vperm.xlu1 %5011, %v786_v46  }
  0x6b   : > { %1771 = vperm.xlu0 %5010, %v785_v47  }
  0x6e   : > { %1826 = vperm.xlu1 %5011, %v796_v49  }
  0x6f   : > { %4597 = vmatmul.mubr.msk.bf16.gmra.mrb[28].mxu0 %vm1181_vm3, %v5021_v48  ;;  %1821 = vperm.xlu0 %5010, %v795_v50  }
  0x70   : > { %4601 = vmatmul.mubr.msk.bf16.gmra.mrb[28].mxu1 %vm1181_vm3, %v5021_v48  ;;  %1524 = vmatprep.mubr.bf16.mxu0 %v7005_v2 }
  0x71   : > { %1597 = vmatprep.mubr.bf16.mxu1 %v7005_v2 }
  0x72   : > { %1836 = vperm.xlu1 %5011, %v798_v51  }
  0x73   : > { %1831 = vperm.xlu0 %5010, %v797_v52  }
  0x76   : > { %1846 = vperm.xlu1 %5011, %v800_v53  }
  0x77   : > { %1841 = vperm.xlu0 %5010, %v799_v54  }
  0x7a   : > { %1856 = vperm.xlu1 %5011, %v802_v55  }
  0x7b   : > { %1851 = vperm.xlu0 %5010, %v801_v56  }
  0x7e   : > { %3440 = vperm.xlu1 %5011, %v804_v57  }
  0x7f   : > { %3435 = vperm.xlu0 %5010, %v803_v58  }
  0x82   : > { %3450 = vperm.xlu1 %5011, %v806_v59  }
  0x83   : > { %3445 = vperm.xlu0 %5010, %v805_v60  }
  0x86   : > { %3460 = vperm.xlu1 %5011, %v808_v61  }
  0x87   : > { %3455 = vperm.xlu0 %5010, %v807_v62  }
  0x8a   : > { %3470 = vperm.xlu1 %5011, %v810_v63  }
  0x8b   : > { %3465 = vperm.xlu0 %5010, %v809_v0  }
  0x8e   : > { %3480 = vperm.xlu1 %5011, %v812_v1  }
  0x8f   : > { %3475 = vperm.xlu0 %5010, %v811_v3  }
  0x92   : > { %3490 = vperm.xlu1 %5011, %v814_v4  }
  0x93   : > { %3485 = vperm.xlu0 %5010, %v813_v5  }
  0x96   : > { %3500 = vperm.xlu1 %5011, %v816_v8  }
  0x97   : > { %3495 = vperm.xlu0 %5010, %v815_v9  }
  0x9a   : > { %3510 = vperm.xlu1 %5011, %v818_v10  }
  0x9b   : > { %3505 = vperm.xlu0 %5010, %v817_v11  }
  0x9d   : > { %v855_v21 = vpop.permute.xlu0 %854  ;;  %v865_v22 = vpop.permute.xlu1 %864 }
  0x9e   : > { %4011 = vperm.xlu1 %5011, %v820_v12  }
  0x9f   : > { %4006 = vperm.xlu0 %5010, %v819_v13  }
  0xa1   : > { %v860_v24 = vpop.permute.xlu0 %859  ;;  %v870_v54 = vpop.permute.xlu1 %869 }
  0xa2   : > { %4021 = vperm.xlu1 %5011, %v822_v14  }
  0xa3   : > { %4016 = vperm.xlu0 %5010, %v821_v15  }
  0xa6   : > { %4031 = vperm.xlu1 %5011, %v824_v16  }
  0xa7   : > { %4026 = vperm.xlu0 %5010, %v823_v17  }
  0xaa   : > { %4041 = vperm.xlu1 %5011, %v826_v18   ;;  %v875_v18 = vpop.permute.xlu0 %874 }
  0xab   : > { %4036 = vperm.xlu0 %5010, %v825_v19  }
  0xaf   : > { %4265 = vperm.xlu0 %5010, %v827_v20  }
 0x10a   : > { %v959_v23 = vpop.f32.mrb[0].mxu0 }
 0x10b   : > { %v1032_v25 = vpop.f32.mrb[0].mxu1  ;;  %v960_v26 = vadd.f32 %v959_v23, %v855_v21  ;;  %v961_v28 = vpop.f32.mrb[1].mxu0 }
 0x10c   : > { %v1033_v27 = vadd.f32 %v1032_v25, %v855_v21  ;;  %v1034_v29 = vpop.f32.mrb[1].mxu1  ;;  %v962_v30 = vadd.f32 %v961_v28, %v855_v21  ;;  %v963_v32 = vpop.f32.mrb[2].mxu0 }
 0x10d   : > { %v1035_v31 = vadd.f32 %v1034_v29, %v855_v21  ;;  %v1036_v33 = vpop.f32.mrb[2].mxu1  ;;  %v964_v34 = vadd.f32 %v963_v32, %v860_v24  ;;  %v965_v36 = vpop.f32.mrb[3].mxu0  ;;  %v1071_v40 = vmax.f32 %v960_v26, 0.0 }
 0x10e   : > { %v1037_v35 = vadd.f32 %v1036_v33, %v860_v24  ;;  %v1038_v37 = vpop.f32.mrb[3].mxu1  ;;  %v966_v38 = vadd.f32 %v965_v36, %v860_v24  ;;  %v1073_v41 = vmax.f32 %v1033_v27, 0.0  ;;  %v1072_v44 = vmax.f32 %v962_v30, 0.0 }
 0x10f   : > { %v1039_v39 = vadd.f32 %v1038_v37, %v860_v24  ;;  %v1075_v42 = vmax.f32 %v964_v34, 0.0  ;;  %v1074_v45 = vmax.f32 %v1035_v31, 0.0 }
 0x110   : > { %v1077_v43 = vmax.f32 %v1037_v35, 0.0  ;;  %v1076_v46 = vmax.f32 %v966_v38, 0.0 }
 0x111   : > { %v1078_v47 = vmax.f32 %v1039_v39, 0.0  ;;  %v1388_v48 = vpack.c.bf16 %v1075_v42, %v1071_v40 }
 0x112   : > { %v1390_v49 = vpack.c.bf16 %v1077_v43, %v1073_v41  ;;  %v969_v50 = vpop.f32.mrb[4].mxu0  ;;  %v1389_v51 = vpack.c.bf16 %v1076_v46, %v1072_v44 }
 0x113   : > { %v1391_v52 = vpack.c.bf16 %v1078_v47, %v1074_v45  ;;  %v1042_v53 = vpop.f32.mrb[4].mxu1  ;;  %v970_v55 = vadd.f32 %v969_v50, %v865_v22  ;;  %v971_v56 = vpop.f32.mrb[5].mxu0 }
 0x114   : > { %v1043_v57 = vadd.f32 %v1042_v53, %v865_v22  ;;  %v972_v58 = vadd.f32 %v971_v56, %v865_v22  ;;  %v1044_v59 = vpop.f32.mrb[5].mxu1  ;;  %v973_v60 = vpop.f32.mrb[6].mxu0  ;;  %1492 = vmatprep.subr.bf16.mxu0 %v1389_v51 }
 0x115   : > { %1565 = vmatprep.subr.bf16.mxu1 %v1391_v52  ;;  %v1045_v61 = vadd.f32 %v1044_v59, %v865_v22  ;;  %v974_v62 = vadd.f32 %v973_v60, %v870_v54  ;;  %v1046_v63 = vpop.f32.mrb[6].mxu1  ;;  %v975_v0 = vpop.f32.mrb[7].mxu0  ;;  %1493 = vmatpush1.bf16.msra.mxu0 %v1388_v48  ;;  %v1079_v5 = vmax.f32 %v970_v55, 0.0 }
 0x116   : > { %1566 = vmatpush1.bf16.msra.mxu1 %v1390_v49  ;;  %v1047_v1 = vadd.f32 %v1046_v63, %v870_v54  ;;  %v976_v3 = vadd.f32 %v975_v0, %v870_v54  ;;  %v1048_v4 = vpop.f32.mrb[7].mxu1  ;;  %v1081_v10 = vmax.f32 %v1043_v57, 0.0  ;;  %v1080_v11 = vmax.f32 %v972_v58, 0.0  ;;  %v880_v22 = vpop.permute.xlu1 %879 }
 0x117   : > { %v1083_v8 = vmax.f32 %v974_v62, 0.0  ;;  %v1049_v9 = vadd.f32 %v1048_v4, %v870_v54  ;;  %v1082_v14 = vmax.f32 %v1045_v61, 0.0  ;;  %v885_v48 = vpop.permute.xlu0 %884 }
 0x118   : > { %v1085_v12 = vmax.f32 %v1047_v1, 0.0  ;;  %v1084_v13 = vmax.f32 %v976_v3, 0.0 }
 0x119   : > { %v1392_v15 = vpack.c.bf16 %v1083_v8, %v1079_v5  ;;  %v1086_v16 = vmax.f32 %v1049_v9, 0.0 }
 0x11a   : > { %v979_v17 = vpop.f32.mrb[8].mxu0  ;;  %v1394_v19 = vpack.c.bf16 %v1085_v12, %v1081_v10  ;;  %v1393_v20 = vpack.c.bf16 %v1084_v13, %v1080_v11  ;;  %v890_v52 = vpop.permute.xlu1 %889 }
 0x11b   : > { %v1052_v21 = vpop.f32.mrb[8].mxu1  ;;  %v1395_v23 = vpack.c.bf16 %v1086_v16, %v1082_v14  ;;  %v980_v24 = vadd.f32 %v979_v17, %v875_v18  ;;  %v981_v25 = vpop.f32.mrb[9].mxu0 }
 0x11c   : > { %v1053_v26 = vadd.f32 %v1052_v21, %v875_v18  ;;  %v982_v27 = vadd.f32 %v981_v25, %v875_v18  ;;  %v1054_v28 = vpop.f32.mrb[9].mxu1  ;;  %v983_v29 = vpop.f32.mrb[10].mxu0  ;;  %1494 = vmatprep.subr.bf16.mxu0 %v1393_v20 }
 0x11d   : > { %v1055_v30 = vadd.f32 %v1054_v28, %v875_v18  ;;  %v984_v31 = vadd.f32 %v983_v29, %v880_v22  ;;  %v1056_v32 = vpop.f32.mrb[10].mxu1  ;;  %1567 = vmatprep.subr.bf16.mxu1 %v1395_v23  ;;  %v985_v33 = vpop.f32.mrb[11].mxu0  ;;  %1495 = vmatpush1.bf16.msra.mxu0 %v1392_v15  ;;  %v1087_v37 = vmax.f32 %v980_v24, 0.0 }
 0x11e   : > { %v1057_v34 = vadd.f32 %v1056_v32, %v880_v22  ;;  %v986_v35 = vadd.f32 %v985_v33, %v880_v22  ;;  %v1058_v36 = vpop.f32.mrb[11].mxu1  ;;  %1568 = vmatpush1.bf16.msra.mxu1 %v1394_v19  ;;  %v1089_v40 = vmax.f32 %v1053_v26, 0.0  ;;  %v1088_v41 = vmax.f32 %v982_v27, 0.0  ;;  %v1129_v13 = vpop.permute.xlu1 %1128 }
 0x11f   : > { %v1091_v38 = vmax.f32 %v984_v31, 0.0  ;;  %v1059_v39 = vadd.f32 %v1058_v36, %v880_v22  ;;  %v1090_v44 = vmax.f32 %v1055_v30, 0.0  ;;  %v1124_v18 = vpop.permute.xlu0 %1123 }
 0x120   : > { %v1093_v42 = vmax.f32 %v1057_v34, 0.0  ;;  %v1092_v43 = vmax.f32 %v986_v35, 0.0 }
 0x121   : > { %v1396_v45 = vpack.c.bf16 %v1091_v38, %v1087_v37  ;;  %v1094_v46 = vmax.f32 %v1059_v39, 0.0 }
 0x122   : > { %v989_v47 = vpop.f32.mrb[12].mxu0  ;;  %v1398_v49 = vpack.c.bf16 %v1093_v42, %v1089_v40  ;;  %v1397_v50 = vpack.c.bf16 %v1092_v43, %v1088_v41  ;;  %v1139_v39 = vpop.permute.xlu1 %1138 }
 0x123   : > { %v1062_v51 = vpop.f32.mrb[12].mxu1  ;;  %v1399_v53 = vpack.c.bf16 %v1094_v46, %v1090_v44  ;;  %v990_v54 = vadd.f32 %v989_v47, %v885_v48  ;;  %v991_v55 = vpop.f32.mrb[13].mxu0 }
 0x124   : > { %v1063_v56 = vadd.f32 %v1062_v51, %v885_v48  ;;  %v992_v57 = vadd.f32 %v991_v55, %v885_v48  ;;  %v1064_v58 = vpop.f32.mrb[13].mxu1  ;;  %v993_v59 = vpop.f32.mrb[14].mxu0  ;;  %1496 = vmatprep.subr.bf16.mxu0 %v1397_v50 }
 0x125   : > { %v1065_v60 = vadd.f32 %v1064_v58, %v885_v48  ;;  %v994_v61 = vadd.f32 %v993_v59, %v890_v52  ;;  %v1066_v62 = vpop.f32.mrb[14].mxu1  ;;  %1569 = vmatprep.subr.bf16.mxu1 %v1399_v53  ;;  %v995_v63 = vpop.f32.mrb[15].mxu0  ;;  %1497 = vmatpush1.bf16.msra.mxu0 %v1396_v45  ;;  %v1095_v4 = vmax.f32 %v990_v54, 0.0 }
 0x126   : > { %v1067_v0 = vadd.f32 %v1066_v62, %v890_v52  ;;  %v996_v1 = vadd.f32 %v995_v63, %v890_v52  ;;  %v1068_v3 = vpop.f32.mrb[15].mxu1  ;;  %1570 = vmatpush1.bf16.msra.mxu1 %v1398_v49  ;;  %v1097_v9 = vmax.f32 %v1063_v56, 0.0  ;;  %v1096_v10 = vmax.f32 %v992_v57, 0.0  ;;  %v1134_v44 = vpop.permute.xlu0 %1133 }
 0x127   : > { %v1099_v5 = vmax.f32 %v994_v61, 0.0  ;;  %v1069_v8 = vadd.f32 %v1068_v3, %v890_v52  ;;  %v1098_v14 = vmax.f32 %v1065_v60, 0.0 }
 0x128   : > { %v1101_v11 = vmax.f32 %v1067_v0, 0.0  ;;  %v1100_v12 = vmax.f32 %v996_v1, 0.0 }
 0x129   : > { %v1400_v15 = vpack.c.bf16 %v1099_v5, %v1095_v4  ;;  %v1102_v16 = vmax.f32 %v1069_v8, 0.0 }
 0x12a   : > { %v1244_v17 = vpop.f32.mrb[16].mxu0  ;;  %v1402_v19 = vpack.c.bf16 %v1101_v11, %v1097_v9  ;;  %v1401_v20 = vpack.c.bf16 %v1100_v12, %v1096_v10  ;;  %v1149_v12 = vpop.permute.xlu1 %1148 }
 0x12b   : > { %v1317_v21 = vpop.f32.mrb[16].mxu1  ;;  %v1403_v22 = vpack.c.bf16 %v1102_v16, %v1098_v14  ;;  %v1245_v23 = vadd.f32 %v1244_v17, %v1124_v18  ;;  %v1246_v24 = vpop.f32.mrb[17].mxu0 }
 0x12c   : > { %v1318_v25 = vadd.f32 %v1317_v21, %v1124_v18  ;;  %v1247_v26 = vadd.f32 %v1246_v24, %v1124_v18  ;;  %v1319_v27 = vpop.f32.mrb[17].mxu1  ;;  %v1248_v28 = vpop.f32.mrb[18].mxu0  ;;  %1498 = vmatprep.subr.bf16.mxu0 %v1401_v20 }
 0x12d   : > { %v1320_v29 = vadd.f32 %v1319_v27, %v1124_v18  ;;  %v1249_v30 = vadd.f32 %v1248_v28, %v1129_v13  ;;  %v1321_v31 = vpop.f32.mrb[18].mxu1  ;;  %1571 = vmatprep.subr.bf16.mxu1 %v1403_v22  ;;  %v1250_v32 = vpop.f32.mrb[19].mxu0  ;;  %1499 = vmatpush1.bf16.msra.mxu0 %v1400_v15  ;;  %v1356_v36 = vmax.f32 %v1245_v23, 0.0 }
 0x12e   : > { %v1322_v33 = vadd.f32 %v1321_v31, %v1129_v13  ;;  %v1251_v34 = vadd.f32 %v1250_v32, %v1129_v13  ;;  %v1323_v35 = vpop.f32.mrb[19].mxu1  ;;  %1572 = vmatpush1.bf16.msra.mxu1 %v1402_v19  ;;  %v1358_v40 = vmax.f32 %v1318_v25, 0.0  ;;  %v1357_v41 = vmax.f32 %v1247_v26, 0.0  ;;  %v1144_v16 = vpop.permute.xlu0 %1143 }
 0x12f   : > { %v1360_v37 = vmax.f32 %v1249_v30, 0.0  ;;  %v1324_v38 = vadd.f32 %v1323_v35, %v1129_v13  ;;  %v1359_v45 = vmax.f32 %v1320_v29, 0.0 }
 0x130   : > { %v1362_v42 = vmax.f32 %v1322_v33, 0.0  ;;  %v1361_v43 = vmax.f32 %v1251_v34, 0.0 }
 0x131   : > { %v1404_v46 = vpack.c.bf16 %v1360_v37, %v1356_v36  ;;  %v1363_v47 = vmax.f32 %v1324_v38, 0.0 }
 0x132   : > { %v1254_v48 = vpop.f32.mrb[20].mxu0  ;;  %v1406_v49 = vpack.c.bf16 %v1362_v42, %v1358_v40  ;;  %v1405_v50 = vpack.c.bf16 %v1361_v43, %v1357_v41  ;;  %v1159_v42 = vpop.permute.xlu1 %1158 }
 0x133   : > { %v1255_v51 = vadd.f32 %v1254_v48, %v1134_v44  ;;  %v1327_v52 = vpop.f32.mrb[20].mxu1  ;;  %v1256_v53 = vpop.f32.mrb[21].mxu0  ;;  %v1407_v54 = vpack.c.bf16 %v1363_v47, %v1359_v45 }
 0x134   : > { %v1328_v55 = vadd.f32 %v1327_v52, %v1134_v44  ;;  %v1257_v56 = vadd.f32 %v1256_v53, %v1134_v44  ;;  %v1329_v57 = vpop.f32.mrb[21].mxu1  ;;  %v1258_v58 = vpop.f32.mrb[22].mxu0  ;;  %1500 = vmatprep.subr.bf16.mxu0 %v1405_v50 }
 0x135   : > { %v1330_v59 = vadd.f32 %v1329_v57, %v1134_v44  ;;  %v1259_v60 = vadd.f32 %v1258_v58, %v1139_v39  ;;  %v1331_v61 = vpop.f32.mrb[22].mxu1  ;;  %v1260_v62 = vpop.f32.mrb[23].mxu0  ;;  %1573 = vmatprep.subr.bf16.mxu1 %v1407_v54  ;;  %1501 = vmatpush1.bf16.msra.mxu0 %v1404_v46  ;;  %v1364_v3 = vmax.f32 %v1255_v51, 0.0 }
 0x136   : > { %v1332_v63 = vadd.f32 %v1331_v61, %v1139_v39  ;;  %v1261_v0 = vadd.f32 %v1260_v62, %v1139_v39  ;;  %v1333_v1 = vpop.f32.mrb[23].mxu1  ;;  %1574 = vmatpush1.bf16.msra.mxu1 %v1406_v49  ;;  %v1366_v8 = vmax.f32 %v1328_v55, 0.0  ;;  %v1365_v9 = vmax.f32 %v1257_v56, 0.0  ;;  %v1154_v46 = vpop.permute.xlu0 %1153 }
 0x137   : > { %v1368_v4 = vmax.f32 %v1259_v60, 0.0  ;;  %v1334_v5 = vadd.f32 %v1333_v1, %v1139_v39  ;;  %v1367_v13 = vmax.f32 %v1330_v59, 0.0 }
 0x138   : > { %v1370_v10 = vmax.f32 %v1332_v63, 0.0  ;;  %v1369_v11 = vmax.f32 %v1261_v0, 0.0 }
 0x139   : > { %v1408_v14 = vpack.c.bf16 %v1368_v4, %v1364_v3  ;;  %v1371_v15 = vmax.f32 %v1334_v5, 0.0  ;;  %v690_v5 = vld [vmem:[%s5983_s17 + $0x8] sm:$0xff] }
 0x13a   : > { %v1410_v17 = vpack.c.bf16 %v1370_v10, %v1366_v8  ;;  %v1409_v18 = vpack.c.bf16 %v1369_v11, %v1365_v9  ;;  %v1264_v19 = vpop.f32.mrb[24].mxu0  ;;  %v694_v8 = vld [vmem:[%s5983_s17 + $0x28] sm:$0xff] }
 0x13b   : > { %v1411_v20 = vpack.c.bf16 %v1371_v15, %v1367_v13  ;;  %v1265_v21 = vadd.f32 %v1264_v19, %v1144_v16  ;;  %v1337_v22 = vpop.f32.mrb[24].mxu1  ;;  %v1266_v23 = vpop.f32.mrb[25].mxu0  ;;  %v692_v13 = vld [vmem:[%s5983_s17 + $0x18] sm:$0xff] }
 0x13c   : > { %v1338_v24 = vadd.f32 %v1337_v22, %v1144_v16  ;;  %v1267_v25 = vadd.f32 %v1266_v23, %v1144_v16  ;;  %v1339_v26 = vpop.f32.mrb[25].mxu1  ;;  %v1268_v27 = vpop.f32.mrb[26].mxu0  ;;  %1502 = vmatprep.subr.bf16.mxu0 %v1409_v18 }
 0x13d   : > { %v1340_v28 = vadd.f32 %v1339_v26, %v1144_v16  ;;  %v1269_v29 = vadd.f32 %v1268_v27, %v1149_v12  ;;  %v1341_v30 = vpop.f32.mrb[26].mxu1  ;;  %1575 = vmatprep.subr.bf16.mxu1 %v1411_v20  ;;  %v1270_v31 = vpop.f32.mrb[27].mxu0  ;;  %1503 = vmatpush1.bf16.msra.mxu0 %v1408_v14  ;;  %v1372_v35 = vmax.f32 %v1265_v21, 0.0  ;;  %v696_v14 = vld [vmem:[%s5983_s17 + $0x38] sm:$0xff]  ;;  %v5022_v20 = vld [vmem:[%s6990_s6] sm:$0xff]   ;;  %v1684_v21 = vpack.c.bf16 %v694_v8, %v690_v5  ;;  %v691_v26 = vld [vmem:[%s5983_s17 + $0x10] sm:$0xff] }
 0x13e   : > { %v1342_v32 = vadd.f32 %v1341_v30, %v1149_v12  ;;  %v1271_v33 = vadd.f32 %v1270_v31, %v1149_v12  ;;  %v1343_v34 = vpop.f32.mrb[27].mxu1  ;;  %1576 = vmatpush1.bf16.msra.mxu1 %v1410_v17  ;;  %v1374_v38 = vmax.f32 %v1338_v24, 0.0  ;;  %v1373_v39 = vmax.f32 %v1267_v25, 0.0  ;;  %v689_v24 = vld [vmem:[%s5983_s17] sm:$0xff]  ;;  %v695_v27 = vld [vmem:[%s5983_s17 + $0x30] sm:$0xff]  ;;  %v700_v30 = vld [vmem:[%s5983_s17 + $0x58] sm:$0xff]  ;;  %v1436_v8 = vpop.permute.xlu1 %1435 }
 0x13f   : > { %v1376_v36 = vmax.f32 %v1269_v29, 0.0  ;;  %v1344_v37 = vadd.f32 %v1343_v34, %v1149_v12  ;;  %v1375_v43 = vmax.f32 %v1340_v28, 0.0  ;;  %v1686_v23 = vpack.c.bf16 %v696_v14, %v692_v13  ;;  %v693_v25 = vld [vmem:[%s5983_s17 + $0x20] sm:$0xff]  ;;  %v698_v28 = vld [vmem:[%s5983_s17 + $0x48] sm:$0xff]  ;;  %v704_v31 = vld [vmem:[%s5983_s17 + $0x78] sm:$0xff] }
 0x140   : > { %v1378_v40 = vmax.f32 %v1342_v32, 0.0  ;;  %v1377_v41 = vmax.f32 %v1271_v33, 0.0  ;;  %v702_v29 = vld [vmem:[%s5983_s17 + $0x68] sm:$0xff]  ;;  %v1683_v32 = vpack.c.bf16 %v693_v25, %v689_v24  ;;  %v1685_v33 = vpack.c.bf16 %v695_v27, %v691_v26 }
 0x141   : > { %v1412_v44 = vpack.c.bf16 %v1376_v36, %v1372_v35  ;;  %v1379_v45 = vmax.f32 %v1344_v37, 0.0  ;;  %v1688_v34 = vpack.c.bf16 %v702_v29, %v698_v28  ;;  %v697_v35 = vld [vmem:[%s5983_s17 + $0x40] sm:$0xff]  ;;  %v1690_v37 = vpack.c.bf16 %v704_v31, %v700_v30 }
 0x142   : > { %v1414_v47 = vpack.c.bf16 %v1378_v40, %v1374_v38  ;;  %v1413_v48 = vpack.c.bf16 %v1377_v41, %v1373_v39  ;;  %v1274_v49 = vpop.f32.mrb[28].mxu0  ;;  %v701_v36 = vld [vmem:[%s5983_s17 + $0x60] sm:$0xff]  ;;  %v699_v38 = vld [vmem:[%s5983_s17 + $0x50] sm:$0xff] }
 0x143   : > { %v1415_v50 = vpack.c.bf16 %v1379_v45, %v1375_v43  ;;  %v1275_v51 = vadd.f32 %v1274_v49, %v1154_v46  ;;  %v1347_v52 = vpop.f32.mrb[28].mxu1  ;;  %v1276_v53 = vpop.f32.mrb[29].mxu0  ;;  %v703_v39 = vld [vmem:[%s5983_s17 + $0x70] sm:$0xff]  ;;  %v1687_v40 = vpack.c.bf16 %v701_v36, %v697_v35  ;;  %v706_v45 = vld [vmem:[%s5983_s17 + $0x88] sm:$0xff]  ;;  %v712_v49 = vld [vmem:[%s5983_s17 + $0xb8] sm:$0xff] }
 0x144   : > { %v1348_v54 = vadd.f32 %v1347_v52, %v1154_v46  ;;  %v1277_v55 = vadd.f32 %v1276_v53, %v1154_v46  ;;  %v1349_v56 = vpop.f32.mrb[29].mxu1  ;;  %v1278_v57 = vpop.f32.mrb[30].mxu0  ;;  %1504 = vmatprep.subr.bf16.mxu0 %v1413_v48  ;;  %v1689_v41 = vpack.c.bf16 %v703_v39, %v699_v38  ;;  %v5024_v43 = vld [vmem:[%s6990_s6 + $0x10] sm:$0xff]  }
 0x145   : > { %v1350_v58 = vadd.f32 %v1349_v56, %v1154_v46  ;;  %v1279_v59 = vadd.f32 %v1278_v57, %v1159_v42  ;;  %v1351_v60 = vpop.f32.mrb[30].mxu1  ;;  %1577 = vmatprep.subr.bf16.mxu1 %v1415_v50  ;;  %v1280_v61 = vpop.f32.mrb[31].mxu0  ;;  %1505 = vmatpush1.bf16.msra.mxu0 %v1412_v44  ;;  %v1380_v1 = vmax.f32 %v1275_v51, 0.0  ;;  %v5025_v44 = vld [vmem:[%s6990_s6 + $0x18] sm:$0x7f]   ;;  %v710_v46 = vld [vmem:[%s5983_s17 + $0xa8] sm:$0xff] }
 0x146   : > { %v1352_v62 = vadd.f32 %v1351_v60, %v1159_v42  ;;  %v1281_v63 = vadd.f32 %v1280_v61, %v1159_v42  ;;  %v1353_v0 = vpop.f32.mrb[31].mxu1  ;;  %1578 = vmatpush1.bf16.msra.mxu1 %v1414_v47  ;;  %v1382_v9 = vmax.f32 %v1348_v54, 0.0  ;;  %v1381_v10 = vmax.f32 %v1277_v55, 0.0  ;;  %v708_v47 = vld [vmem:[%s5983_s17 + $0x98] sm:$0xff]  ;;  %v705_v50 = vld [vmem:[%s5983_s17 + $0x80] sm:$0xff]  ;;  %v707_v54 = vld [vmem:[%s5983_s17 + $0x90] sm:$0xff] }
 0x147   : > { %v1384_v3 = vmax.f32 %v1279_v59, 0.0  ;;  %v1354_v4 = vadd.f32 %v1353_v0, %v1159_v42  ;;  %v1383_v15 = vmax.f32 %v1350_v58, 0.0  ;;  %v5023_v42 = vld [vmem:[%s6990_s6 + $0x8] sm:$0xff]   ;;  %v1692_v48 = vpack.c.bf16 %v710_v46, %v706_v45  ;;  %v709_v51 = vld [vmem:[%s5983_s17 + $0xa0] sm:$0xff]  ;;  %v711_v55 = vld [vmem:[%s5983_s17 + $0xb0] sm:$0xff] }
 0x148   : > { %v1386_v11 = vmax.f32 %v1352_v62, 0.0  ;;  %v1385_v12 = vmax.f32 %v1281_v63, 0.0  ;;  %v1694_v52 = vpack.c.bf16 %v712_v49, %v708_v47  ;;  %v1691_v53 = vpack.c.bf16 %v709_v51, %v705_v50  ;;  %v714_v57 = vld [vmem:[%s5983_s17 + $0xc8] sm:$0xff]  ;;  %v716_v59 = vld [vmem:[%s5983_s17 + $0xd8] sm:$0xff]  ;;  %v713_v62 = vld [vmem:[%s5983_s17 + $0xc0] sm:$0xff] }
 0x149   : > { %v1416_v16 = vpack.c.bf16 %v1384_v3, %v1380_v1  ;;  %v1387_v17 = vmax.f32 %v1354_v4, 0.0  ;;  %v1693_v56 = vpack.c.bf16 %v711_v55, %v707_v54  ;;  %v718_v58 = vld [vmem:[%s5983_s17 + $0xe8] sm:$0xff]  ;;  %v720_v61 = vld [vmem:[%s5983_s17 + $0xf8] sm:$0xff]  ;;  %v717_v63 = vld [vmem:[%s5983_s17 + $0xe0] sm:$0xff] }
 0x14a   : > { %v1418_v18 = vpack.c.bf16 %v1386_v11, %v1382_v9  ;;  %v1417_v19 = vpack.c.bf16 %v1385_v12, %v1381_v10  ;;  %v1696_v60 = vpack.c.bf16 %v718_v58, %v714_v57  ;;  %v1698_v0 = vpack.c.bf16 %v720_v61, %v716_v59  ;;  %v715_v3 = vld [vmem:[%s5983_s17 + $0xd0] sm:$0xff]  ;;  %v1431_v9 = vpop.permute.xlu0 %1430 }
 0x14b   : > { %v1419_v22 = vpack.c.bf16 %v1387_v17, %v1383_v15  ;;  %v1695_v1 = vpack.c.bf16 %v717_v63, %v713_v62  ;;  %v719_v4 = vld [vmem:[%s5983_s17 + $0xf0] sm:$0xff] }
 0x14c   : > { %1506 = vmatprep.subr.bf16.mxu0 %v1417_v19  ;;  %v1697_v5 = vpack.c.bf16 %v719_v4, %v715_v3 }
 0x14d   : > { %1579 = vmatprep.subr.bf16.mxu1 %v1419_v22  ;;  %1507 = vmatpush1.bf16.msra.mxu0 %v1416_v16 }
 0x14e   : > { %1580 = vmatpush1.bf16.msra.mxu1 %v1418_v18  ;;  %1931 = vmatprep.subr.bf16.mxu0 %v1684_v21  ;;  %v1441_v36 = vpop.permute.xlu0 %1440 }
 0x14f   : > { %2084 = vmatprep.subr.bf16.mxu1 %v1686_v23 }
 0x150   : > { %1525 = vmatmul.mubr.bf16.vlgmr.msra.gmra.mrb[32].mxu0 %v5022_v20 }
 0x151   : > { %1598 = vmatmul.mubr.bf16.vlgmr.msra.gmra.mrb[32].mxu1 %v5022_v20  ;;  %1534 = vmatprep.mubr.bf16.mxu0 %v7005_v2 }
 0x152   : > { %1607 = vmatprep.mubr.bf16.mxu1 %v7005_v2  ;;  %1932 = vmatpush1.bf16.msra.mxu0 %v1683_v32  ;;  %v1446_v32 = vpop.permute.xlu1 %1445  ;;  %v1451_v3 = vpop.permute.xlu0 %1450 }
 0x153   : > { %2085 = vmatpush1.bf16.msra.mxu1 %v1685_v33  ;;  %1933 = vmatprep.subr.bf16.mxu0 %v1688_v34 }
 0x154   : > { %2086 = vmatprep.subr.bf16.mxu1 %v1690_v37 }
 0x156   : > { %1934 = vmatpush1.bf16.msra.mxu0 %v1687_v40  ;;  %v1456_v62 = vpop.permute.xlu1 %1455 }
 0x157   : > { %2087 = vmatpush1.bf16.msra.mxu1 %v1689_v41  ;;  %1935 = vmatprep.subr.bf16.mxu0 %v1692_v48 }
 0x158   : > { %1535 = vmatmul.mubr.bf16.gmra.mrb[36].mxu0 %v5023_v42  ;;  %2088 = vmatprep.subr.bf16.mxu1 %v1694_v52 }
 0x159   : > { %1608 = vmatmul.mubr.bf16.gmra.mrb[36].mxu1 %v5023_v42  ;;  %1544 = vmatprep.mubr.bf16.mxu0 %v7005_v2 }
 0x15a   : > { %1617 = vmatprep.mubr.bf16.mxu1 %v7005_v2  ;;  %1936 = vmatpush1.bf16.msra.mxu0 %v1691_v53 }
 0x15b   : > { %2089 = vmatpush1.bf16.msra.mxu1 %v1693_v56  ;;  %1937 = vmatprep.subr.bf16.mxu0 %v1696_v60 }
 0x15c   : > { %2090 = vmatprep.subr.bf16.mxu1 %v1698_v0 }
 0x15e   : > { %1938 = vmatpush1.bf16.msra.mxu0 %v1695_v1 }
 0x15f   : > { %2091 = vmatpush1.bf16.msra.mxu1 %v1697_v5 }
 0x160   : > { %1545 = vmatmul.mubr.bf16.gmra.mrb[40].mxu0 %v5024_v43 }
 0x161   : > { %1618 = vmatmul.mubr.bf16.gmra.mrb[40].mxu1 %v5024_v43  ;;  %1554 = vmatprep.mubr.bf16.mxu0 %v7005_v2 }
 0x162   : > { %1627 = vmatprep.mubr.bf16.mxu1 %v7005_v2 }
 0x168   : > { %1555 = vmatmul.mubr.bf16.gmra.mrb[44].mxu0 %v5025_v44 }
 0x169   : > { %1628 = vmatmul.mubr.bf16.gmra.mrb[44].mxu1 %v5025_v44  ;;  %1963 = vmatprep.mubr.bf16.mxu0 %v7005_v2 }
 0x16a   : > { %2116 = vmatprep.mubr.bf16.mxu1 %v7005_v2 }
 0x223   : > { %v1526_v10 = vpop.f32.mrb[32].mxu0 }
 0x224   : > { %v1527_v11 = vadd.f32 %v1526_v10, %v1431_v9  ;;  %v1599_v12 = vpop.f32.mrb[32].mxu1  ;;  %v1528_v13 = vpop.f32.mrb[33].mxu0 }
 0x225   : > { %v1600_v14 = vadd.f32 %v1599_v12, %v1431_v9  ;;  %v1529_v15 = vadd.f32 %v1528_v13, %v1431_v9  ;;  %v1601_v16 = vpop.f32.mrb[33].mxu1  ;;  %v1530_v17 = vpop.f32.mrb[34].mxu0 }
 0x226   : > { %v1602_v18 = vadd.f32 %v1601_v16, %v1431_v9  ;;  %v1531_v19 = vadd.f32 %v1530_v17, %v1436_v8  ;;  %v1603_v20 = vpop.f32.mrb[34].mxu1  ;;  %v1532_v21 = vpop.f32.mrb[35].mxu0  ;;  %v1638_v25 = vmax.f32 %v1527_v11, 0.0 }
 0x227   : > { %v1604_v22 = vadd.f32 %v1603_v20, %v1436_v8  ;;  %v1533_v23 = vadd.f32 %v1532_v21, %v1436_v8  ;;  %v1605_v24 = vpop.f32.mrb[35].mxu1  ;;  %v1640_v28 = vmax.f32 %v1600_v14, 0.0  ;;  %v1639_v29 = vmax.f32 %v1529_v15, 0.0 }
 0x228   : > { %v1642_v26 = vmax.f32 %v1531_v19, 0.0  ;;  %v1606_v27 = vadd.f32 %v1605_v24, %v1436_v8  ;;  %v1641_v33 = vmax.f32 %v1602_v18, 0.0 }
 0x229   : > { %v1644_v30 = vmax.f32 %v1604_v22, 0.0  ;;  %v1643_v31 = vmax.f32 %v1533_v23, 0.0 }
 0x22a   : > { %v1699_v34 = vpack.c.bf16 %v1642_v26, %v1638_v25  ;;  %v1645_v35 = vmax.f32 %v1606_v27, 0.0 }
 0x22b   : > { %v1701_v37 = vpack.c.bf16 %v1644_v30, %v1640_v28  ;;  %v1700_v38 = vpack.c.bf16 %v1643_v31, %v1639_v29  ;;  %v1536_v39 = vpop.f32.mrb[36].mxu0  ;;  %v1461_v31 = vpop.permute.xlu1 %1460 }
 0x22c   : > { %v1702_v40 = vpack.c.bf16 %v1645_v35, %v1641_v33  ;;  %v1537_v41 = vadd.f32 %v1536_v39, %v1441_v36  ;;  %v1609_v42 = vpop.f32.mrb[36].mxu1  ;;  %v1538_v43 = vpop.f32.mrb[37].mxu0 }
 0x22d   : > { %v1610_v44 = vadd.f32 %v1609_v42, %v1441_v36  ;;  %v1539_v45 = vadd.f32 %v1538_v43, %v1441_v36  ;;  %v1611_v46 = vpop.f32.mrb[37].mxu1  ;;  %v1540_v47 = vpop.f32.mrb[38].mxu0  ;;  %1939 = vmatprep.subr.bf16.mxu0 %v1700_v38 }
 0x22e   : > { %v1612_v48 = vadd.f32 %v1611_v46, %v1441_v36  ;;  %v1541_v49 = vadd.f32 %v1540_v47, %v1446_v32  ;;  %v1613_v50 = vpop.f32.mrb[38].mxu1  ;;  %2092 = vmatprep.subr.bf16.mxu1 %v1702_v40  ;;  %v1542_v51 = vpop.f32.mrb[39].mxu0  ;;  %1940 = vmatpush1.bf16.msra.mxu0 %v1699_v34  ;;  %v1646_v55 = vmax.f32 %v1537_v41, 0.0 }
 0x22f   : > { %v1614_v52 = vadd.f32 %v1613_v50, %v1446_v32  ;;  %v1543_v53 = vadd.f32 %v1542_v51, %v1446_v32  ;;  %v1615_v54 = vpop.f32.mrb[39].mxu1  ;;  %2093 = vmatpush1.bf16.msra.mxu1 %v1701_v37  ;;  %v1648_v58 = vmax.f32 %v1610_v44, 0.0  ;;  %v1647_v59 = vmax.f32 %v1539_v45, 0.0  ;;  %v1466_v35 = vpop.permute.xlu0 %1465  ;;  %v5382_v45 = vld [vmem:[%s5727_s16] sm:$0x77] }
 0x230   : > { %v1650_v56 = vmax.f32 %v1541_v49, 0.0  ;;  %v1616_v57 = vadd.f32 %v1615_v54, %v1446_v32  ;;  %v1649_v63 = vmax.f32 %v1612_v48, 0.0  ;;  %v1670_v46 = vrot.slane %v5382_v45, 3  ;;  %v5383_v51 = vld [vmem:[%s5727_s16 + $0x8] sm:$0x77]  ;;  %v6138_v45 = vld [vmem:[%s6042_s24 + $0x80] sm:$0xff] }
 0x231   : > { %v1652_v60 = vmax.f32 %v1614_v52, 0.0  ;;  %v1651_v61 = vmax.f32 %v1543_v53, 0.0  ;;  %v1672_v52 = vrot.slane %v5383_v51, 3  ;;  %v6155_v51 = vld [vmem:[%s6042_s24 + $0xe8] sm:$0xff]  ;;  %s4758_s16 = sshll.u32 %s5486_s21, 12  ;;  %s5498_s21 = smov [#allocation2]  }
 0x232   : > { %v1703_v0 = vpack.c.bf16 %v1650_v56, %v1646_v55  ;;  %v1653_v1 = vmax.f32 %v1616_v57, 0.0  ;;  %7042 = vst [vmem:[#allocation17_spill] sm:$0xff] %v6155_v51  ;;  %s6926_s3 = scalar_lea.hbm %s6998_s14, %s4758_s16  ;;  %s5420_s29 = sshll.u32 %s5498_s21, 4  ;;  %s5421_s29 = int_to_ptr.vmem [resolvable:$false] %s5420_s29 }
 0x233   : > { %v1705_v4 = vpack.c.bf16 %v1652_v60, %v1648_v58  ;;  %v1704_v5 = vpack.c.bf16 %v1651_v61, %v1647_v59  ;;  %v1546_v8 = vpop.f32.mrb[40].mxu0  ;;  %v1671_v58 = vrot.slane %v5741_v6, 3  ;;  %v1673_v61 = vrot.slane %v5743_v7, 3  ;;  %v6055_v6 = vld [vmem:[%s6042_s24 + $0x18] sm:$0xff]  ;;  %s5422_s17 = scalar_lea.vmem %s5421_s29, 8192 }
 0x234   : > { %v1706_v9 = vpack.c.bf16 %v1653_v1, %v1649_v63  ;;  %v1547_v10 = vadd.f32 %v1546_v8, %v1451_v3  ;;  %v1619_v11 = vpop.f32.mrb[40].mxu1  ;;  %v1548_v12 = vpop.f32.mrb[41].mxu0  ;;  %v6048_v1 = vld [vmem:[%s6042_s24 + $0x8] sm:$0xff] }
 0x235   : > { %v1620_v13 = vadd.f32 %v1619_v11, %v1451_v3  ;;  %v1549_v14 = vadd.f32 %v1548_v12, %v1451_v3  ;;  %v1621_v15 = vpop.f32.mrb[41].mxu1  ;;  %v1550_v16 = vpop.f32.mrb[42].mxu0  ;;  %1941 = vmatprep.subr.bf16.mxu0 %v1704_v5 }
 0x236   : > { %v1622_v17 = vadd.f32 %v1621_v15, %v1451_v3  ;;  %v1551_v18 = vadd.f32 %v1550_v16, %v1456_v62  ;;  %v1623_v19 = vpop.f32.mrb[42].mxu1  ;;  %2094 = vmatprep.subr.bf16.mxu1 %v1706_v9  ;;  %v1552_v20 = vpop.f32.mrb[43].mxu0  ;;  %1942 = vmatpush1.bf16.msra.mxu0 %v1703_v0  ;;  %v1654_v24 = vmax.f32 %v1547_v10, 0.0  ;;  %v6051_v3 = vld [vmem:[%s6042_s24 + $0x28] sm:$0xff]  ;;  %v6058_v10 = vld [vmem:[%s6042_s24 + $0x38] sm:$0xff] }
 0x237   : > { %v1624_v21 = vadd.f32 %v1623_v19, %v1456_v62  ;;  %v1553_v22 = vadd.f32 %v1552_v20, %v1456_v62  ;;  %v1625_v23 = vpop.f32.mrb[43].mxu1  ;;  %2095 = vmatpush1.bf16.msra.mxu1 %v1705_v4  ;;  %v1656_v27 = vmax.f32 %v1620_v13, 0.0  ;;  %v1655_v28 = vmax.f32 %v1549_v14, 0.0 }
 0x238   : > { %v1658_v25 = vmax.f32 %v1551_v18, 0.0  ;;  %v1626_v26 = vadd.f32 %v1625_v23, %v1456_v62  ;;  %v1657_v32 = vmax.f32 %v1622_v17, 0.0  ;;  %v5026_v17 = vld [vmem:[%s6993_s9] sm:$0xff]   ;;  %v2238_v18 = vpack.c.bf16 %v6051_v3, %v6048_v1  ;;  %v6077_v23 = vld [vmem:[%s6042_s24 + $0x10] sm:$0xff] }
 0x239   : > { %v1660_v29 = vmax.f32 %v1624_v21, 0.0  ;;  %v1659_v30 = vmax.f32 %v1553_v22, 0.0  ;;  %v2240_v20 = vpack.c.bf16 %v6058_v10, %v6055_v6  ;;  %v6071_v21 = vld [vmem:[%s6042_s24] sm:$0xff] }
 0x23a   : > { %v1707_v33 = vpack.c.bf16 %v1658_v25, %v1654_v24  ;;  %v1661_v34 = vmax.f32 %v1626_v26, 0.0  ;;  %v6074_v22 = vld [vmem:[%s6042_s24 + $0x20] sm:$0xff]  ;;  %v6080_v24 = vld [vmem:[%s6042_s24 + $0x30] sm:$0xff]  ;;  %v6083_v25 = vld [vmem:[%s6042_s24 + $0x48] sm:$0xff] }
 0x23b   : > { %v1709_v36 = vpack.c.bf16 %v1660_v29, %v1656_v27  ;;  %v1708_v37 = vpack.c.bf16 %v1659_v30, %v1655_v28  ;;  %v1556_v38 = vpop.f32.mrb[44].mxu0  ;;  %v6086_v26 = vld [vmem:[%s6042_s24 + $0x68] sm:$0xff]  ;;  %v6089_v27 = vld [vmem:[%s6042_s24 + $0x58] sm:$0xff]  ;;  %v2237_v29 = vpack.c.bf16 %v6074_v22, %v6071_v21  ;;  %v2239_v30 = vpack.c.bf16 %v6080_v24, %v6077_v23 }
 0x23c   : > { %v1710_v39 = vpack.c.bf16 %v1661_v34, %v1657_v32  ;;  %v1629_v40 = vpop.f32.mrb[44].mxu1  ;;  %v1558_v41 = vpop.f32.mrb[45].mxu0  ;;  %v1557_v42 = vadd.f32 %v1556_v38, %v1461_v31  ;;  %v6092_v28 = vld [vmem:[%s6042_s24 + $0x78] sm:$0xff]  ;;  %v6101_v32 = vld [vmem:[%s6042_s24 + $0x40] sm:$0xff]  ;;  %v6107_v34 = vld [vmem:[%s6042_s24 + $0x50] sm:$0xff] }
 0x23d   : > { %v1631_v43 = vpop.f32.mrb[45].mxu1  ;;  %v1560_v44 = vpop.f32.mrb[46].mxu0  ;;  %1943 = vmatprep.subr.bf16.mxu0 %v1708_v37  ;;  %v1630_v47 = vadd.f32 %v1629_v40, %v1461_v31  ;;  %v1559_v48 = vadd.f32 %v1558_v41, %v1461_v31  ;;  %v6115_v37 = vld [vmem:[%s6042_s24 + $0x88] sm:$0xff]  ;;  %v6125_v40 = vld [vmem:[%s6042_s24 + $0xb8] sm:$0xff] }
 0x23e   : > { %v1561_v49 = vadd.f32 %v1560_v44, %v1466_v35  ;;  %v1633_v50 = vpop.f32.mrb[46].mxu1  ;;  %2096 = vmatprep.subr.bf16.mxu1 %v1710_v39  ;;  %v1562_v53 = vpop.f32.mrb[47].mxu0  ;;  %1944 = vmatpush1.bf16.msra.mxu0 %v1707_v33  ;;  %v1632_v54 = vadd.f32 %v1631_v43, %v1461_v31  ;;  %v1662_v62 = vmax.f32 %v1557_v42, 0.0  ;;  %v2242_v31 = vpack.c.bf16 %v6086_v26, %v6083_v25  ;;  %v6104_v33 = vld [vmem:[%s6042_s24 + $0x60] sm:$0xff]  ;;  %v6118_v38 = vld [vmem:[%s6042_s24 + $0xa8] sm:$0xff]  ;;  %v6122_v39 = vld [vmem:[%s6042_s24 + $0x98] sm:$0xff] }
 0x23f   : > { %v1634_v55 = vadd.f32 %v1633_v50, %v1466_v35  ;;  %v1563_v56 = vadd.f32 %v1562_v53, %v1466_v35  ;;  %v1635_v57 = vpop.f32.mrb[47].mxu1  ;;  %2097 = vmatpush1.bf16.msra.mxu1 %v1709_v36  ;;  %v1664_v4 = vmax.f32 %v1630_v47, 0.0  ;;  %v1663_v5 = vmax.f32 %v1559_v48, 0.0  ;;  %v6112_v36 = vld [vmem:[%s6042_s24 + $0x70] sm:$0xff]  ;;  %7035 = vst [vmem:[#allocation10_spill] sm:$0xff] %v6115_v37  ;;  %7036 = vst [vmem:[#allocation11_spill] sm:$0xff] %v6118_v38 }
 0x240   : > { %v1666_v59 = vmax.f32 %v1561_v49, 0.0  ;;  %v1636_v60 = vadd.f32 %v1635_v57, %v1466_v35  ;;  %v1665_v7 = vmax.f32 %v1632_v54, 0.0  ;;  %v2244_v35 = vpack.c.bf16 %v6092_v28, %v6089_v27  ;;  %7037 = vst [vmem:[#allocation12_spill] sm:$0xff] %v6122_v39  ;;  %7038 = vst [vmem:[#allocation13_spill] sm:$0xff] %v6125_v40  ;;  %v5027_v41 = vld [vmem:[%s6993_s9 + $0x8] sm:$0xff]   ;;  %v6144_v47 = vld [vmem:[%s6042_s24 + $0x90] sm:$0xff] }
 0x241   : > { %v1668_v63 = vmax.f32 %v1634_v55, 0.0  ;;  %v1667_v0 = vmax.f32 %v1563_v56, 0.0  ;;  %v2241_v42 = vpack.c.bf16 %v6104_v33, %v6101_v32  ;;  %v2243_v43 = vpack.c.bf16 %v6112_v36, %v6107_v34  ;;  %7039 = vst [vmem:[#allocation14_spill] sm:$0xff] %v6144_v47  ;;  %v6149_v49 = vld [vmem:[%s6042_s24 + $0xb0] sm:$0xff]  ;;  %v6152_v50 = vld [vmem:[%s6042_s24 + $0xc8] sm:$0xff]  ;;  %v6161_v53 = vld [vmem:[%s6042_s24 + $0xf8] sm:$0xff] }
 0x242   : > { %v1679_v8 = vsel %vm1678_vm4, %v1666_v59, %v1670_v46  ;;  %v1669_v9 = vmax.f32 %v1636_v60, 0.0  ;;  %v2246_v44 = vpack.c.bf16 %v6118_v38, %v6115_v37  ;;  %v6141_v46 = vld [vmem:[%s6042_s24 + $0xa0] sm:$0xff]  ;;  %v2248_v48 = vpack.c.bf16 %v6125_v40, %v6122_v39  ;;  %7040 = vst [vmem:[#allocation15_spill] sm:$0xff] %v6149_v49  ;;  %7041 = vst [vmem:[#allocation16_spill] sm:$0xff] %v6152_v50  ;;  %v6178_v60 = vld [vmem:[%s6042_s24 + $0xd0] sm:$0xff] }
 0x243   : > { %v1711_v11 = vpack.c.bf16 %v1679_v8, %v1662_v62  ;;  %v1681_v12 = vsel %vm1678_vm4, %v1668_v63, %v1672_v52  ;;  %v1680_v13 = vsel %vm1678_vm4, %v1667_v0, %v1671_v58  ;;  %v6158_v52 = vld [vmem:[%s6042_s24 + $0xd8] sm:$0xff]  ;;  %7044 = vst [vmem:[#allocation19_spill] sm:$0xff] %v6161_v53  ;;  %v2245_v54 = vpack.c.bf16 %v6141_v46, %v6138_v45  ;;  %v6170_v57 = vld [vmem:[%s6042_s24 + $0xc0] sm:$0xff]  ;;  %v5028_v0 = vld [vmem:[%s6993_s9 + $0x10] sm:$0xff]  }
 0x244   : > { %v1713_v14 = vpack.c.bf16 %v1681_v12, %v1664_v4  ;;  %v1712_v15 = vpack.c.bf16 %v1680_v13, %v1663_v5  ;;  %v1682_v16 = vsel %vm1678_vm4, %v1669_v9, %v1673_v61  ;;  %7043 = vst [vmem:[#allocation18_spill] sm:$0xff] %v6158_v52  ;;  %v2247_v55 = vpack.c.bf16 %v6149_v49, %v6144_v47  ;;  %v6173_v58 = vld [vmem:[%s6042_s24 + $0xe0] sm:$0xff]  ;;  %v6181_v61 = vld [vmem:[%s6042_s24 + $0xf0] sm:$0xff]  ;;  %v5029_v4 = vld [vmem:[%s6993_s9 + $0x18] sm:$0xff]  }
 0x245   : > { %v1714_v19 = vpack.c.bf16 %v1682_v16, %v1665_v7  ;;  %v2250_v56 = vpack.c.bf16 %v6155_v51, %v6152_v50  ;;  %7045 = vst [vmem:[#allocation20_spill] sm:$0xff] %v6170_v57  ;;  %7046 = vst [vmem:[#allocation21_spill] sm:$0xff] %v6173_v58  ;;  %v2252_v59 = vpack.c.bf16 %v6161_v53, %v6158_v52  ;;  %v5030_v5 = vld [vmem:[%s6993_s9 + $0x20] sm:$0xff]   ;;  %v5031_v8 = vld [vmem:[%s6993_s9 + $0x28] sm:$0xff]  }
 0x246   : > { %1945 = vmatprep.subr.bf16.mxu0 %v1712_v15  ;;  %7047 = vst [vmem:[#allocation22_spill] sm:$0xff] %v6178_v60  ;;  %7048 = vst [vmem:[#allocation23_spill] sm:$0xff] %v6181_v61  ;;  %v2249_v62 = vpack.c.bf16 %v6173_v58, %v6170_v57  ;;  %v2251_v63 = vpack.c.bf16 %v6181_v61, %v6178_v60  ;;  %v5032_v9 = vld [vmem:[%s6993_s9 + $0x30] sm:$0xff]   ;;  %v5033_v7 = vld [vmem:[%s6993_s9 + $0x38] sm:$0xff]  }
 0x247   : > { %2098 = vmatprep.subr.bf16.mxu1 %v1714_v19  ;;  %1946 = vmatpush1.bf16.msra.mxu0 %v1711_v11  ;;  %v5034_v11 = vld [vmem:[%s6993_s9 + $0x40] sm:$0xff]   ;;  %v5035_v12 = vld [vmem:[%s6993_s9 + $0x48] sm:$0xff]   ;;  %v5036_v13 = vld [vmem:[%s6993_s9 + $0x50] sm:$0xff]  }
 0x248   : > { %2099 = vmatpush1.bf16.msra.mxu1 %v1713_v14  ;;  %2333 = vmatprep.subr.bf16.mxu0 %v2238_v18  ;;  %v5037_v14 = vld [vmem:[%s6993_s9 + $0x58] sm:$0xff]   ;;  %v5038_v15 = vld [vmem:[%s6991_s7] sm:$0xff]   ;;  %v5039_v16 = vld [vmem:[%s6991_s7 + $0x8] sm:$0xff]  }
 0x249   : > { %2446 = vmatprep.subr.bf16.mxu1 %v2240_v20  ;;  %v5041_v18 = vld [vmem:[%s6991_s7 + $0x18] sm:$0xff]   ;;  %v5042_v19 = vld [vmem:[%s6991_s7 + $0x20] sm:$0xff]   ;;  %v5043_v20 = vld [vmem:[%s6991_s7 + $0x28] sm:$0xff]  }
 0x24a   : > { %1964 = vmatmul.mubr.bf16.vlgmr.msra.gmra.mrb[48].mxu0 %v5026_v17 }
 0x24b   : > { %2117 = vmatmul.mubr.bf16.vlgmr.msra.gmra.mrb[48].mxu1 %v5026_v17  ;;  %1973 = vmatprep.mubr.bf16.mxu0 %v7005_v2  ;;  %v5040_v17 = vld [vmem:[%s6991_s7 + $0x10] sm:$0xff]  }
 0x24c   : > { %2126 = vmatprep.mubr.bf16.mxu1 %v7005_v2  ;;  %2334 = vmatpush1.bf16.msra.mxu0 %v2237_v29  ;;  %v5044_v29 = vld [vmem:[%s6991_s7 + $0x30] sm:$0xff]  }
 0x24d   : > { %2447 = vmatpush1.bf16.msra.mxu1 %v2239_v30  ;;  %2335 = vmatprep.subr.bf16.mxu0 %v2242_v31  ;;  %v5045_v30 = vld [vmem:[%s6991_s7 + $0x38] sm:$0xff]  }
 0x24e   : > { %2448 = vmatprep.subr.bf16.mxu1 %v2244_v35 }
 0x250   : > { %2336 = vmatpush1.bf16.msra.mxu0 %v2241_v42 }
 0x251   : > { %2449 = vmatpush1.bf16.msra.mxu1 %v2243_v43  ;;  %2337 = vmatprep.subr.bf16.mxu0 %v2246_v44 }
 0x252   : > { %1974 = vmatmul.mubr.bf16.gmra.mrb[52].mxu0 %v5027_v41  ;;  %2450 = vmatprep.subr.bf16.mxu1 %v2248_v48 }
 0x253   : > { %2127 = vmatmul.mubr.bf16.gmra.mrb[52].mxu1 %v5027_v41  ;;  %1983 = vmatprep.mubr.bf16.mxu0 %v7005_v2 }
 0x254   : > { %2136 = vmatprep.mubr.bf16.mxu1 %v7005_v2  ;;  %2338 = vmatpush1.bf16.msra.mxu0 %v2245_v54 }
 0x255   : > { %2451 = vmatpush1.bf16.msra.mxu1 %v2247_v55  ;;  %2339 = vmatprep.subr.bf16.mxu0 %v2250_v56 }
 0x256   : > { %2452 = vmatprep.subr.bf16.mxu1 %v2252_v59 }
 0x258   : > { %2340 = vmatpush1.bf16.msra.mxu0 %v2249_v62 }
 0x259   : > { %2453 = vmatpush1.bf16.msra.mxu1 %v2251_v63 }
 0x25a   : > { %1984 = vmatmul.mubr.bf16.gmra.mrb[56].mxu0 %v5028_v0 }
 0x25b   : > { %2137 = vmatmul.mubr.bf16.gmra.mrb[56].mxu1 %v5028_v0  ;;  %1993 = vmatprep.mubr.bf16.mxu0 %v7005_v2 }
 0x25c   : > { %2146 = vmatprep.mubr.bf16.mxu1 %v7005_v2 }
 0x262   : > { %1994 = vmatmul.mubr.bf16.gmra.mrb[60].mxu0 %v5029_v4 }
 0x263   : > { %2147 = vmatmul.mubr.bf16.gmra.mrb[60].mxu1 %v5029_v4  ;;  %2003 = vmatprep.mubr.bf16.mxu0 %v7005_v2 }
 0x264   : > { %2156 = vmatprep.mubr.bf16.mxu1 %v7005_v2 }
 0x26a   : > { %2004 = vmatmul.mubr.bf16.gmra.mrb[64].mxu0 %v5030_v5 }
 0x26b   : > { %2157 = vmatmul.mubr.bf16.gmra.mrb[64].mxu1 %v5030_v5  ;;  %2013 = vmatprep.mubr.bf16.mxu0 %v7005_v2 }
 0x26c   : > { %2166 = vmatprep.mubr.bf16.mxu1 %v7005_v2 }
 0x272   : > { %2014 = vmatmul.mubr.bf16.gmra.mrb[68].mxu0 %v5031_v8 }
 0x273   : > { %2167 = vmatmul.mubr.bf16.gmra.mrb[68].mxu1 %v5031_v8  ;;  %2023 = vmatprep.mubr.bf16.mxu0 %v7005_v2 }
 0x274   : > { %2176 = vmatprep.mubr.bf16.mxu1 %v7005_v2 }
 0x27a   : > { %2024 = vmatmul.mubr.bf16.gmra.mrb[72].mxu0 %v5032_v9 }
 0x27b   : > { %2177 = vmatmul.mubr.bf16.gmra.mrb[72].mxu1 %v5032_v9  ;;  %2033 = vmatprep.mubr.bf16.mxu0 %v7005_v2 }
 0x27c   : > { %2186 = vmatprep.mubr.bf16.mxu1 %v7005_v2 }
 0x282   : > { %2034 = vmatmul.mubr.bf16.gmra.mrb[76].mxu0 %v5033_v7 }
 0x283   : > { %2187 = vmatmul.mubr.bf16.gmra.mrb[76].mxu1 %v5033_v7  ;;  %2043 = vmatprep.mubr.bf16.mxu0 %v7005_v2 }
 0x284   : > { %2196 = vmatprep.mubr.bf16.mxu1 %v7005_v2 }
 0x28a   : > { %2044 = vmatmul.mubr.bf16.gmra.mrb[80].mxu0 %v5034_v11 }
 0x28b   : > { %2197 = vmatmul.mubr.bf16.gmra.mrb[80].mxu1 %v5034_v11  ;;  %2053 = vmatprep.mubr.bf16.mxu0 %v7005_v2 }
 0x28c   : > { %2206 = vmatprep.mubr.bf16.mxu1 %v7005_v2 }
 0x292   : > { %2054 = vmatmul.mubr.bf16.gmra.mrb[84].mxu0 %v5035_v12 }
 0x293   : > { %2207 = vmatmul.mubr.bf16.gmra.mrb[84].mxu1 %v5035_v12  ;;  %2063 = vmatprep.mubr.bf16.mxu0 %v7005_v2 }
 0x294   : > { %2216 = vmatprep.mubr.bf16.mxu1 %v7005_v2 }
 0x29a   : > { %2064 = vmatmul.mubr.bf16.gmra.mrb[88].mxu0 %v5036_v13 }
 0x29b   : > { %2217 = vmatmul.mubr.bf16.gmra.mrb[88].mxu1 %v5036_v13  ;;  %2073 = vmatprep.mubr.bf16.mxu0 %v7005_v2 }
 0x29c   : > { %2226 = vmatprep.mubr.bf16.mxu1 %v7005_v2 }
 0x2a2   : > { %2074 = vmatmul.mubr.bf16.gmra.mrb[92].mxu0 %v5037_v14 }
 0x2a3   : > { %2227 = vmatmul.mubr.bf16.gmra.mrb[92].mxu1 %v5037_v14  ;;  %2365 = vmatprep.mubr.bf16.mxu0 %v7005_v2 }
 0x2a4   : > { %2478 = vmatprep.mubr.bf16.mxu1 %v7005_v2 }
 0x2aa   : > { %4626 = vmatmul.mubr.msk.bf16.vlgmr.msra.gmra.mrb[48].mxu0 %vm912_vm2, %v5038_v15 }
 0x2ab   : > { %4634 = vmatmul.mubr.msk.bf16.vlgmr.msra.gmra.mrb[48].mxu1 %vm912_vm2, %v5038_v15  ;;  %2375 = vmatprep.mubr.bf16.mxu0 %v7005_v2 }
 0x2ac   : > { %2488 = vmatprep.mubr.bf16.mxu1 %v7005_v2 }
 0x2b2   : > { %4627 = vmatmul.mubr.msk.bf16.gmra.mrb[52].mxu0 %vm912_vm2, %v5039_v16 }
 0x2b3   : > { %4635 = vmatmul.mubr.msk.bf16.gmra.mrb[52].mxu1 %vm912_vm2, %v5039_v16  ;;  %2385 = vmatprep.mubr.bf16.mxu0 %v7005_v2 }
 0x2b4   : > { %2498 = vmatprep.mubr.bf16.mxu1 %v7005_v2 }
 0x2ba   : > { %4628 = vmatmul.mubr.msk.bf16.gmra.mrb[56].mxu0 %vm912_vm2, %v5040_v17 }
 0x2bb   : > { %4636 = vmatmul.mubr.msk.bf16.gmra.mrb[56].mxu1 %vm912_vm2, %v5040_v17  ;;  %2395 = vmatprep.mubr.bf16.mxu0 %v7005_v2 }
 0x2bc   : > { %2508 = vmatprep.mubr.bf16.mxu1 %v7005_v2 }
 0x2c2   : > { %4629 = vmatmul.mubr.msk.bf16.gmra.mrb[60].mxu0 %vm912_vm2, %v5041_v18 }
 0x2c3   : > { %4637 = vmatmul.mubr.msk.bf16.gmra.mrb[60].mxu1 %vm912_vm2, %v5041_v18  ;;  %2405 = vmatprep.mubr.bf16.mxu0 %v7005_v2 }
 0x2c4   : > { %2518 = vmatprep.mubr.bf16.mxu1 %v7005_v2 }
 0x2ca   : > { %4630 = vmatmul.mubr.msk.bf16.gmra.mrb[64].mxu0 %vm912_vm2, %v5042_v19 }
 0x2cb   : > { %4638 = vmatmul.mubr.msk.bf16.gmra.mrb[64].mxu1 %vm912_vm2, %v5042_v19  ;;  %2415 = vmatprep.mubr.bf16.mxu0 %v7005_v2 }
 0x2cc   : > { %2528 = vmatprep.mubr.bf16.mxu1 %v7005_v2 }
 0x2d2   : > { %4631 = vmatmul.mubr.msk.bf16.gmra.mrb[68].mxu0 %vm912_vm2, %v5043_v20 }
 0x2d3   : > { %4639 = vmatmul.mubr.msk.bf16.gmra.mrb[68].mxu1 %vm912_vm2, %v5043_v20  ;;  %2425 = vmatprep.mubr.bf16.mxu0 %v7005_v2 }
 0x2d4   : > { %2538 = vmatprep.mubr.bf16.mxu1 %v7005_v2 }
 0x2da   : > { %4632 = vmatmul.mubr.msk.bf16.gmra.mrb[72].mxu0 %vm912_vm2, %v5044_v29 }
 0x2db   : > { %4640 = vmatmul.mubr.msk.bf16.gmra.mrb[72].mxu1 %vm912_vm2, %v5044_v29  ;;  %2435 = vmatprep.mubr.bf16.mxu0 %v7005_v2 }
 0x2dc   : > { %2548 = vmatprep.mubr.bf16.mxu1 %v7005_v2 }
 0x2e2   : > { %4633 = vmatmul.mubr.msk.bf16.gmra.mrb[76].mxu0 %vm912_vm2, %v5045_v30 }
 0x2e3   : > { %4641 = vmatmul.mubr.msk.bf16.gmra.mrb[76].mxu1 %vm912_vm2, %v5045_v30  ;;  %3127 = vmatprep.mubr.bf16.mxu0 %v7005_v2 }
 0x2e4   : > { %3200 = vmatprep.mubr.bf16.mxu1 %v7005_v2 }
 0x37d   : > { %v6295_v31 = vpop.f32.mrb[48].mxu0 }
 0x37e   : > { %7049 = vst [vmem:[#allocation24_spill] sm:$0xff] %v6295_v31  ;;  %v6297_v35 = vpop.f32.mrb[48].mxu1  ;;  %v6299_v41 = vpop.f32.mrb[49].mxu0 }
 0x37f   : > { %7050 = vst [vmem:[#allocation25_spill] sm:$0xff] %v6297_v35  ;;  %7051 = vst [vmem:[#allocation26_spill] sm:$0xff] %v6299_v41  ;;  %v6301_v42 = vpop.f32.mrb[49].mxu1  ;;  %v6303_v43 = vpop.f32.mrb[50].mxu0 }
 0x380   : > { %7052 = vst [vmem:[#allocation27_spill] sm:$0xff] %v6301_v42  ;;  %7053 = vst [vmem:[#allocation28_spill] sm:$0xff] %v6303_v43  ;;  %v6305_v44 = vpop.f32.mrb[50].mxu1  ;;  %v6307_v48 = vpop.f32.mrb[51].mxu0 }
 0x381   : > { %7054 = vst [vmem:[#allocation29_spill] sm:$0xff] %v6305_v44  ;;  %7055 = vst [vmem:[#allocation30_spill] sm:$0xff] %v6307_v48  ;;  %v6309_v54 = vpop.f32.mrb[51].mxu1  ;;  %v1787_v44 = vpop.permute.xlu1 %1786 }
 0x382   : > { %7056 = vst [vmem:[#allocation31_spill] sm:$0xff] %v6309_v54  ;;  %v1782_v54 = vpop.permute.xlu0 %1781 }
 0x385   : > { %v6311_v55 = vpop.f32.mrb[52].mxu0 }
 0x386   : > { %7057 = vst [vmem:[#allocation32_spill] sm:$0xff] %v6311_v55  ;;  %v6313_v56 = vpop.f32.mrb[52].mxu1  ;;  %v6315_v59 = vpop.f32.mrb[53].mxu0 }
 0x387   : > { %7058 = vst [vmem:[#allocation33_spill] sm:$0xff] %v6313_v56  ;;  %7059 = vst [vmem:[#allocation34_spill] sm:$0xff] %v6315_v59  ;;  %v6317_v62 = vpop.f32.mrb[53].mxu1  ;;  %v6319_v63 = vpop.f32.mrb[54].mxu0 }
 0x388   : > { %7060 = vst [vmem:[#allocation35_spill] sm:$0xff] %v6317_v62  ;;  %7061 = vst [vmem:[#allocation36_spill] sm:$0xff] %v6319_v63  ;;  %v6321_v0 = vpop.f32.mrb[54].mxu1  ;;  %v6323_v4 = vpop.f32.mrb[55].mxu0 }
 0x389   : > { %7062 = vst [vmem:[#allocation37_spill] sm:$0xff] %v6321_v0  ;;  %7063 = vst [vmem:[#allocation38_spill] sm:$0xff] %v6323_v4  ;;  %v6325_v5 = vpop.f32.mrb[55].mxu1 }
 0x38a   : > { %7064 = vst [vmem:[#allocation39_spill] sm:$0xff] %v6325_v5 }
 0x38d   : > { %v6327_v8 = vpop.f32.mrb[56].mxu0 }
 0x38e   : > { %7065 = vst [vmem:[#allocation40_spill] sm:$0xff] %v6327_v8  ;;  %v6329_v9 = vpop.f32.mrb[56].mxu1  ;;  %v6331_v7 = vpop.f32.mrb[57].mxu0 }
 0x38f   : > { %7066 = vst [vmem:[#allocation41_spill] sm:$0xff] %v6329_v9  ;;  %7067 = vst [vmem:[#allocation42_spill] sm:$0xff] %v6331_v7  ;;  %v6333_v11 = vpop.f32.mrb[57].mxu1  ;;  %v6335_v12 = vpop.f32.mrb[58].mxu0 }
 0x390   : > { %7068 = vst [vmem:[#allocation43_spill] sm:$0xff] %v6333_v11  ;;  %7069 = vst [vmem:[#allocation44_spill] sm:$0xff] %v6335_v12  ;;  %v6337_v13 = vpop.f32.mrb[58].mxu1  ;;  %v6339_v14 = vpop.f32.mrb[59].mxu0 }
 0x391   : > { %7070 = vst [vmem:[#allocation45_spill] sm:$0xff] %v6337_v13  ;;  %7071 = vst [vmem:[#allocation46_spill] sm:$0xff] %v6339_v14  ;;  %v6341_v15 = vpop.f32.mrb[59].mxu1 }
 0x392   : > { %7072 = vst [vmem:[#allocation47_spill] sm:$0xff] %v6341_v15 }
 0x395   : > { %v6343_v16 = vpop.f32.mrb[60].mxu0 }
 0x396   : > { %7073 = vst [vmem:[#allocation48_spill] sm:$0xff] %v6343_v16  ;;  %v6345_v17 = vpop.f32.mrb[60].mxu1  ;;  %v6347_v18 = vpop.f32.mrb[61].mxu0 }
 0x397   : > { %7074 = vst [vmem:[#allocation49_spill] sm:$0xff] %v6345_v17  ;;  %7075 = vst [vmem:[#allocation50_spill] sm:$0xff] %v6347_v18  ;;  %v6349_v19 = vpop.f32.mrb[61].mxu1  ;;  %v6351_v20 = vpop.f32.mrb[62].mxu0 }
 0x398   : > { %7076 = vst [vmem:[#allocation51_spill] sm:$0xff] %v6349_v19  ;;  %7077 = vst [vmem:[#allocation52_spill] sm:$0xff] %v6351_v20  ;;  %v6353_v29 = vpop.f32.mrb[62].mxu1  ;;  %v6355_v30 = vpop.f32.mrb[63].mxu0 }
 0x399   : > { %7078 = vst [vmem:[#allocation53_spill] sm:$0xff] %v6353_v29  ;;  %7079 = vst [vmem:[#allocation54_spill] sm:$0xff] %v6355_v30  ;;  %v6357_v2 = vpop.f32.mrb[63].mxu1 }
 0x39a   : > { %7080 = vst [vmem:[#allocation55_spill] sm:$0xff] %v6357_v2 }
 0x39d   : > { %v2407_v13 = vpop.f32.mrb[64].mxu0 }
 0x39e   : > { %v2520_v14 = vpop.f32.mrb[64].mxu1  ;;  %v2409_v12 = vpop.f32.mrb[65].mxu0  ;;  %v4775_v48 = vadd.f32 %v2407_v13, %v1782_v54 }
 0x39f   : > { %v2522_v15 = vpop.f32.mrb[65].mxu1  ;;  %v2411_v11 = vpop.f32.mrb[66].mxu0  ;;  %v4823_v43 = vadd.f32 %v2520_v14, %v1782_v54  ;;  %v4776_v41 = vadd.f32 %v2409_v12, %v1782_v54 }
 0x3a0   : > { %v2524_v16 = vpop.f32.mrb[66].mxu1  ;;  %v2413_v7 = vpop.f32.mrb[67].mxu0  ;;  %v4824_v53 = vadd.f32 %v2522_v15, %v1782_v54  ;;  %v4674_v50 = vmul.f32 -1.442695, %v4775_v48  ;;  %v4777_v61 = vadd.f32 %v2411_v11, %v1787_v44 }
 0x3a1   : > { %v2526_v17 = vpop.f32.mrb[67].mxu1  ;;  %v4676_v13 = vmul.f32 -1.442695, %v4823_v43  ;;  %v4825_v14 = vadd.f32 %v2524_v16, %v1787_v44  ;;  %v4675_v12 = vmul.f32 -1.442695, %v4776_v41  ;;  %v4778_v40 = vadd.f32 %v2413_v7, %v1787_v44  ;;  %v1792_v16 = vpop.permute.xlu0 %1791 }
 0x3a2   : > { %v4677_v39 = vmul.f32 -1.442695, %v4824_v53  ;;  %5062 = vpow2.f32 %v4674_v50  ;;  %v4678_v38 = vmul.f32 -1.442695, %v4777_v61  ;;  %v4826_v47 = vadd.f32 %v2526_v17, %v1787_v44 }
 0x3a3   : > { %5064 = vpow2.f32 %v4676_v13  ;;  %v4680_v54 = vmul.f32 -1.442695, %v4825_v14  ;;  %v4679_v15 = vmul.f32 -1.442695, %v4778_v40 }
 0x3a4   : > { %5066 = vpow2.f32 %v4675_v12  ;;  %v1797_v12 = vpop.permute.xlu1 %1796 }
 0x3a5   : > { %v2417_v9 = vpop.f32.mrb[68].mxu0  ;;  %5068 = vpow2.f32 %v4677_v39 }
 0x3a6   : > { %v2530_v18 = vpop.f32.mrb[68].mxu1  ;;  %v6359_v8 = vpop.f32.mrb[69].mxu0  ;;  %5070 = vpow2.f32 %v4678_v38  ;;  %v4779_v50 = vadd.f32 %v2417_v9, %v1792_v16 }
 0x3a7   : > { %v6361_v19 = vpop.f32.mrb[69].mxu1  ;;  %v6363_v20 = vpop.f32.mrb[70].mxu0  ;;  %5072 = vpow2.f32 %v4680_v54  ;;  %v4827_v13 = vadd.f32 %v2530_v18, %v1792_v16  ;;  %v4780_v39 = vadd.f32 %v6359_v8, %v1792_v16 }
 0x3a8   : > { %v6365_v29 = vpop.f32.mrb[70].mxu1  ;;  %v6367_v30 = vpop.f32.mrb[71].mxu0  ;;  %5074 = vpow2.f32 %v4679_v15  ;;  %v4681_v15 = vmul.f32 -1.442695, %v4826_v47  ;;  %v4828_v44 = vadd.f32 %v6361_v19, %v1792_v16  ;;  %v4682_v17 = vmul.f32 -1.442695, %v4779_v50 }
 0x3a9   : > { %v6369_v2 = vpop.f32.mrb[71].mxu1  ;;  %v4781_v9 = vadd.f32 %v6363_v20, %v1797_v12  ;;  %v4829_v18 = vadd.f32 %v6365_v29, %v1797_v12  ;;  %v4782_v8 = vadd.f32 %v6367_v30, %v1797_v12 }
 0x3aa   : > { %v4830_v47 = vadd.f32 %v6369_v2, %v1797_v12 }
 0x3ab   : > { %v4686_v19 = vmul.f32 -1.442695, %v4781_v9  ;;  %v4687_v29 = vmul.f32 -1.442695, %v4782_v8 }
 0x3ac   : > { %v5063_v48 = vpop.eup %5062  ;;  %v4689_v30 = vmul.f32 -1.442695, %v4830_v47 }
 0x3ad   : > { %v6371_v5 = vpop.f32.mrb[72].mxu0  ;;  %v5065_v11 = vpop.eup %5064  ;;  %v2911_v37 = vadd.f32 1.0, %v5063_v48  ;;  %v4683_v48 = vmul.f32 -1.442695, %v4780_v39 }
 0x3ae   : > { %v6373_v4 = vpop.f32.mrb[72].mxu1  ;;  %v6375_v0 = vpop.f32.mrb[73].mxu0  ;;  %v2913_v49 = vadd.f32 1.0, %v5065_v11 }
 0x3af   : > { %v6377_v63 = vpop.f32.mrb[73].mxu1  ;;  %v6379_v62 = vpop.f32.mrb[74].mxu0  ;;  %5076 = vrcp.f32 %v2911_v37 }
 0x3b0   : > { %v6381_v59 = vpop.f32.mrb[74].mxu1  ;;  %v6383_v56 = vpop.f32.mrb[75].mxu0  ;;  %5078 = vrcp.f32 %v2913_v49  ;;  %v4684_v49 = vmul.f32 -1.442695, %v4827_v13 }
 0x3b1   : > { %v6385_v55 = vpop.f32.mrb[75].mxu1  ;;  %v5067_v43 = vpop.eup %5066 }
 0x3b2   : > { %v5069_v41 = vpop.eup %5068  ;;  %v2912_v53 = vadd.f32 1.0, %v5067_v43  ;;  %v1802_v11 = vpop.permute.xlu0 %1801  ;;  %v4685_v43 = vmul.f32 -1.442695, %v4828_v44 }
 0x3b3   : > { %v5071_v61 = vpop.eup %5070  ;;  %v2914_v7 = vadd.f32 1.0, %v5069_v41  ;;  %v4783_v16 = vadd.f32 %v6371_v5, %v1802_v11  ;;  %v4688_v41 = vmul.f32 -1.442695, %v4829_v18  ;;  %v4831_v20 = vadd.f32 %v6373_v4, %v1802_v11 }
 0x3b4   : > { %v5073_v40 = vpop.eup %5072  ;;  %5080 = vrcp.f32 %v2912_v53  ;;  %v2915_v38 = vadd.f32 1.0, %v5071_v61  ;;  %v4784_v50 = vadd.f32 %v6375_v0, %v1802_v11 }
 0x3b5   : > { %v6387_v42 = vpop.f32.mrb[76].mxu0  ;;  %v5075_v14 = vpop.eup %5074  ;;  %5082 = vrcp.f32 %v2914_v7  ;;  %v2917_v54 = vadd.f32 1.0, %v5073_v40  ;;  %v4832_v7 = vadd.f32 %v6377_v63, %v1802_v11  ;;  %v4690_v2 = vmul.f32 -1.442695, %v4783_v16 }
 0x3b6   : > { %v6389_v35 = vpop.f32.mrb[76].mxu1  ;;  %v6391_v31 = vpop.f32.mrb[77].mxu0  ;;  %5084 = vrcp.f32 %v2915_v38  ;;  %v2916_v37 = vadd.f32 1.0, %v5075_v14  ;;  %v4692_v5 = vmul.f32 -1.442695, %v4831_v20 }
 0x3b7   : > { %v6393_v52 = vpop.f32.mrb[77].mxu1  ;;  %v6395_v51 = vpop.f32.mrb[78].mxu0  ;;  %5086 = vrcp.f32 %v2917_v54  ;;  %v4691_v4 = vmul.f32 -1.442695, %v4784_v50  ;;  %v4693_v14 = vmul.f32 -1.442695, %v4832_v7 }
 0x3b8   : > { %v6397_v60 = vpop.f32.mrb[78].mxu1  ;;  %v6399_v58 = vpop.f32.mrb[79].mxu0  ;;  %5088 = vrcp.f32 %v2916_v37 }
 0x3b9   : > { %v6401_v57 = vpop.f32.mrb[79].mxu1  ;;  %5090 = vpow2.f32 %v4681_v15  ;;  %v5077_v53 = vpop.eup %5076 }
 0x3ba   : > { %5092 = vpow2.f32 %v4682_v17  ;;  %v5079_v61 = vpop.eup %5078  ;;  %v3007_v0 = vmul.f32 %v5077_v53, %v6071_v21 }
 0x3bb   : > { %5094 = vpow2.f32 %v4684_v49  ;;  %v6418_v63 = vmul.f32 %v5079_v61, %v6077_v23 }
 0x3bc   : > { %5096 = vpow2.f32 %v4683_v48 }
 0x3bd   : > { %5098 = vpow2.f32 %v4685_v43 }
 0x3be   : > { %v5081_v13 = vpop.eup %5080  ;;  %5100 = vpow2.f32 %v4686_v19 }
 0x3bf   : > { %v6413_v40 = vpop.eup %5082  ;;  %5102 = vpow2.f32 %v4688_v41  ;;  %v3008_v37 = vmul.f32 %v5081_v13, %v6048_v1 }
 0x3c0   : > { %v5085_v38 = vpop.eup %5084  ;;  %5104 = vpow2.f32 %v4687_v29 }
 0x3c1   : > { %v5087_v39 = vpop.eup %5086  ;;  %5106 = vpow2.f32 %v4689_v30  ;;  %v3011_v12 = vmul.f32 %v5085_v38, %v6074_v22 }
 0x3c2   : > { %v5089_v54 = vpop.eup %5088  ;;  %5108 = vpow2.f32 %v4690_v2  ;;  %v6421_v15 = vmul.f32 %v5087_v39, %v6080_v24  ;;  %v1812_v39 = vpop.permute.xlu0 %1811 }
 0x3c3   : > { %v5091_v44 = vpop.eup %5090  ;;  %5110 = vpow2.f32 %v4692_v5  ;;  %v3012_v17 = vmul.f32 %v5089_v54, %v6051_v3  ;;  %v3039_v9 = vpack.c.bf16 %v3011_v12, %v3007_v0  ;;  %v1807_v3 = vpop.permute.xlu1 %1806 }
 0x3c4   : > { %v5093_v49 = vpop.eup %5092  ;;  %v2918_v18 = vadd.f32 1.0, %v5091_v44  ;;  %5112 = vpow2.f32 %v4691_v4  ;;  %v3041_v21 = vpack.c.bf16 %v6421_v15, %v6418_v63  ;;  %v4785_v41 = vadd.f32 %v6379_v62, %v1807_v3 }
 0x3c5   : > { %v5095_v22 = vpop.eup %5094  ;;  %v2919_v48 = vadd.f32 1.0, %v5093_v49  ;;  %5114 = vpow2.f32 %v4693_v14  ;;  %v3040_v23 = vpack.c.bf16 %v3012_v17, %v3008_v37  ;;  %v4833_v29 = vadd.f32 %v6381_v59, %v1807_v3 }
 0x3c6   : > { %v5097_v8 = vpop.eup %5096  ;;  %5116 = vrcp.f32 %v2918_v18  ;;  %v2921_v24 = vadd.f32 1.0, %v5095_v22  ;;  %v4786_v30 = vadd.f32 %v6383_v56, %v1807_v3  ;;  %v4694_v38 = vmul.f32 -1.442695, %v4785_v41 }
 0x3c7   : > { %v5099_v11 = vpop.eup %5098  ;;  %5118 = vrcp.f32 %v2919_v48  ;;  %v2920_v43 = vadd.f32 1.0, %v5097_v8  ;;  %3095 = vmatprep.subr.bf16.mxu0 %v3040_v23  ;;  %v4696_v14 = vmul.f32 -1.442695, %v4833_v29  ;;  %v4834_v0 = vadd.f32 %v6385_v55, %v1807_v3  ;;  %v1817_v12 = vpop.permute.xlu1 %1816 }
 0x3c8   : > { %v5101_v1 = vpop.eup %5100  ;;  %5120 = vrcp.f32 %v2921_v24  ;;  %v2922_v47 = vadd.f32 1.0, %v5099_v11  ;;  %3096 = vmatpush1.bf16.msra.mxu0 %v3039_v9  ;;  %v4695_v44 = vmul.f32 -1.442695, %v4786_v30  ;;  %v4787_v56 = vadd.f32 %v6387_v42, %v1812_v39 }
 0x3c9   : > { %v5103_v19 = vpop.eup %5102  ;;  %5122 = vrcp.f32 %v2920_v43  ;;  %v2923_v16 = vadd.f32 1.0, %v5101_v1  ;;  %v4835_v37 = vadd.f32 %v6389_v35, %v1812_v39  ;;  %v4788_v9 = vadd.f32 %v6391_v31, %v1812_v39 }
 0x3ca   : > { %v5105_v20 = vpop.eup %5104  ;;  %5124 = vrcp.f32 %v2922_v47  ;;  %v2925_v53 = vadd.f32 1.0, %v5103_v19  ;;  %v4836_v49 = vadd.f32 %v6393_v52, %v1812_v39  ;;  %v4789_v18 = vadd.f32 %v6395_v51, %v1817_v12 }
 0x3cb   : > { %v5107_v50 = vpop.eup %5106  ;;  %5126 = vrcp.f32 %v2923_v16  ;;  %v2924_v61 = vadd.f32 1.0, %v5105_v20  ;;  %v4837_v55 = vadd.f32 %v6397_v60, %v1817_v12  ;;  %v3010_v48 = vmul.f32 %v6413_v40, %v6055_v6 }
 0x3cc   : > { %v5109_v7 = vpop.eup %5108  ;;  %5128 = vrcp.f32 %v2925_v53  ;;  %v2926_v13 = vadd.f32 1.0, %v5107_v50  ;;  %v4697_v35 = vmul.f32 -1.442695, %v4834_v0  ;;  %v4698_v24 = vmul.f32 -1.442695, %v4787_v56 }
 0x3cd   : > { %v5111_v2 = vpop.eup %5110  ;;  %5130 = vrcp.f32 %v2924_v61  ;;  %v2927_v5 = vadd.f32 1.0, %v5109_v7  ;;  %v4790_v31 = vadd.f32 %v6399_v58, %v1817_v12  ;;  %v4700_v51 = vmul.f32 -1.442695, %v4835_v37 }
 0x3ce   : > { %v5113_v4 = vpop.eup %5112  ;;  %5132 = vrcp.f32 %v2926_v13  ;;  %v2929_v62 = vadd.f32 1.0, %v5111_v2  ;;  %v4699_v43 = vmul.f32 -1.442695, %v4788_v9  ;;  %v4701_v60 = vmul.f32 -1.442695, %v4836_v49 }
 0x3cf   : > { %v5115_v59 = vpop.eup %5114  ;;  %v2928_v54 = vadd.f32 1.0, %v5113_v4  ;;  %5134 = vrcp.f32 %v2927_v5  ;;  %v4702_v3 = vmul.f32 -1.442695, %v4789_v18  ;;  %v4704_v6 = vmul.f32 -1.442695, %v4837_v55 }
 0x3d0   : > { %v5117_v17 = vpop.eup %5116  ;;  %5136 = vrcp.f32 %v2929_v62  ;;  %v4838_v40 = vadd.f32 %v6401_v57, %v1817_v12  ;;  %v4703_v16 = vmul.f32 -1.442695, %v4790_v31  ;;  %v2930_v30 = vadd.f32 1.0, %v5115_v59 }
 0x3d1   : > { %v5119_v22 = vpop.eup %5118  ;;  %v3014_v23 = vmul.f32 %v5117_v17, %v6058_v10  ;;  %5138 = vrcp.f32 %v2928_v54 }
 0x3d2   : > { %v5121_v42 = vpop.eup %5120  ;;  %5140 = vpow2.f32 %v4694_v38  ;;  %v3015_v58 = vmul.f32 %v5119_v22, %v6101_v32 }
 0x3d3   : > { %v5123_v8 = vpop.eup %5122  ;;  %v3042_v52 = vpack.c.bf16 %v3014_v23, %v3010_v48  ;;  %5142 = vpow2.f32 %v4696_v14  ;;  %v3017_v41 = vmul.f32 %v5121_v42, %v6107_v34 }
 0x3d4   : > { %v5125_v11 = vpop.eup %5124  ;;  %5144 = vpow2.f32 %v4695_v44  ;;  %v3016_v29 = vmul.f32 %v5123_v8, %v6083_v25 }
 0x3d5   : > { %v5127_v1 = vpop.eup %5126  ;;  %3168 = vmatprep.subr.bf16.mxu1 %v3042_v52  ;;  %5146 = vpow2.f32 %v4697_v35  ;;  %v3018_v63 = vmul.f32 %v5125_v11, %v6089_v27  ;;  %v7082_v52 = vld [vmem:[#allocation15_spill] sm:$0xff] }
 0x3d6   : > { %v5129_v10 = vpop.eup %5128  ;;  %3169 = vmatpush1.bf16.msra.mxu1 %v3041_v21  ;;  %v3019_v47 = vmul.f32 %v5127_v1, %v6104_v33  ;;  %5148 = vpow2.f32 %v4698_v24  ;;  %v4705_v21 = vmul.f32 -1.442695, %v4838_v40  ;;  %v7081_v24 = vld [vmem:[#allocation14_spill] sm:$0xff]  ;;  %v7085_v40 = vld [vmem:[#allocation12_spill] sm:$0xff] }
 0x3d7   : > { %v5131_v19 = vpop.eup %5130  ;;  %v3021_v20 = vmul.f32 %v5129_v10, %v6112_v36  ;;  %5150 = vpow2.f32 %v4700_v51 }
 0x3d8   : > { %v5133_v53 = vpop.eup %5132  ;;  %v3020_v57 = vmul.f32 %v5131_v19, %v6086_v26  ;;  %v3043_v50 = vpack.c.bf16 %v3019_v47, %v3015_v58  ;;  %5152 = vpow2.f32 %v4699_v43  ;;  %v7083_v43 = vld [vmem:[#allocation10_spill] sm:$0xff]  ;;  %v7086_v47 = vld [vmem:[#allocation13_spill] sm:$0xff] }
 0x3d9   : > { %v3022_v32 = vmul.f32 %v5133_v53, %v6092_v28  ;;  %v3045_v33 = vpack.c.bf16 %v3021_v20, %v3017_v41  ;;  %v5135_v15 = vpop.eup %5134  ;;  %5154 = vpow2.f32 %v4701_v60  ;;  %v7084_v60 = vld [vmem:[#allocation11_spill] sm:$0xff] }
 0x3da   : > { %v3044_v61 = vpack.c.bf16 %v3020_v57, %v3016_v29  ;;  %v5137_v34 = vpop.eup %5136  ;;  %5156 = vpow2.f32 %v4702_v3  ;;  %v3023_v42 = vmul.f32 %v5135_v15, %v6138_v45 }
 0x3db   : > { %v3046_v36 = vpack.c.bf16 %v3022_v32, %v3018_v63  ;;  %v5139_v7 = vpop.eup %5138  ;;  %5158 = vpow2.f32 %v4704_v6  ;;  %v3025_v31 = vmul.f32 %v5137_v34, %v7081_v24  ;;  %v7088_v32 = vld [vmem:[#allocation21_spill] sm:$0xff]  ;;  %v7090_v34 = vld [vmem:[#allocation23_spill] sm:$0xff] }
 0x3dc   : > { %3097 = vmatprep.subr.bf16.mxu0 %v3044_v61  ;;  %v5141_v25 = vpop.eup %5140  ;;  %5160 = vpow2.f32 %v4703_v16  ;;  %v3024_v1 = vmul.f32 %v5139_v7, %v7083_v43  ;;  %v7091_v7 = vld [vmem:[#allocation16_spill] sm:$0xff]  ;;  %v7101_v24 = vld [vmem:[#allocation29_spill] sm:$0xff] }
 0x3dd   : > { %3170 = vmatprep.subr.bf16.mxu1 %v3046_v36  ;;  %3098 = vmatpush1.bf16.msra.mxu0 %v3043_v50  ;;  %v5143_v26 = vpop.eup %5142  ;;  %v2931_v27 = vadd.f32 1.0, %v5141_v25  ;;  %5162 = vpow2.f32 %v4705_v21  ;;  %v7087_v50 = vld [vmem:[#allocation20_spill] sm:$0xff]  ;;  %v7089_v21 = vld [vmem:[#allocation22_spill] sm:$0xff] }
 0x3de   : > { %3171 = vmatpush1.bf16.msra.mxu1 %v3045_v33  ;;  %v5145_v28 = vpop.eup %5144  ;;  %5164 = vrcp.f32 %v2930_v30  ;;  %v2933_v13 = vadd.f32 1.0, %v5143_v26  ;;  %v7092_v26 = vld [vmem:[#allocation17_spill] sm:$0xff] }
 0x3df   : > { %v5147_v2 = vpop.eup %5146  ;;  %5166 = vrcp.f32 %v2931_v27  ;;  %v2932_v5 = vadd.f32 1.0, %v5145_v28 }
 0x3e0   : > { %v5149_v38 = vpop.eup %5148  ;;  %5168 = vrcp.f32 %v2933_v13  ;;  %v2934_v4 = vadd.f32 1.0, %v5147_v2  ;;  %v7093_v13 = vld [vmem:[#allocation18_spill] sm:$0xff] }
 0x3e1   : > { %v5151_v39 = vpop.eup %5150  ;;  %5170 = vrcp.f32 %v2932_v5  ;;  %v2935_v62 = vadd.f32 1.0, %v5149_v38  ;;  %v7094_v5 = vld [vmem:[#allocation19_spill] sm:$0xff] }
 0x3e2   : > { %v5153_v14 = vpop.eup %5152  ;;  %5172 = vrcp.f32 %v2934_v4  ;;  %v2937_v0 = vadd.f32 1.0, %v5151_v39 }
 0x3e3   : > { %v5155_v59 = vpop.eup %5154  ;;  %5174 = vrcp.f32 %v2935_v62  ;;  %v2936_v12 = vadd.f32 1.0, %v5153_v14  ;;  %v5046_v14 = vld [vmem:[%s6992_s8] sm:$0xff]  }
 0x3e4   : > { %v5157_v54 = vpop.eup %5156  ;;  %5176 = vrcp.f32 %v2937_v0  ;;  %v2938_v44 = vadd.f32 1.0, %v5155_v59  ;;  %v7095_v0 = vmov 0   ;;  %v5047_v59 = vld [vmem:[%s6992_s8 + $0x8] sm:$0xff]  }
 0x3e5   : > { %v5159_v56 = vpop.eup %5158  ;;  %5178 = vrcp.f32 %v2936_v12  ;;  %v2939_v37 = vadd.f32 1.0, %v5157_v54  ;;  %v5048_v12 = vld [vmem:[%s6992_s8 + $0x10] sm:$0xff]   ;;  %v5049_v54 = vld [vmem:[%s6992_s8 + $0x18] sm:$0xff]  }
 0x3e6   : > { %v5161_v17 = vpop.eup %5160  ;;  %5180 = vrcp.f32 %v2938_v44  ;;  %v2941_v9 = vadd.f32 1.0, %v5159_v56  ;;  %v1742_v44 = vpop.permute.xlu0 %1741  ;;  %v7096_v56 = vld [vmem:[#allocation24_spill] sm:$0xff] }
 0x3e7   : > { %v5163_v49 = vpop.eup %5162  ;;  %5182 = vrcp.f32 %v2939_v37  ;;  %v2940_v18 = vadd.f32 1.0, %v5161_v17  ;;  %v4759_v37 = vadd.f32 %v7096_v56, %v1742_v44  ;;  %v7097_v17 = vld [vmem:[#allocation25_spill] sm:$0xff] }
 0x3e8   : > { %v5165_v22 = vpop.eup %5164  ;;  %5184 = vrcp.f32 %v2941_v9  ;;  %v2942_v55 = vadd.f32 1.0, %v5163_v49  ;;  %v4807_v9 = vadd.f32 %v7097_v17, %v1742_v44  ;;  %v7098_v49 = vld [vmem:[#allocation26_spill] sm:$0xff] }
 0x3e9   : > { %v5167_v48 = vpop.eup %5166  ;;  %5186 = vrcp.f32 %v2940_v18  ;;  %v3026_v58 = vmul.f32 %v5165_v22, %v7085_v40  ;;  %v4760_v18 = vadd.f32 %v7098_v49, %v1742_v44  ;;  %v1747_v22 = vpop.permute.xlu1 %1746 }
 0x3ea   : > { %v5169_v23 = vpop.eup %5168  ;;  %5188 = vrcp.f32 %v2942_v55  ;;  %v3027_v35 = vmul.f32 %v5167_v48, %v6141_v46  ;;  %v7099_v55 = vld [vmem:[#allocation27_spill] sm:$0xff]  ;;  %v1752_v43 = vpop.permute.xlu0 %1751 }
 0x3eb   : > { %v5171_v8 = vpop.eup %5170  ;;  %v3029_v11 = vmul.f32 %v5169_v23, %v7082_v52  ;;  %v4808_v48 = vadd.f32 %v7099_v55, %v1742_v44  ;;  %v4642_v23 = vmul.f32 -1.442695, %v4759_v37  ;;  %v4643_v52 = vmul.f32 -1.442695, %v4760_v18 }
 0x3ec   : > { %v5173_v51 = vpop.eup %5172  ;;  %v3028_v3 = vmul.f32 %v5171_v8, %v7084_v60  ;;  %v3047_v6 = vpack.c.bf16 %v3027_v35, %v3023_v42  ;;  %v7100_v42 = vld [vmem:[#allocation28_spill] sm:$0xff]  ;;  %v4644_v8 = vmul.f32 -1.442695, %v4807_v9  ;;  %v7103_v60 = vld [vmem:[#allocation31_spill] sm:$0xff] }
 0x3ed   : > { %v5175_v10 = vpop.eup %5174  ;;  %v3030_v19 = vmul.f32 %v5173_v51, %v7086_v47  ;;  %v3049_v16 = vpack.c.bf16 %v3029_v11, %v3025_v31  ;;  %v4761_v35 = vadd.f32 %v7100_v42, %v1747_v22  ;;  %v4809_v31 = vadd.f32 %v7101_v24, %v1747_v22  ;;  %v7102_v11 = vld [vmem:[#allocation30_spill] sm:$0xff] }
 0x3ee   : > { %v5177_v45 = vpop.eup %5176  ;;  %v3048_v41 = vpack.c.bf16 %v3028_v3, %v3024_v1  ;;  %v3031_v63 = vmul.f32 %v5175_v10, %v7087_v50  ;;  %v4762_v51 = vadd.f32 %v7102_v11, %v1747_v22  ;;  %v4645_v1 = vmul.f32 -1.442695, %v4808_v48  ;;  %v7104_v10 = vld [vmem:[#allocation32_spill] sm:$0xff]  ;;  %v1762_v55 = vpop.permute.xlu0 %1761 }
 0x3ef   : > { %v5179_v46 = vpop.eup %5178  ;;  %v3050_v20 = vpack.c.bf16 %v3030_v19, %v3026_v58  ;;  %v3033_v61 = vmul.f32 %v5177_v45, %v7089_v21  ;;  %v4810_v3 = vadd.f32 %v7103_v60, %v1747_v22  ;;  %5190 = vpow2.f32 %v4642_v23  ;;  %v7108_v50 = vld [vmem:[#allocation36_spill] sm:$0xff]  ;;  %v7111_v23 = vld [vmem:[#allocation39_spill] sm:$0xff] }
 0x3f0   : > { %v5181_v53 = vpop.eup %5180  ;;  %3099 = vmatprep.subr.bf16.mxu0 %v3048_v41  ;;  %v3032_v25 = vmul.f32 %v5179_v46, %v7091_v7  ;;  %v4763_v40 = vadd.f32 %v7104_v10, %v1752_v43  ;;  %5192 = vpow2.f32 %v4644_v8  ;;  %v4648_v58 = vmul.f32 -1.442695, %v4809_v31  ;;  %v7106_v46 = vld [vmem:[#allocation34_spill] sm:$0xff]  ;;  %v7112_v8 = vld [vmem:[#allocation40_spill] sm:$0xff] }
 0x3f1   : > { %v5183_v29 = vpop.eup %5182  ;;  %3172 = vmatprep.subr.bf16.mxu1 %v3050_v20  ;;  %3100 = vmatpush1.bf16.msra.mxu0 %v3047_v6  ;;  %v3034_v2 = vmul.f32 %v5181_v53, %v7093_v13  ;;  %v4646_v6 = vmul.f32 -1.442695, %v4761_v35  ;;  %5194 = vpow2.f32 %v4643_v52  ;;  %v4647_v47 = vmul.f32 -1.442695, %v4762_v51  ;;  %v1757_v53 = vpop.permute.xlu1 %1756  ;;  %v7113_v52 = vld [vmem:[#allocation41_spill] sm:$0xff] }
 0x3f2   : > { %v5185_v57 = vpop.eup %5184  ;;  %3173 = vmatpush1.bf16.msra.mxu1 %v3049_v16  ;;  %v3035_v33 = vmul.f32 %v5183_v29, %v7088_v32  ;;  %5196 = vpow2.f32 %v4645_v1  ;;  %v4649_v19 = vmul.f32 -1.442695, %v4810_v3  ;;  %v7105_v16 = vld [vmem:[#allocation33_spill] sm:$0xff]  ;;  %v4650_v41 = vmul.f32 -1.442695, %v4763_v40  ;;  %v7107_v29 = vld [vmem:[#allocation35_spill] sm:$0xff] }
 0x3f3   : > { %v5187_v15 = vpop.eup %5186  ;;  %v3037_v30 = vmul.f32 %v5185_v57, %v7090_v34  ;;  %v4811_v45 = vadd.f32 %v7105_v16, %v1752_v43  ;;  %5198 = vpow2.f32 %v4646_v6  ;;  %v4764_v20 = vadd.f32 %v7106_v46, %v1752_v43  ;;  %v7114_v1 = vld [vmem:[#allocation42_spill] sm:$0xff]  ;;  %v7115_v40 = vld [vmem:[#allocation43_spill] sm:$0xff]  ;;  %v7116_v16 = vld [vmem:[#allocation44_spill] sm:$0xff] }
 0x3f4   : > { %v5189_v36 = vpop.eup %5188  ;;  %v3036_v27 = vmul.f32 %v5187_v15, %v7092_v26  ;;  %v3051_v28 = vpack.c.bf16 %v3035_v33, %v3031_v63  ;;  %5200 = vpow2.f32 %v4648_v58  ;;  %v4812_v57 = vadd.f32 %v7107_v29, %v1752_v43 }
 0x3f5   : > { %v3038_v38 = vmul.f32 %v5189_v36, %v7094_v5  ;;  %v3053_v4 = vpack.c.bf16 %v3037_v30, %v3033_v61  ;;  %5202 = vpow2.f32 %v4647_v47  ;;  %v4765_v63 = vadd.f32 %v7108_v50, %v1757_v53  ;;  %v1767_v6 = vpop.permute.xlu1 %1766  ;;  %v7118_v50 = vld [vmem:[#allocation46_spill] sm:$0xff] }
 0x3f6   : > { %v3052_v39 = vpack.c.bf16 %v3036_v27, %v3032_v25  ;;  %5204 = vpow2.f32 %v4649_v19  ;;  %v4652_v32 = vmul.f32 -1.442695, %v4811_v45  ;;  %v4651_v33 = vmul.f32 -1.442695, %v4764_v20  ;;  %v7117_v20 = vld [vmem:[#allocation45_spill] sm:$0xff] }
 0x3f7   : > { %v3054_v62 = vpack.c.bf16 %v3038_v38, %v3034_v2  ;;  %5206 = vpow2.f32 %v4650_v41  ;;  %v4653_v15 = vmul.f32 -1.442695, %v4812_v57  ;;  %v4654_v61 = vmul.f32 -1.442695, %v4765_v63 }
 0x3f8   : > { %3101 = vmatprep.subr.bf16.mxu0 %v3052_v39  ;;  %5208 = vpow2.f32 %v4652_v32  ;;  %v4814_v42 = vadd.f32 %v7111_v23, %v1757_v53  ;;  %v4767_v24 = vadd.f32 %v7112_v8, %v1762_v55  ;;  %v4815_v11 = vadd.f32 %v7113_v52, %v1762_v55  ;;  %v7127_v52 = vld [vmem:[#allocation55_spill] sm:$0xff] }
 0x3f9   : > { %3174 = vmatprep.subr.bf16.mxu1 %v3054_v62  ;;  %3102 = vmatpush1.bf16.msra.mxu0 %v3051_v28  ;;  %v5191_v21 = vpop.eup %5190  ;;  %5210 = vpow2.f32 %v4651_v33  ;;  %v7109_v62 = vld [vmem:[#allocation37_spill] sm:$0xff]  ;;  %v4768_v60 = vadd.f32 %v7114_v1, %v1762_v55  ;;  %v4816_v58 = vadd.f32 %v7115_v40, %v1762_v55  ;;  %v4769_v45 = vadd.f32 %v7116_v16, %v1767_v6  ;;  %v1772_v33 = vpop.permute.xlu0 %1771 }
 0x3fa   : > { %3175 = vmatpush1.bf16.msra.mxu1 %v3053_v4  ;;  %v5193_v34 = vpop.eup %5192  ;;  %v2687_v7 = vadd.f32 1.0, %v5191_v21  ;;  %5212 = vpow2.f32 %v4653_v15  ;;  %v4657_v10 = vmul.f32 -1.442695, %v4814_v42  ;;  %v4658_v19 = vmul.f32 -1.442695, %v4767_v24  ;;  %v7119_v21 = vld [vmem:[#allocation47_spill] sm:$0xff] }
 0x3fb   : > { %v5195_v30 = vpop.eup %5194  ;;  %v2689_v26 = vadd.f32 1.0, %v5193_v34  ;;  %5214 = vpow2.f32 %v4654_v61  ;;  %v4660_v46 = vmul.f32 -1.442695, %v4815_v11  ;;  %v4659_v57 = vmul.f32 -1.442695, %v4768_v60  ;;  %v7125_v55 = vld [vmem:[#allocation53_spill] sm:$0xff] }
 0x3fc   : > { %4710 = vmatmul.mubr.msk.bf16.vlgmr.msra.gmra.mrb[80].mxu0 %vm912_vm2, %v5046_v14  ;;  %v5197_v36 = vpop.eup %5196  ;;  %v2688_v28 = vadd.f32 1.0, %v5195_v30  ;;  %5216 = vrcp.f32 %v2687_v7  ;;  %v4770_v63 = vadd.f32 %v7118_v50, %v1767_v6  ;;  %v4661_v15 = vmul.f32 -1.442695, %v4816_v58 }
 0x3fd   : > { %4714 = vmatmul.mubr.msk.bf16.vlgmr.msra.gmra.mrb[80].mxu1 %vm912_vm2, %v5046_v14  ;;  %3137 = vmatprep.mubr.bf16.mxu0 %v7095_v0  ;;  %v5199_v25 = vpop.eup %5198  ;;  %v2690_v2 = vadd.f32 1.0, %v5197_v36  ;;  %5218 = vrcp.f32 %v2689_v26  ;;  %v4813_v14 = vadd.f32 %v7109_v62, %v1757_v53  ;;  %v4818_v61 = vadd.f32 %v7119_v21, %v1767_v6  ;;  %v7120_v36 = vld [vmem:[#allocation48_spill] sm:$0xff]  ;;  %v7122_v62 = vld [vmem:[#allocation50_spill] sm:$0xff] }
 0x3fe   : > { %3210 = vmatprep.mubr.bf16.mxu1 %v7095_v0  ;;  %v5201_v27 = vpop.eup %5200  ;;  %v2691_v38 = vadd.f32 1.0, %v5199_v25  ;;  %5220 = vrcp.f32 %v2688_v28  ;;  %v4662_v30 = vmul.f32 -1.442695, %v4769_v45  ;;  %v4771_v7 = vadd.f32 %v7120_v36, %v1772_v33 }
 0x3ff   : > { %v5203_v13 = vpop.eup %5202  ;;  %v2693_v39 = vadd.f32 1.0, %v5201_v27  ;;  %5222 = vrcp.f32 %v2690_v2  ;;  %v4656_v9 = vmul.f32 -1.442695, %v4813_v14  ;;  %v7121_v27 = vld [vmem:[#allocation49_spill] sm:$0xff]  ;;  %v4663_v2 = vmul.f32 -1.442695, %v4770_v63 }
 0x400   : > { %v5205_v5 = vpop.eup %5204  ;;  %5224 = vrcp.f32 %v2691_v38  ;;  %v4819_v28 = vadd.f32 %v7121_v27, %v1772_v33  ;;  %v4665_v38 = vmul.f32 -1.442695, %v4818_v61  ;;  %v4772_v14 = vadd.f32 %v7122_v62, %v1772_v33 }
 0x401   : > { %v5207_v4 = vpop.eup %5206  ;;  %v2694_v44 = vadd.f32 1.0, %v5205_v5  ;;  %5226 = vrcp.f32 %v2693_v39  ;;  %v4666_v39 = vmul.f32 -1.442695, %v4771_v7 }
 0x402   : > { %v5209_v56 = vpop.eup %5208  ;;  %v2695_v37 = vadd.f32 1.0, %v5207_v4  ;;  %v4667_v42 = vmul.f32 -1.442695, %v4772_v14 }
 0x403   : > { %v5211_v17 = vpop.eup %5210  ;;  %v2697_v48 = vadd.f32 1.0, %v5209_v56 }
 0x404   : > { %4711 = vmatmul.mubr.msk.bf16.gmra.mrb[84].mxu0 %vm912_vm2, %v5047_v59  ;;  %v5213_v49 = vpop.eup %5212  ;;  %v2696_v35 = vadd.f32 1.0, %v5211_v17 }
 0x405   : > { %4715 = vmatmul.mubr.msk.bf16.gmra.mrb[84].mxu1 %vm912_vm2, %v5047_v59  ;;  %3147 = vmatprep.mubr.bf16.mxu0 %v7095_v0  ;;  %v2692_v59 = vadd.f32 1.0, %v5203_v13  ;;  %v5215_v22 = vpop.eup %5214  ;;  %v2698_v31 = vadd.f32 1.0, %v5213_v49 }
 0x406   : > { %3220 = vmatprep.mubr.bf16.mxu1 %v7095_v0  ;;  %v6515_v51 = vpop.eup %5216  ;;  %v2699_v43 = vadd.f32 1.0, %v5215_v22 }
 0x407   : > { %5228 = vrcp.f32 %v2692_v59  ;;  %v6518_v3 = vpop.eup %5218 }
 0x408   : > { %5230 = vrcp.f32 %v2694_v44  ;;  %v6521_v47 = vpop.eup %5220  ;;  %v7123_v44 = vld [vmem:[#allocation51_spill] sm:$0xff] }
 0x409   : > { %5232 = vrcp.f32 %v2695_v37  ;;  %v6524_v41 = vpop.eup %5222  ;;  %v4820_v56 = vadd.f32 %v7123_v44, %v1772_v33 }
 0x40a   : > { %5234 = vpow2.f32 %v4656_v9  ;;  %v6527_v29 = vpop.eup %5224  ;;  %v7124_v9 = vld [vmem:[#allocation52_spill] sm:$0xff] }
 0x40b   : > { %v6530_v32 = vpop.eup %5226 }
 0x40c   : > { %4712 = vmatmul.mubr.msk.bf16.gmra.mrb[88].mxu0 %vm912_vm2, %v5048_v12 }
 0x40d   : > { %4716 = vmatmul.mubr.msk.bf16.gmra.mrb[88].mxu1 %vm912_vm2, %v5048_v12  ;;  %3157 = vmatprep.mubr.bf16.mxu0 %v7095_v0  ;;  %v7110_v12 = vld [vmem:[#allocation38_spill] sm:$0xff] }
 0x40e   : > { %3230 = vmatprep.mubr.bf16.mxu1 %v7095_v0 }
 0x411   : > { %v6533_v34 = vpop.eup %5228 }
 0x412   : > { %v6536_v25 = vpop.eup %5230 }
 0x413   : > { %v6539_v13 = vpop.eup %5232 }
 0x414   : > { %4713 = vmatmul.mubr.msk.bf16.gmra.mrb[92].mxu0 %vm912_vm2, %v5049_v54  ;;  %v5235_v5 = vpop.eup %5234 }
 0x415   : > { %4717 = vmatmul.mubr.msk.bf16.gmra.mrb[92].mxu1 %vm912_vm2, %v5049_v54  ;;  %3609 = vmatprep.mubr.bf16.mxu0 %v7095_v0  ;;  %v4766_v54 = vadd.f32 %v7110_v12, %v1757_v53  ;;  %v4817_v53 = vadd.f32 %v7117_v20, %v1767_v6  ;;  %v1777_v12 = vpop.permute.xlu1 %1776  ;;  %v2701_v17 = vadd.f32 1.0, %v5235_v5 }
 0x416   : > { %3722 = vmatprep.mubr.bf16.mxu1 %v7095_v0  ;;  %v4773_v49 = vadd.f32 %v7124_v9, %v1777_v12  ;;  %v4822_v11 = vadd.f32 %v7127_v52, %v1777_v12 }
 0x417   : > { %v4655_v18 = vmul.f32 -1.442695, %v4766_v54  ;;  %v4664_v26 = vmul.f32 -1.442695, %v4817_v53  ;;  %v4668_v54 = vmul.f32 -1.442695, %v4819_v28 }
 0x418   : > { %v4670_v1 = vmul.f32 -1.442695, %v4773_v49 }
 0x419   : > { %5236 = vpow2.f32 %v4655_v18 }
 0x41a   : > { %5238 = vrcp.f32 %v2697_v48  ;;  %v4821_v48 = vadd.f32 %v7125_v55, %v1777_v12 }
 0x41b   : > { %5240 = vrcp.f32 %v2696_v35  ;;  %v7126_v35 = vld [vmem:[#allocation54_spill] sm:$0xff] }
 0x41c   : > { %5242 = vrcp.f32 %v2698_v31  ;;  %v4774_v8 = vadd.f32 %v7126_v35, %v1777_v12  ;;  %v4669_v31 = vmul.f32 -1.442695, %v4820_v56  ;;  %v4672_v6 = vmul.f32 -1.442695, %v4821_v48 }
 0x41d   : > { %5244 = vrcp.f32 %v2699_v43 }
 0x41e   : > { %5246 = vpow2.f32 %v4657_v10  ;;  %v4671_v40 = vmul.f32 -1.442695, %v4774_v8  ;;  %v1822_v8 = vpop.permute.xlu0 %1821 }
 0x41f   : > { %5248 = vpow2.f32 %v4658_v19  ;;  %v4673_v19 = vmul.f32 -1.442695, %v4822_v11 }
 0x420   : > { %5250 = vpow2.f32 %v4660_v46 }
 0x421   : > { %5252 = vpow2.f32 %v4659_v57 }
 0x422   : > { %5254 = vpow2.f32 %v4661_v15 }
 0x423   : > { %v5237_v4 = vpop.eup %5236  ;;  %5256 = vpow2.f32 %v4662_v30 }
 0x424   : > { %v6542_v59 = vpop.eup %5238  ;;  %5258 = vpow2.f32 %v4664_v26  ;;  %v2700_v22 = vadd.f32 1.0, %v5237_v4 }
 0x425   : > { %v6545_v37 = vpop.eup %5240  ;;  %5260 = vpow2.f32 %v4663_v2 }
 0x426   : > { %v6548_v18 = vpop.eup %5242  ;;  %5262 = vpow2.f32 %v4665_v38 }
 0x427   : > { %v6551_v23 = vpop.eup %5244  ;;  %5264 = vpow2.f32 %v4666_v39 }
 0x428   : > { %v5247_v24 = vpop.eup %5246  ;;  %5266 = vpow2.f32 %v4668_v54 }
 0x429   : > { %v5249_v43 = vpop.eup %5248  ;;  %5268 = vrcp.f32 %v2701_v17  ;;  %v2702_v45 = vadd.f32 1.0, %v5247_v24 }
 0x42a   : > { %v5251_v60 = vpop.eup %5250  ;;  %5270 = vrcp.f32 %v2700_v22  ;;  %v2703_v20 = vadd.f32 1.0, %v5249_v43 }
 0x42b   : > { %v5253_v10 = vpop.eup %5252  ;;  %5272 = vpow2.f32 %v4667_v42  ;;  %v2705_v57 = vadd.f32 1.0, %v5251_v60  ;;  %v1827_v42 = vpop.permute.xlu1 %1826 }
 0x42c   : > { %v5255_v58 = vpop.eup %5254  ;;  %5274 = vpow2.f32 %v4669_v31  ;;  %v2704_v63 = vadd.f32 1.0, %v5253_v10 }
 0x42d   : > { %v5257_v16 = vpop.eup %5256  ;;  %5276 = vpow2.f32 %v4670_v1  ;;  %v2706_v15 = vadd.f32 1.0, %v5255_v58 }
 0x42e   : > { %v5259_v46 = vpop.eup %5258  ;;  %5278 = vpow2.f32 %v4672_v6  ;;  %v2707_v61 = vadd.f32 1.0, %v5257_v16 }
 0x42f   : > { %v5261_v53 = vpop.eup %5260  ;;  %5280 = vpow2.f32 %v4671_v40  ;;  %v2709_v36 = vadd.f32 1.0, %v5259_v46 }
 0x430   : > { %v5263_v50 = vpop.eup %5262  ;;  %5282 = vpow2.f32 %v4673_v19  ;;  %v2708_v26 = vadd.f32 1.0, %v5261_v53 }
 0x431   : > { %v5265_v33 = vpop.eup %5264  ;;  %5284 = vrcp.f32 %v2702_v45  ;;  %v2710_v28 = vadd.f32 1.0, %v5263_v50 }
 0x432   : > { %v5267_v21 = vpop.eup %5266  ;;  %5286 = vrcp.f32 %v2703_v20  ;;  %v2711_v5 = vadd.f32 1.0, %v5265_v33 }
 0x433   : > { %v6555_v30 = vpop.eup %5268  ;;  %5288 = vrcp.f32 %v2705_v57  ;;  %v2713_v4 = vadd.f32 1.0, %v5267_v21 }
 0x434   : > { %v6557_v7 = vpop.eup %5270  ;;  %5290 = vrcp.f32 %v2704_v63 }
 0x435   : > { %v5273_v27 = vpop.eup %5272  ;;  %5292 = vrcp.f32 %v2706_v15 }
 0x436   : > { %v5275_v2 = vpop.eup %5274  ;;  %5294 = vrcp.f32 %v2707_v61  ;;  %v2712_v62 = vadd.f32 1.0, %v5273_v27  ;;  %v1837_v61 = vpop.permute.xlu1 %1836 }
 0x437   : > { %v5277_v38 = vpop.eup %5276  ;;  %5296 = vrcp.f32 %v2709_v36  ;;  %v2714_v12 = vadd.f32 1.0, %v5275_v2 }
 0x438   : > { %v5279_v39 = vpop.eup %5278  ;;  %5298 = vrcp.f32 %v2708_v26  ;;  %v2715_v44 = vadd.f32 1.0, %v5277_v38  ;;  %v1832_v26 = vpop.permute.xlu0 %1831 }
 0x439   : > { %v5281_v14 = vpop.eup %5280  ;;  %5300 = vrcp.f32 %v2710_v28  ;;  %v2717_v17 = vadd.f32 1.0, %v5279_v39 }
 0x43a   : > { %v5283_v54 = vpop.eup %5282  ;;  %5302 = vrcp.f32 %v2711_v5  ;;  %v2716_v49 = vadd.f32 1.0, %v5281_v14 }
 0x43b   : > { %v6559_v56 = vpop.eup %5284  ;;  %5304 = vrcp.f32 %v2713_v4  ;;  %v2718_v55 = vadd.f32 1.0, %v5283_v54 }
 0x43c   : > { %v6561_v9 = vpop.eup %5286  ;;  %5306 = vrcp.f32 %v2712_v62 }
 0x43d   : > { %v6563_v22 = vpop.eup %5288  ;;  %5308 = vrcp.f32 %v2714_v12 }
 0x43e   : > { %v6565_v48 = vpop.eup %5290  ;;  %5310 = vrcp.f32 %v2715_v44 }
 0x43f   : > { %v6567_v35 = vpop.eup %5292  ;;  %5312 = vrcp.f32 %v2717_v17 }
 0x440   : > { %v6569_v31 = vpop.eup %5294  ;;  %5314 = vrcp.f32 %v2716_v49 }
 0x441   : > { %v6571_v1 = vpop.eup %5296  ;;  %5316 = vrcp.f32 %v2718_v55 }
 0x442   : > { %v6573_v58 = vpop.eup %5298 }
 0x443   : > { %v6575_v20 = vpop.eup %5300 }
 0x444   : > { %v6577_v50 = vpop.eup %5302 }
 0x445   : > { %v6579_v33 = vpop.eup %5304 }
 0x446   : > { %v6581_v21 = vpop.eup %5306 }
 0x447   : > { %v6583_v36 = vpop.eup %5308 }
 0x448   : > { %v6585_v28 = vpop.eup %5310 }
 0x449   : > { %v6587_v4 = vpop.eup %5312 }
 0x44a   : > { %7128 = vst [vmem:[#allocation14_spill] sm:$0xff] %v6587_v4  ;;  %v6589_v54 = vpop.eup %5314 }
 0x4cf   : > { %v3129_v24 = vpop.f32.mrb[80].mxu0 }
 0x4d0   : > { %v4791_v52 = vadd.f32 %v3129_v24, %v1822_v8  ;;  %v3202_v11 = vpop.f32.mrb[80].mxu1  ;;  %v3131_v43 = vpop.f32.mrb[81].mxu0 }
 0x4d1   : > { %v4839_v60 = vadd.f32 %v3202_v11, %v1822_v8  ;;  %v4792_v6 = vadd.f32 %v3131_v43, %v1822_v8  ;;  %v3204_v10 = vpop.f32.mrb[81].mxu1  ;;  %v3133_v40 = vpop.f32.mrb[82].mxu0 }
 0x4d2   : > { %5318 = vtanh.f32 %v4791_v52  ;;  %v4840_v19 = vadd.f32 %v3204_v10, %v1822_v8  ;;  %v4793_v16 = vadd.f32 %v3133_v40, %v1827_v42  ;;  %v3206_v45 = vpop.f32.mrb[82].mxu1  ;;  %v3135_v46 = vpop.f32.mrb[83].mxu0 }
 0x4d3   : > { %5320 = vtanh.f32 %v4839_v60  ;;  %v4841_v53 = vadd.f32 %v3206_v45, %v1827_v42  ;;  %v3208_v57 = vpop.f32.mrb[83].mxu1  ;;  %v4794_v63 = vadd.f32 %v3135_v46, %v1827_v42  ;;  %v6594_v60 = vld [vmem:[%s6042_s24] sm:$0xff] }
 0x4d4   : > { %5322 = vtanh.f32 %v4792_v6  ;;  %v4842_v15 = vadd.f32 %v3208_v57, %v1827_v42  ;;  %v6591_v42 = vpop.eup %5316 }
 0x4d5   : > { %5324 = vtanh.f32 %v4840_v19  ;;  %v1847_v19 = vpop.permute.xlu1 %1846 }
 0x4d6   : > { %5326 = vtanh.f32 %v4793_v16  ;;  %v6598_v16 = vld [vmem:[%s6042_s24 + $0x10] sm:$0xff] }
 0x4d7   : > { %5328 = vtanh.f32 %v4841_v53  ;;  %v3139_v27 = vpop.f32.mrb[84].mxu0  ;;  %v1842_v53 = vpop.permute.xlu0 %1841 }
 0x4d8   : > { %5330 = vtanh.f32 %v4794_v63  ;;  %v4795_v2 = vadd.f32 %v3139_v27, %v1832_v26  ;;  %v3212_v5 = vpop.f32.mrb[84].mxu1  ;;  %v3141_v38 = vpop.f32.mrb[85].mxu0  ;;  %v5386_v63 = vld [vmem:[%s6042_s24 + $0x8] sm:$0xff] }
 0x4d9   : > { %5332 = vtanh.f32 %v4842_v15  ;;  %v4843_v39 = vadd.f32 %v3212_v5, %v1832_v26  ;;  %v4796_v62 = vadd.f32 %v3141_v38, %v1832_v26  ;;  %v3214_v14 = vpop.f32.mrb[85].mxu1  ;;  %v3143_v12 = vpop.f32.mrb[86].mxu0  ;;  %v5387_v38 = vld [vmem:[%s6042_s24 + $0x18] sm:$0xff] }
 0x4da   : > { %5334 = vtanh.f32 %v4795_v2  ;;  %v4844_v44 = vadd.f32 %v3214_v14, %v1832_v26  ;;  %v4797_v17 = vadd.f32 %v3143_v12, %v1837_v61  ;;  %v3216_v49 = vpop.f32.mrb[86].mxu1  ;;  %v3145_v55 = vpop.f32.mrb[87].mxu0  ;;  %v6613_v12 = vld [vmem:[%s6042_s24 + $0x20] sm:$0xff] }
 0x4db   : > { %5336 = vtanh.f32 %v4843_v39  ;;  %v4845_v8 = vadd.f32 %v3216_v49, %v1837_v61  ;;  %v3218_v24 = vpop.f32.mrb[87].mxu1  ;;  %v4798_v11 = vadd.f32 %v3145_v55, %v1837_v61 }
 0x4dc   : > { %v5319_v52 = vpop.eup %5318  ;;  %5338 = vtanh.f32 %v4796_v62  ;;  %v4846_v10 = vadd.f32 %v3218_v24, %v1837_v61  ;;  %v6617_v24 = vld [vmem:[%s6042_s24 + $0x30] sm:$0xff] }
 0x4dd   : > { %v5321_v43 = vpop.eup %5320  ;;  %v3273_v6 = vsub.f32 %v5319_v52, %v6594_v60  ;;  %5340 = vtanh.f32 %v4844_v44 }
 0x4de   : > { %v5323_v40 = vpop.eup %5322  ;;  %v3275_v45 = vsub.f32 %v5321_v43, %v6598_v16  ;;  %5342 = vtanh.f32 %v4797_v17 }
 0x4df   : > { %v5325_v46 = vpop.eup %5324  ;;  %5344 = vtanh.f32 %v4845_v8  ;;  %v3149_v57 = vpop.f32.mrb[88].mxu0  ;;  %v3274_v15 = vsub.f32 %v5323_v40, %v5386_v63  ;;  %v6604_v26 = vmul.f32 %v6515_v51, %v3273_v6 }
 0x4e0   : > { %v5327_v61 = vpop.eup %5326  ;;  %5346 = vtanh.f32 %v4798_v11  ;;  %v4799_v27 = vadd.f32 %v3149_v57, %v1842_v53  ;;  %v3222_v2 = vpop.f32.mrb[88].mxu1  ;;  %v3276_v39 = vsub.f32 %v5325_v46, %v5387_v38  ;;  %v6608_v62 = vmul.f32 %v6518_v3, %v3275_v45  ;;  %v5390_v57 = vld [vmem:[%s6042_s24 + $0x28] sm:$0xff]  ;;  %v6633_v3 = vld [vmem:[%s6042_s24 + $0x40] sm:$0xff] }
 0x4e1   : > { %v3151_v5 = vpop.f32.mrb[89].mxu0  ;;  %v6610_v14 = vpop.eup %5328  ;;  %v3277_v44 = vsub.f32 %v5327_v61, %v6613_v12  ;;  %5348 = vtanh.f32 %v4846_v10  ;;  %v4847_v51 = vadd.f32 %v3222_v2, %v1842_v53 }
 0x4e2   : > { %v4800_v17 = vadd.f32 %v3151_v5, %v1842_v53  ;;  %v3224_v49 = vpop.f32.mrb[89].mxu1  ;;  %v3153_v55 = vpop.f32.mrb[90].mxu0  ;;  %5350 = vtanh.f32 %v4799_v27  ;;  %v3306_v27 = vmul.f32 %v6521_v47, %v3274_v15  ;;  %v5391_v5 = vld [vmem:[%s6042_s24 + $0x38] sm:$0xff] }
 0x4e3   : > { %v5331_v8 = vpop.eup %5330  ;;  %v4848_v52 = vadd.f32 %v3224_v49, %v1842_v53  ;;  %v4801_v11 = vadd.f32 %v3153_v55, %v1847_v19  ;;  %v3226_v43 = vpop.f32.mrb[90].mxu1  ;;  %5352 = vtanh.f32 %v4847_v51 }
 0x4e4   : > { %v3155_v6 = vpop.f32.mrb[91].mxu0  ;;  %v5333_v10 = vpop.eup %5332  ;;  %v4849_v40 = vadd.f32 %v3226_v43, %v1847_v19  ;;  %v3278_v61 = vsub.f32 %v5331_v8, %v5390_v57  ;;  %5354 = vtanh.f32 %v4800_v17  ;;  %v3308_v8 = vmul.f32 %v6524_v41, %v3276_v39 }
 0x4e5   : > { %v4802_v45 = vadd.f32 %v3155_v6, %v1847_v19  ;;  %v3228_v46 = vpop.f32.mrb[91].mxu1  ;;  %v6626_v2 = vpop.eup %5334  ;;  %v3280_v49 = vsub.f32 %v5333_v10, %v5391_v5  ;;  %5356 = vtanh.f32 %v4848_v52  ;;  %v3338_v15 = vadd.f32 %v5386_v63, %v3306_v27 }
 0x4e6   : > { %v4850_v53 = vadd.f32 %v3228_v46, %v1847_v19  ;;  %v6630_v55 = vpop.eup %5336  ;;  %v3310_v43 = vmul.f32 %v6533_v34, %v3278_v61  ;;  %v1857_v17 = vpop.permute.xlu1 %1856  ;;  %v6642_v19 = vld [vmem:[%s6042_s24 + $0x50] sm:$0xff]  ;;  %5358 = vtanh.f32 %v4801_v11  ;;  %v3340_v39 = vadd.f32 %v5387_v38, %v3308_v8 }
 0x4e7   : > { %v6639_v6 = vpop.eup %5338  ;;  %v3312_v10 = vmul.f32 %v6536_v25, %v3280_v49  ;;  %v1852_v52 = vpop.permute.xlu0 %1851  ;;  %5360 = vtanh.f32 %v4849_v40  ;;  %v3309_v61 = vmul.f32 %v6527_v29, %v3277_v44  ;;  %3370 = vst [vmem:[%s6653_s22 + $0x8] sm:$0xff] %v3338_v15  ;;  %v3337_v63 = vadd.f32 %v6594_v60, %v6604_v26  ;;  %v6661_v29 = vld [vmem:[%s6042_s24 + $0x60] sm:$0xff] }
 0x4e8   : > { %v6647_v46 = vpop.eup %5340  ;;  %v3159_v34 = vpop.f32.mrb[92].mxu0  ;;  %v3342_v41 = vadd.f32 %v5390_v57, %v3310_v43  ;;  %5362 = vtanh.f32 %v4802_v45  ;;  %3372 = vst [vmem:[%s6653_s22 + $0x18] sm:$0xff] %v3340_v39 }
 0x4e9   : > { %v6650_v51 = vpop.eup %5342  ;;  %v4803_v0 = vadd.f32 %v3159_v34, %v1852_v52  ;;  %v3232_v47 = vpop.f32.mrb[92].mxu1  ;;  %v3344_v25 = vadd.f32 %v5391_v5, %v3312_v10  ;;  %5364 = vtanh.f32 %v4850_v53  ;;  %v6668_v5 = vld [vmem:[%s6042_s24 + $0x70] sm:$0xff]  ;;  %3369 = vst [vmem:[%s6653_s22] sm:$0xff] %v3337_v63 }
 0x4ea   : > { %v3161_v4 = vpop.f32.mrb[93].mxu0  ;;  %v6658_v38 = vpop.eup %5344  ;;  %v4851_v11 = vadd.f32 %v3232_v47, %v1852_v52  ;;  %3374 = vst [vmem:[%s6653_s22 + $0x28] sm:$0xff] %v3342_v41  ;;  %v3402_v49 = vpack.c.bf16 %v3342_v41, %v3338_v15  ;;  %v7129_v15 = vsub.f32 %v6610_v14, %v6617_v24  ;;  %v3339_v41 = vadd.f32 %v6598_v16, %v6608_v62 }
 0x4eb   : > { %v4804_v40 = vadd.f32 %v3161_v4, %v1852_v52  ;;  %v3234_v45 = vpop.f32.mrb[93].mxu1  ;;  %v3163_v57 = vpop.f32.mrb[94].mxu0  ;;  %v3287_v60 = vsub.f32 %v6658_v38, %v6668_v5  ;;  %5366 = vtanh.f32 %v4803_v0  ;;  %3376 = vst [vmem:[%s6653_s22 + $0x38] sm:$0xff] %v3344_v25  ;;  %v3404_v4 = vpack.c.bf16 %v3344_v25, %v3340_v39  ;;  %v6686_v25 = vld [vmem:[%s6042_s24 + $0x80] sm:$0xff]  ;;  %v5405_v38 = vld [vmem:[%s6042_s24 + $0x88] sm:$0xff] }
 0x4ec   : > { %v5347_v27 = vpop.eup %5346  ;;  %v4852_v26 = vadd.f32 %v3234_v45, %v1852_v52  ;;  %v3236_v43 = vpop.f32.mrb[94].mxu1  ;;  %5368 = vtanh.f32 %v4851_v11  ;;  %v4805_v47 = vadd.f32 %v3163_v57, %v1857_v17  ;;  %3577 = vmatprep.subr.bf16.mxu0 %v3402_v49  ;;  %v3341_v0 = vadd.f32 %v6613_v12, %v3309_v61  ;;  %3371 = vst [vmem:[%s6653_s22 + $0x10] sm:$0xff] %v3339_v41 }
 0x4ed   : > { %v3165_v53 = vpop.f32.mrb[95].mxu0  ;;  %v5349_v8 = vpop.eup %5348  ;;  %v4853_v10 = vadd.f32 %v3236_v43, %v1857_v17  ;;  %5370 = vtanh.f32 %v4804_v40  ;;  %v3311_v52 = vmul.f32 %v6530_v32, %v7129_v15  ;;  %3690 = vmatprep.subr.bf16.mxu1 %v3404_v4  ;;  %v6693_v32 = vld [vmem:[%s6042_s24 + $0x90] sm:$0xff]  ;;  %v5400_v43 = vld [vmem:[%s6042_s24 + $0x58] sm:$0xff] }
 0x4ee   : > { %v3238_v34 = vpop.f32.mrb[95].mxu1  ;;  %v6674_v44 = vpop.eup %5350  ;;  %5372 = vtanh.f32 %v4852_v26  ;;  %v4806_v12 = vadd.f32 %v3165_v53, %v1857_v17  ;;  %3373 = vst [vmem:[%s6653_s22 + $0x20] sm:$0xff] %v3341_v0  ;;  %v3401_v62 = vpack.c.bf16 %v3341_v0, %v3337_v63  ;;  %v5399_v26 = vld [vmem:[%s6042_s24 + $0x68] sm:$0xff]  ;;  %v3284_v53 = vsub.f32 %v6647_v46, %v5400_v43 }
 0x4ef   : > { %v6683_v39 = vpop.eup %5352  ;;  %v3289_v11 = vsub.f32 %v6674_v44, %v6686_v25  ;;  %v4854_v14 = vadd.f32 %v3238_v34, %v1857_v17  ;;  %5374 = vtanh.f32 %v4805_v47  ;;  %v3343_v40 = vadd.f32 %v6617_v24, %v3311_v52  ;;  %v5398_v17 = vld [vmem:[%s6042_s24 + $0x48] sm:$0xff]  ;;  %v5401_v24 = vld [vmem:[%s6042_s24 + $0x78] sm:$0xff] }
 0x4f0   : > { %v6690_v61 = vpop.eup %5354  ;;  %v3291_v16 = vsub.f32 %v6683_v39, %v6693_v32  ;;  %5376 = vtanh.f32 %v4853_v10  ;;  %v3282_v57 = vsub.f32 %v6639_v6, %v5398_v17  ;;  %v3286_v49 = vsub.f32 %v5347_v27, %v5399_v26  ;;  %3578 = vmatpush1.bf16.msra.mxu0 %v3401_v62  ;;  %v6718_v27 = vld [vmem:[%s6042_s24 + $0xa0] sm:$0xff] }
 0x4f1   : > { %v6700_v45 = vpop.eup %5356  ;;  %3375 = vst [vmem:[%s6653_s22 + $0x30] sm:$0xff] %v3343_v40  ;;  %v3403_v63 = vpack.c.bf16 %v3343_v40, %v3339_v41  ;;  %5378 = vtanh.f32 %v4806_v12  ;;  %v3288_v47 = vsub.f32 %v5349_v8, %v5401_v24  ;;  %v7130_v10 = vsub.f32 %v6626_v2, %v6633_v3  ;;  %v6725_v41 = vld [vmem:[%s6042_s24 + $0xb0] sm:$0xff] }
 0x4f2   : > { %v6707_v4 = vpop.eup %5358  ;;  %5380 = vtanh.f32 %v4854_v14  ;;  %v3314_v0 = vmul.f32 %v6545_v37, %v3282_v57  ;;  %v3318_v15 = vmul.f32 %v6557_v7, %v3286_v49  ;;  %v7131_v12 = vsub.f32 %v6650_v51, %v6661_v29 }
 0x4f3   : > { %v3313_v34 = vmul.f32 %v6539_v13, %v7130_v10  ;;  %v6715_v6 = vpop.eup %5360  ;;  %v3293_v46 = vsub.f32 %v6707_v4, %v6718_v27  ;;  %3691 = vmatpush1.bf16.msra.mxu1 %v3403_v63  ;;  %v3316_v13 = vmul.f32 %v6548_v18, %v3284_v53  ;;  %v3320_v8 = vmul.f32 %v6559_v56, %v3288_v47 }
 0x4f4   : > { %v5363_v52 = vpop.eup %5362  ;;  %v3295_v2 = vsub.f32 %v6715_v6, %v6725_v41  ;;  %v3317_v37 = vmul.f32 %v6551_v23, %v7131_v12  ;;  %v3346_v14 = vadd.f32 %v5398_v17, %v3314_v0  ;;  %v3350_v62 = vadd.f32 %v5399_v26, %v3318_v15  ;;  %v5409_v15 = vld [vmem:[%s6042_s24 + $0xb8] sm:$0xff] }
 0x4f5   : > { %v5365_v7 = vpop.eup %5364  ;;  %v3345_v40 = vadd.f32 %v6633_v3, %v3313_v34  ;;  %v7132_v57 = vsub.f32 %v6630_v55, %v6642_v19  ;;  %v3348_v56 = vadd.f32 %v5400_v43, %v3316_v13  ;;  %v3352_v51 = vadd.f32 %v5401_v24, %v3320_v8  ;;  %v6750_v55 = vld [vmem:[%s6042_s24 + $0xc0] sm:$0xff]  ;;  %v5408_v34 = vld [vmem:[%s6042_s24 + $0x98] sm:$0xff] }
 0x4f6   : > { %v6740_v49 = vpop.eup %5366  ;;  %v3349_v23 = vadd.f32 %v6661_v29, %v3317_v37  ;;  %v3319_v17 = vmul.f32 %v6555_v30, %v3287_v60  ;;  %3378 = vst [vmem:[%s6653_s22 + $0x48] sm:$0xff] %v3346_v14  ;;  %3382 = vst [vmem:[%s6653_s22 + $0x68] sm:$0xff] %v3350_v62  ;;  %v3406_v26 = vpack.c.bf16 %v3350_v62, %v3346_v14  ;;  %v6763_v60 = vld [vmem:[%s6042_s24 + $0xd0] sm:$0xff]  ;;  %v5410_v37 = vld [vmem:[%s6042_s24 + $0xe0] sm:$0xff] }
 0x4f7   : > { %v3315_v18 = vmul.f32 %v6542_v59, %v7132_v57  ;;  %v6747_v3 = vpop.eup %5368  ;;  %v3297_v59 = vsub.f32 %v6740_v49, %v6750_v55  ;;  %3377 = vst [vmem:[%s6653_s22 + $0x40] sm:$0xff] %v3345_v40  ;;  %v3290_v43 = vsub.f32 %v6690_v61, %v5405_v38  ;;  %3380 = vst [vmem:[%s6653_s22 + $0x58] sm:$0xff] %v3348_v56  ;;  %v5407_v61 = vld [vmem:[%s6042_s24 + $0xa8] sm:$0xff]  ;;  %v6787_v57 = vld [vmem:[%s6042_s24 + $0xf0] sm:$0xff] }
 0x4f8   : > { %v6760_v30 = vpop.eup %5370  ;;  %v3299_v53 = vsub.f32 %v6747_v3, %v6763_v60  ;;  %3384 = vst [vmem:[%s6653_s22 + $0x78] sm:$0xff] %v3352_v51  ;;  %v3408_v4 = vpack.c.bf16 %v3352_v51, %v3348_v56  ;;  %3381 = vst [vmem:[%s6653_s22 + $0x60] sm:$0xff] %v3349_v23  ;;  %v3405_v63 = vpack.c.bf16 %v3349_v23, %v3345_v40  ;;  %3579 = vmatprep.subr.bf16.mxu0 %v3406_v26  ;;  %v5412_v56 = vld [vmem:[%s6042_s24 + $0xc8] sm:$0xff]  ;;  %v5414_v6 = vld [vmem:[%s6042_s24 + $0xd8] sm:$0xff] }
 0x4f9   : > { %v3347_v29 = vadd.f32 %v6642_v19, %v3315_v18  ;;  %v3351_v19 = vadd.f32 %v6668_v5, %v3319_v17  ;;  %v5373_v24 = vpop.eup %5372  ;;  %v3294_v47 = vsub.f32 %v5363_v52, %v5407_v61  ;;  %v3322_v10 = vmul.f32 %v6565_v48, %v3290_v43  ;;  %v5413_v23 = vld [vmem:[%s6042_s24 + $0xe8] sm:$0xff] }
 0x4fa   : > { %v3292_v0 = vsub.f32 %v6700_v45, %v5408_v34  ;;  %v3296_v13 = vsub.f32 %v5365_v7, %v5409_v15  ;;  %v5375_v8 = vpop.eup %5374  ;;  %3692 = vmatprep.subr.bf16.mxu1 %v3408_v4  ;;  %3580 = vmatpush1.bf16.msra.mxu0 %v3405_v63  ;;  %v3321_v5 = vmul.f32 %v6561_v9, %v3289_v11 }
 0x4fb   : > { %3379 = vst [vmem:[%s6653_s22 + $0x50] sm:$0xff] %v3347_v29  ;;  %3383 = vst [vmem:[%s6653_s22 + $0x70] sm:$0xff] %v3351_v19  ;;  %v3407_v12 = vpack.c.bf16 %v3351_v19, %v3347_v29  ;;  %v3325_v52 = vmul.f32 %v6569_v31, %v3293_v46  ;;  %v5377_v48 = vpop.eup %5376  ;;  %v3301_v14 = vsub.f32 %v5375_v8, %v5410_v37  ;;  %v5056_v8 = vld [vmem:[%s6994_s10 + $0x30] sm:$0xff]  }
 0x4fc   : > { %v3326_v45 = vmul.f32 %v6573_v58, %v3294_v47  ;;  %v3354_v62 = vadd.f32 %v5405_v38, %v3322_v10  ;;  %v3324_v7 = vmul.f32 %v6567_v35, %v3292_v0  ;;  %v5379_v40 = vpop.eup %5378  ;;  %v3303_v44 = vsub.f32 %v5377_v48, %v6787_v57  ;;  %v5415_v38 = vld [vmem:[%s6042_s24 + $0xf8] sm:$0xff]  ;;  %s4388_s24 = sshll.u32 %s6653_s22, 4  ;;  %s6929_s24 = int_to_ptr.vmem [resolvable:$true] %s4388_s24 }
 0x4fd   : > { %3693 = vmatpush1.bf16.msra.mxu1 %v3407_v12  ;;  %v3328_v9 = vmul.f32 %v6575_v20, %v3296_v13  ;;  %v3353_v31 = vadd.f32 %v6686_v25, %v3321_v5  ;;  %v3357_v58 = vadd.f32 %v6718_v27, %v3325_v52  ;;  %v5381_v11 = vpop.eup %5380  ;;  %v3323_v18 = vmul.f32 %v6563_v22, %v3291_v16  ;;  %v5053_v0 = vld [vmem:[%s6994_s10 + $0x18] sm:$0xff]   ;;  %v5055_v13 = vld [vmem:[%s6994_s10 + $0x28] sm:$0xff]   ;;  %v3436_v5 = vpop.permute.xlu0 %3435  ;;  %s5416_s4 = scalar_lea.vmem %s6929_s24, 4096  ;;  %p5423_p1 = scmp.lt.s32.totalorder %s6929_s24, %s5421_s29 }
 0x4fe   : > { %v3358_v46 = vadd.f32 %v5407_v61, %v3326_v45  ;;  %3386 = vst [vmem:[%s6653_s22 + $0x88] sm:$0xff] %v3354_v62  ;;  %v3356_v35 = vadd.f32 %v5408_v34, %v3324_v7  ;;  %v3327_v20 = vmul.f32 %v6571_v1, %v3295_v2  ;;  %v3298_v51 = vsub.f32 %v6760_v30, %v5412_v56  ;;  %v5052_v34 = vld [vmem:[%s6994_s10 + $0x10] sm:$0xff]   ;;  %v5057_v12 = vld [vmem:[%s6994_s10 + $0x38] sm:$0xff]   ;;  %p5417_p12 = scmp.ne.s32.totalorder %s6929_s24, %s5416_s4  ;;  %p5424_p2 = scmp.lt.s32.totalorder %s5422_s17, %s5416_s4 }
 0x4ff   : > { %v3360_v25 = vadd.f32 %v5409_v15, %v3328_v9  ;;  %3385 = vst [vmem:[%s6653_s22 + $0x80] sm:$0xff] %v3353_v31  ;;  %3389 = vst [vmem:[%s6653_s22 + $0xa0] sm:$0xff] %v3357_v58  ;;  %v3409_v27 = vpack.c.bf16 %v3357_v58, %v3353_v31  ;;  %v3302_v39 = vsub.f32 %v5379_v40, %v5413_v23  ;;  %v7134_v10 = vmov 0   ;;  %v5054_v15 = vld [vmem:[%s6994_s10 + $0x20] sm:$0xff]  }
 0x500   : > { %3390 = vst [vmem:[%s6653_s22 + $0xa8] sm:$0xff] %v3358_v46  ;;  %v3410_v22 = vpack.c.bf16 %v3358_v46, %v3354_v62  ;;  %3388 = vst [vmem:[%s6653_s22 + $0x98] sm:$0xff] %v3356_v35  ;;  %v3355_v16 = vadd.f32 %v6693_v32, %v3323_v18  ;;  %v3359_v1 = vadd.f32 %v6725_v41, %v3327_v20  ;;  %p5418_p13 = pnand %p5417_p12, %p5621_p4  ;;  %p5425_p3 = por %p5424_p2, %p5423_p1 }
 0x501   : > { %v3300_v2 = vsub.f32 %v5373_v24, %v5414_v6  ;;  %3392 = vst [vmem:[%s6653_s22 + $0xb8] sm:$0xff] %v3360_v25  ;;  %v3412_v17 = vpack.c.bf16 %v3360_v25, %v3356_v35  ;;  %v3330_v26 = vmul.f32 %v6581_v21, %v3298_v51  ;;  %v3334_v29 = vmul.f32 %v6589_v54, %v3302_v39 }
 0x502   : > { %v3304_v43 = vsub.f32 %v5381_v11, %v5415_v38  ;;  %3581 = vmatprep.subr.bf16.mxu0 %v3410_v22  ;;  %3387 = vst [vmem:[%s6653_s22 + $0x90] sm:$0xff] %v3355_v16  ;;  %3391 = vst [vmem:[%s6653_s22 + $0xb0] sm:$0xff] %v3359_v1  ;;  %v3411_v30 = vpack.c.bf16 %v3359_v1, %v3355_v16  ;;  %v3329_v41 = vmul.f32 %v6577_v50, %v3297_v59  ;;  %v7133_v59 = vld [vmem:[#allocation14_spill] sm:$0xff]  ;;  %p5419_p0 = pneg %p5418_p13 }
 0x503   : > { %v3332_v32 = vmul.f32 %v6583_v36, %v3300_v2  ;;  %v3333_v4 = vmul.f32 %v6585_v28, %v3301_v14  ;;  %3694 = vmatprep.subr.bf16.mxu1 %v3412_v17  ;;  %3582 = vmatpush1.bf16.msra.mxu0 %v3409_v27  ;;  %v3362_v21 = vadd.f32 %v5412_v56, %v3330_v26  ;;  %v3441_v14 = vpop.permute.xlu1 %3440 }
 0x504   : > { %v3366_v54 = vadd.f32 %v5413_v23, %v3334_v29  ;;  %v3336_v63 = vmul.f32 %v6591_v42, %v3304_v43  ;;  %3695 = vmatpush1.bf16.msra.mxu1 %v3411_v30  ;;  %v3361_v36 = vadd.f32 %v6750_v55, %v3329_v41  ;;  %v3331_v50 = vmul.f32 %v6579_v33, %v3299_v53  ;;  %v5050_v33 = vld [vmem:[%s6994_s10] sm:$0xff]   ;;  %v3446_v23 = vpop.permute.xlu0 %3445  ;;  %p5426_p5 = pnand %p5425_p3, %p5419_p0 }
 0x505   : > { %v3364_v19 = vadd.f32 %v5414_v6, %v3332_v32  ;;  %v3365_v24 = vadd.f32 %v5410_v37, %v3333_v4  ;;  %3394 = vst [vmem:[%s6653_s22 + $0xc8] sm:$0xff] %v3362_v21  ;;  %v3335_v61 = vmul.f32 %v7133_v59, %v3303_v44 }
 0x506   : > { %3398 = vst [vmem:[%s6653_s22 + $0xe8] sm:$0xff] %v3366_v54  ;;  %v3414_v28 = vpack.c.bf16 %v3366_v54, %v3362_v21  ;;  %v3368_v49 = vadd.f32 %v5415_v38, %v3336_v63  ;;  %3393 = vst [vmem:[%s6653_s22 + $0xc0] sm:$0xff] %v3361_v36  ;;  %v3363_v55 = vadd.f32 %v6763_v60, %v3331_v50  ;;  %v5051_v60 = vld [vmem:[%s6994_s10 + $0x8] sm:$0xff]  }
 0x507   : > { %3396 = vst [vmem:[%s6653_s22 + $0xd8] sm:$0xff] %v3364_v19  ;;  %3397 = vst [vmem:[%s6653_s22 + $0xe0] sm:$0xff] %v3365_v24  ;;  %v3413_v42 = vpack.c.bf16 %v3365_v24, %v3361_v36  ;;  %v3367_v3 = vadd.f32 %v6787_v57, %v3335_v61  ;;  %v3451_v29 = vpop.permute.xlu1 %3450 }
 0x508   : > { %3583 = vmatprep.subr.bf16.mxu0 %v3414_v28  ;;  %3400 = vst [vmem:[%s6653_s22 + $0xf8] sm:$0xff] %v3368_v49  ;;  %v3416_v47 = vpack.c.bf16 %v3368_v49, %v3364_v19  ;;  %3395 = vst [vmem:[%s6653_s22 + $0xd0] sm:$0xff] %v3363_v55 }
 0x509   : > { %3584 = vmatpush1.bf16.msra.mxu0 %v3413_v42  ;;  %3399 = vst [vmem:[%s6653_s22 + $0xf0] sm:$0xff] %v3367_v3  ;;  %v3415_v53 = vpack.c.bf16 %v3367_v3, %v3363_v55  ;;  %v3456_v3 = vpop.permute.xlu0 %3455 }
 0x50a   : > { %3696 = vmatprep.subr.bf16.mxu1 %v3416_v47 }
 0x50b   : > { %3697 = vmatpush1.bf16.msra.mxu1 %v3415_v53 }
 0x50c   : > { %4726 = vmatmul.mubr.msk.bf16.vlgmr.msra.gmra.mrb[96].mxu0 %vm912_vm2, %v5050_v33 }
 0x50d   : > { %3619 = vmatprep.mubr.bf16.mxu0 %v7134_v10 }
 0x50e   : > { %4734 = vmatmul.mubr.msk.bf16.vlgmr.msra.gmra.mrb[96].mxu1 %vm912_vm2, %v5050_v33 }
 0x50f   : > { %3732 = vmatprep.mubr.bf16.mxu1 %v7134_v10 }
 0x514   : > { %4727 = vmatmul.mubr.msk.bf16.gmra.mrb[100].mxu0 %vm912_vm2, %v5051_v60 }
 0x515   : > { %3629 = vmatprep.mubr.bf16.mxu0 %v7134_v10 }
 0x516   : > { %4735 = vmatmul.mubr.msk.bf16.gmra.mrb[100].mxu1 %vm912_vm2, %v5051_v60 }
 0x517   : > { %3742 = vmatprep.mubr.bf16.mxu1 %v7134_v10 }
 0x51c   : > { %4728 = vmatmul.mubr.msk.bf16.gmra.mrb[104].mxu0 %vm912_vm2, %v5052_v34 }
 0x51d   : > { %3639 = vmatprep.mubr.bf16.mxu0 %v7134_v10 }
 0x51e   : > { %4736 = vmatmul.mubr.msk.bf16.gmra.mrb[104].mxu1 %vm912_vm2, %v5052_v34 }
 0x51f   : > { %3752 = vmatprep.mubr.bf16.mxu1 %v7134_v10 }
 0x524   : > { %4729 = vmatmul.mubr.msk.bf16.gmra.mrb[108].mxu0 %vm912_vm2, %v5053_v0 }
 0x525   : > { %3649 = vmatprep.mubr.bf16.mxu0 %v7134_v10 }
 0x526   : > { %4737 = vmatmul.mubr.msk.bf16.gmra.mrb[108].mxu1 %vm912_vm2, %v5053_v0 }
 0x527   : > { %3762 = vmatprep.mubr.bf16.mxu1 %v7134_v10 }
 0x52c   : > { %4730 = vmatmul.mubr.msk.bf16.gmra.mrb[112].mxu0 %vm912_vm2, %v5054_v15 }
 0x52d   : > { %3659 = vmatprep.mubr.bf16.mxu0 %v7134_v10 }
 0x52e   : > { %4738 = vmatmul.mubr.msk.bf16.gmra.mrb[112].mxu1 %vm912_vm2, %v5054_v15 }
 0x52f   : > { %3772 = vmatprep.mubr.bf16.mxu1 %v7134_v10 }
 0x534   : > { %4731 = vmatmul.mubr.msk.bf16.gmra.mrb[116].mxu0 %vm912_vm2, %v5055_v13 }
 0x535   : > { %3669 = vmatprep.mubr.bf16.mxu0 %v7134_v10 }
 0x536   : > { %4739 = vmatmul.mubr.msk.bf16.gmra.mrb[116].mxu1 %vm912_vm2, %v5055_v13 }
 0x537   : > { %3782 = vmatprep.mubr.bf16.mxu1 %v7134_v10 }
 0x53c   : > { %4732 = vmatmul.mubr.msk.bf16.gmra.mrb[120].mxu0 %vm912_vm2, %v5056_v8 }
 0x53d   : > { %3679 = vmatprep.mubr.bf16.mxu0 %v7134_v10 }
 0x53e   : > { %4740 = vmatmul.mubr.msk.bf16.gmra.mrb[120].mxu1 %vm912_vm2, %v5056_v8 }
 0x53f   : > { %3792 = vmatprep.mubr.bf16.mxu1 %v7134_v10 }
 0x544   : > { %4733 = vmatmul.mubr.msk.bf16.gmra.mrb[124].mxu0 %vm912_vm2, %v5057_v12 }
 0x545   : > { %4100 = vmatprep.mubr.bf16.mxu0 %v7134_v10 }
 0x546   : > { %4741 = vmatmul.mubr.msk.bf16.gmra.mrb[124].mxu1 %vm912_vm2, %v5057_v12  ;;  %v3461_v12 = vpop.permute.xlu1 %3460 }
 0x547   : > { %4173 = vmatprep.mubr.bf16.mxu1 %v7134_v10 }
 0x5df   : > { %v3611_v52 = vpop.f32.mrb[96].mxu0 }
 0x5e0   : > { %v3612_v48 = vadd.f32 %v3611_v52, %v3436_v5  ;;  %v3613_v37 = vpop.f32.mrb[97].mxu0 }
 0x5e1   : > { %v3614_v45 = vadd.f32 %v3613_v37, %v3436_v5  ;;  %v3615_v62 = vpop.f32.mrb[98].mxu0  ;;  %v3724_v7 = vpop.f32.mrb[96].mxu1 }
 0x5e2   : > { %v3616_v40 = vadd.f32 %v3615_v62, %v3441_v14  ;;  %v3617_v57 = vpop.f32.mrb[99].mxu0  ;;  %v3725_v44 = vadd.f32 %v3724_v7, %v3436_v5  ;;  %v3726_v9 = vpop.f32.mrb[97].mxu1  ;;  %v3836_v58 = vmax.f32 %v3612_v48, 0.0 }
 0x5e3   : > { %v3618_v31 = vadd.f32 %v3617_v57, %v3441_v14  ;;  %v3727_v11 = vadd.f32 %v3726_v9, %v3436_v5  ;;  %v3728_v35 = vpop.f32.mrb[98].mxu1  ;;  %v3837_v18 = vmax.f32 %v3614_v45, 0.0 }
 0x5e4   : > { %v3840_v46 = vmax.f32 %v3616_v40, 0.0  ;;  %v3729_v20 = vadd.f32 %v3728_v35, %v3441_v14  ;;  %v3730_v27 = vpop.f32.mrb[99].mxu1  ;;  %v3838_v39 = vmax.f32 %v3725_v44, 0.0 }
 0x5e5   : > { %v3841_v25 = vmax.f32 %v3618_v31, 0.0  ;;  %v3731_v51 = vadd.f32 %v3730_v27, %v3441_v14  ;;  %v3839_v6 = vmax.f32 %v3727_v11, 0.0  ;;  %v3466_v27 = vpop.permute.xlu0 %3465 }
 0x5e6   : > { %v3964_v56 = vpack.c.bf16 %v3840_v46, %v3836_v58  ;;  %v3842_v22 = vmax.f32 %v3729_v20, 0.0 }
 0x5e7   : > { %v3965_v16 = vpack.c.bf16 %v3841_v25, %v3837_v18  ;;  %v3621_v1 = vpop.f32.mrb[100].mxu0  ;;  %v3843_v2 = vmax.f32 %v3731_v51, 0.0 }
 0x5e8   : > { %v3622_v17 = vadd.f32 %v3621_v1, %v3446_v23  ;;  %v3623_v26 = vpop.f32.mrb[101].mxu0  ;;  %v3966_v38 = vpack.c.bf16 %v3842_v22, %v3838_v39 }
 0x5e9   : > { %v3624_v43 = vadd.f32 %v3623_v26, %v3446_v23  ;;  %v3625_v30 = vpop.f32.mrb[102].mxu0  ;;  %4068 = vmatprep.subr.bf16.mxu0 %v3965_v16  ;;  %v3967_v32 = vpack.c.bf16 %v3843_v2, %v3839_v6  ;;  %v3734_v41 = vpop.f32.mrb[100].mxu1 }
 0x5ea   : > { %v3626_v4 = vadd.f32 %v3625_v30, %v3451_v29  ;;  %v3627_v21 = vpop.f32.mrb[103].mxu0  ;;  %4069 = vmatpush1.bf16.msra.mxu0 %v3964_v56  ;;  %v3735_v54 = vadd.f32 %v3734_v41, %v3446_v23  ;;  %v3736_v63 = vpop.f32.mrb[101].mxu1  ;;  %v3844_v36 = vmax.f32 %v3622_v17, 0.0 }
 0x5eb   : > { %v3628_v19 = vadd.f32 %v3627_v21, %v3451_v29  ;;  %v3737_v24 = vadd.f32 %v3736_v63, %v3446_v23  ;;  %v3738_v28 = vpop.f32.mrb[102].mxu1  ;;  %4141 = vmatprep.subr.bf16.mxu1 %v3967_v32  ;;  %v3845_v49 = vmax.f32 %v3624_v43, 0.0  ;;  %v3471_v2 = vpop.permute.xlu1 %3470 }
 0x5ec   : > { %v3848_v50 = vmax.f32 %v3626_v4, 0.0  ;;  %v3739_v59 = vadd.f32 %v3738_v28, %v3451_v29  ;;  %v3740_v42 = vpop.f32.mrb[103].mxu1  ;;  %4142 = vmatpush1.bf16.msra.mxu1 %v3966_v38  ;;  %v3846_v33 = vmax.f32 %v3735_v54, 0.0 }
 0x5ed   : > { %v3849_v61 = vmax.f32 %v3628_v19, 0.0  ;;  %v3741_v47 = vadd.f32 %v3740_v42, %v3451_v29  ;;  %v3847_v0 = vmax.f32 %v3737_v24, 0.0 }
 0x5ee   : > { %v3968_v55 = vpack.c.bf16 %v3848_v50, %v3844_v36  ;;  %v3850_v53 = vmax.f32 %v3739_v59, 0.0 }
 0x5ef   : > { %v3969_v60 = vpack.c.bf16 %v3849_v61, %v3845_v49  ;;  %v3631_v34 = vpop.f32.mrb[104].mxu0  ;;  %v3851_v15 = vmax.f32 %v3741_v47, 0.0 }
 0x5f0   : > { %v3632_v13 = vadd.f32 %v3631_v34, %v3456_v3  ;;  %v3633_v8 = vpop.f32.mrb[105].mxu0  ;;  %v3970_v5 = vpack.c.bf16 %v3850_v53, %v3846_v33  ;;  %v3481_v33 = vpop.permute.xlu1 %3480 }
 0x5f1   : > { %v3634_v52 = vadd.f32 %v3633_v8, %v3456_v3  ;;  %v3635_v48 = vpop.f32.mrb[106].mxu0  ;;  %4070 = vmatprep.subr.bf16.mxu0 %v3969_v60  ;;  %v3971_v37 = vpack.c.bf16 %v3851_v15, %v3847_v0  ;;  %v3744_v14 = vpop.f32.mrb[104].mxu1 }
 0x5f2   : > { %v3636_v45 = vadd.f32 %v3635_v48, %v3461_v12  ;;  %v3637_v62 = vpop.f32.mrb[107].mxu0  ;;  %4071 = vmatpush1.bf16.msra.mxu0 %v3968_v55  ;;  %v3745_v7 = vadd.f32 %v3744_v14, %v3456_v3  ;;  %v3746_v40 = vpop.f32.mrb[105].mxu1  ;;  %v3852_v44 = vmax.f32 %v3632_v13, 0.0 }
 0x5f3   : > { %v3638_v57 = vadd.f32 %v3637_v62, %v3461_v12  ;;  %v3747_v9 = vadd.f32 %v3746_v40, %v3456_v3  ;;  %v3748_v58 = vpop.f32.mrb[106].mxu1  ;;  %4143 = vmatprep.subr.bf16.mxu1 %v3971_v37  ;;  %v3853_v11 = vmax.f32 %v3634_v52, 0.0  ;;  %v3476_v0 = vpop.permute.xlu0 %3475 }
 0x5f4   : > { %v3856_v31 = vmax.f32 %v3636_v45, 0.0  ;;  %v3749_v46 = vadd.f32 %v3748_v58, %v3461_v12  ;;  %v3750_v18 = vpop.f32.mrb[107].mxu1  ;;  %4144 = vmatpush1.bf16.msra.mxu1 %v3970_v5  ;;  %v3854_v56 = vmax.f32 %v3745_v7, 0.0 }
 0x5f5   : > { %v3857_v35 = vmax.f32 %v3638_v57, 0.0  ;;  %v3751_v25 = vadd.f32 %v3750_v18, %v3461_v12  ;;  %v3855_v22 = vmax.f32 %v3747_v9, 0.0 }
 0x5f6   : > { %v3972_v20 = vpack.c.bf16 %v3856_v31, %v3852_v44  ;;  %v3858_v51 = vmax.f32 %v3749_v46, 0.0 }
 0x5f7   : > { %v3973_v23 = vpack.c.bf16 %v3857_v35, %v3853_v11  ;;  %v3641_v39 = vpop.f32.mrb[108].mxu0  ;;  %v3859_v16 = vmax.f32 %v3751_v25, 0.0  ;;  %v3491_v35 = vpop.permute.xlu1 %3490 }
 0x5f8   : > { %v3642_v1 = vadd.f32 %v3641_v39, %v3466_v27  ;;  %v3643_v6 = vpop.f32.mrb[109].mxu0  ;;  %v3974_v17 = vpack.c.bf16 %v3858_v51, %v3854_v56  ;;  %v3486_v25 = vpop.permute.xlu0 %3485 }
 0x5f9   : > { %v3644_v26 = vadd.f32 %v3643_v6, %v3466_v27  ;;  %v3645_v29 = vpop.f32.mrb[110].mxu0  ;;  %4072 = vmatprep.subr.bf16.mxu0 %v3973_v23  ;;  %v3975_v38 = vpack.c.bf16 %v3859_v16, %v3855_v22  ;;  %v3754_v43 = vpop.f32.mrb[108].mxu1 }
 0x5fa   : > { %v3646_v30 = vadd.f32 %v3645_v29, %v3471_v2  ;;  %v3647_v32 = vpop.f32.mrb[111].mxu0  ;;  %4073 = vmatpush1.bf16.msra.mxu0 %v3972_v20  ;;  %v3755_v41 = vadd.f32 %v3754_v43, %v3466_v27  ;;  %v3756_v4 = vpop.f32.mrb[109].mxu1  ;;  %v3860_v54 = vmax.f32 %v3642_v1, 0.0 }
 0x5fb   : > { %v3648_v21 = vadd.f32 %v3647_v32, %v3471_v2  ;;  %v3757_v63 = vadd.f32 %v3756_v4, %v3466_v27  ;;  %v3758_v36 = vpop.f32.mrb[110].mxu1  ;;  %4145 = vmatprep.subr.bf16.mxu1 %v3975_v38  ;;  %v3861_v24 = vmax.f32 %v3644_v26, 0.0  ;;  %v3501_v4 = vpop.permute.xlu1 %3500 }
 0x5fc   : > { %v3864_v19 = vmax.f32 %v3646_v30, 0.0  ;;  %v3759_v50 = vadd.f32 %v3758_v36, %v3471_v2  ;;  %v3760_v49 = vpop.f32.mrb[111].mxu1  ;;  %4146 = vmatpush1.bf16.msra.mxu1 %v3974_v17  ;;  %v3862_v42 = vmax.f32 %v3755_v41, 0.0 }
 0x5fd   : > { %v3865_v28 = vmax.f32 %v3648_v21, 0.0  ;;  %v3761_v61 = vadd.f32 %v3760_v49, %v3471_v2  ;;  %v3863_v53 = vmax.f32 %v3757_v63, 0.0  ;;  %v3496_v63 = vpop.permute.xlu0 %3495 }
 0x5fe   : > { %v3976_v59 = vpack.c.bf16 %v3864_v19, %v3860_v54  ;;  %v3866_v55 = vmax.f32 %v3759_v50, 0.0 }
 0x5ff   : > { %v3977_v47 = vpack.c.bf16 %v3865_v28, %v3861_v24  ;;  %v3651_v3 = vpop.f32.mrb[112].mxu0  ;;  %v3867_v60 = vmax.f32 %v3761_v61, 0.0 }
 0x600   : > { %v3653_v34 = vpop.f32.mrb[113].mxu0  ;;  %v3978_v15 = vpack.c.bf16 %v3866_v55, %v3862_v42  ;;  %v3652_v12 = vadd.f32 %v3651_v3, %v3476_v0 }
 0x601   : > { %v3655_v13 = vpop.f32.mrb[114].mxu0  ;;  %4074 = vmatprep.subr.bf16.mxu0 %v3977_v47  ;;  %v3979_v8 = vpack.c.bf16 %v3867_v60, %v3863_v53  ;;  %v3764_v5 = vpop.f32.mrb[112].mxu1  ;;  %v3654_v37 = vadd.f32 %v3653_v34, %v3476_v0 }
 0x602   : > { %v3656_v52 = vadd.f32 %v3655_v13, %v3481_v33  ;;  %v3657_v48 = vpop.f32.mrb[115].mxu0  ;;  %4075 = vmatpush1.bf16.msra.mxu0 %v3976_v59  ;;  %v3766_v14 = vpop.f32.mrb[113].mxu1  ;;  %v3765_v40 = vadd.f32 %v3764_v5, %v3476_v0 }
 0x603   : > { %v3658_v45 = vadd.f32 %v3657_v48, %v3481_v33  ;;  %v3768_v7 = vpop.f32.mrb[114].mxu1  ;;  %4147 = vmatprep.subr.bf16.mxu1 %v3979_v8  ;;  %v3767_v31 = vadd.f32 %v3766_v14, %v3476_v0  ;;  %v3511_v13 = vpop.permute.xlu1 %3510 }
 0x604   : > { %v3980_v62 = vpack.c.bf16 %v3656_v52, %v3652_v12  ;;  %v3769_v57 = vadd.f32 %v3768_v7, %v3481_v33  ;;  %v3770_v9 = vpop.f32.mrb[115].mxu1  ;;  %4148 = vmatpush1.bf16.msra.mxu1 %v3978_v15  ;;  %v3506_v5 = vpop.permute.xlu0 %3505 }
 0x605   : > { %v3981_v44 = vpack.c.bf16 %v3658_v45, %v3654_v37  ;;  %v3771_v58 = vadd.f32 %v3770_v9, %v3481_v33 }
 0x606   : > { %v3982_v11 = vpack.c.bf16 %v3769_v57, %v3765_v40 }
 0x607   : > { %v3661_v46 = vpop.f32.mrb[116].mxu0  ;;  %4076 = vmatprep.subr.bf16.mxu0 %v3981_v44  ;;  %v3983_v18 = vpack.c.bf16 %v3771_v58, %v3767_v31 }
 0x608   : > { %v3663_v20 = vpop.f32.mrb[117].mxu0  ;;  %4077 = vmatpush1.bf16.msra.mxu0 %v3980_v62  ;;  %v3662_v56 = vadd.f32 %v3661_v46, %v3486_v25 }
 0x609   : > { %v3665_v27 = vpop.f32.mrb[118].mxu0  ;;  %v3774_v51 = vpop.f32.mrb[116].mxu1  ;;  %4149 = vmatprep.subr.bf16.mxu1 %v3983_v18  ;;  %v3664_v22 = vadd.f32 %v3663_v20, %v3486_v25  ;;  %v5058_v20 = vld [vmem:[%s6995_s11] sm:$0xff]  }
 0x60a   : > { %v3666_v23 = vadd.f32 %v3665_v27, %v3491_v35  ;;  %v3667_v39 = vpop.f32.mrb[119].mxu0  ;;  %v3776_v16 = vpop.f32.mrb[117].mxu1  ;;  %4150 = vmatpush1.bf16.msra.mxu1 %v3982_v11  ;;  %v3775_v17 = vadd.f32 %v3774_v51, %v3486_v25  ;;  %v5059_v27 = vld [vmem:[%s6995_s11 + $0x8] sm:$0xff]   ;;  %v5061_v51 = vld [vmem:[%s6995_s11 + $0x18] sm:$0xff]  }
 0x60b   : > { %v3668_v1 = vadd.f32 %v3667_v39, %v3491_v35  ;;  %v3778_v2 = vpop.f32.mrb[118].mxu1  ;;  %v3777_v43 = vadd.f32 %v3776_v16, %v3486_v25 }
 0x60c   : > { %v3984_v6 = vpack.c.bf16 %v3666_v23, %v3662_v56  ;;  %v3779_v26 = vadd.f32 %v3778_v2, %v3491_v35  ;;  %v3780_v38 = vpop.f32.mrb[119].mxu1  ;;  %v5060_v56 = vld [vmem:[%s6995_s11 + $0x10] sm:$0xff]   ;;  %v4007_v23 = vpop.permute.xlu0 %4006 }
 0x60d   : > { %v3985_v29 = vpack.c.bf16 %v3668_v1, %v3664_v22  ;;  %v3781_v30 = vadd.f32 %v3780_v38, %v3491_v35  ;;  %v4012_v1 = vpop.permute.xlu1 %4011 }
 0x60e   : > { %v3986_v32 = vpack.c.bf16 %v3779_v26, %v3775_v17 }
 0x60f   : > { %v3671_v41 = vpop.f32.mrb[120].mxu0  ;;  %4078 = vmatprep.subr.bf16.mxu0 %v3985_v29  ;;  %v3987_v21 = vpack.c.bf16 %v3781_v30, %v3777_v43 }
 0x610   : > { %v3673_v54 = vpop.f32.mrb[121].mxu0  ;;  %4079 = vmatpush1.bf16.msra.mxu0 %v3984_v6  ;;  %v3672_v36 = vadd.f32 %v3671_v41, %v3496_v63 }
 0x611   : > { %v3675_v19 = vpop.f32.mrb[122].mxu0  ;;  %v3784_v24 = vpop.f32.mrb[120].mxu1  ;;  %4151 = vmatprep.subr.bf16.mxu1 %v3987_v21  ;;  %v3674_v49 = vadd.f32 %v3673_v54, %v3496_v63 }
 0x612   : > { %v3676_v50 = vadd.f32 %v3675_v19, %v3501_v4  ;;  %v3677_v28 = vpop.f32.mrb[123].mxu0  ;;  %v3786_v59 = vpop.f32.mrb[121].mxu1  ;;  %4152 = vmatpush1.bf16.msra.mxu1 %v3986_v32  ;;  %v3785_v47 = vadd.f32 %v3784_v24, %v3496_v63 }
 0x613   : > { %v3678_v61 = vadd.f32 %v3677_v28, %v3501_v4  ;;  %v3788_v55 = vpop.f32.mrb[122].mxu1  ;;  %v3787_v60 = vadd.f32 %v3786_v59, %v3496_v63 }
 0x614   : > { %v3988_v42 = vpack.c.bf16 %v3676_v50, %v3672_v36  ;;  %v3789_v3 = vadd.f32 %v3788_v55, %v3501_v4  ;;  %v3790_v53 = vpop.f32.mrb[123].mxu1  ;;  %v4017_v50 = vpop.permute.xlu0 %4016 }
 0x615   : > { %v3989_v33 = vpack.c.bf16 %v3678_v61, %v3674_v49  ;;  %v3791_v34 = vadd.f32 %v3790_v53, %v3501_v4 }
 0x616   : > { %v3990_v0 = vpack.c.bf16 %v3789_v3, %v3785_v47 }
 0x617   : > { %v3681_v15 = vpop.f32.mrb[124].mxu0  ;;  %4080 = vmatprep.subr.bf16.mxu0 %v3989_v33  ;;  %v3991_v8 = vpack.c.bf16 %v3791_v34, %v3787_v60  ;;  %v4022_v33 = vpop.permute.xlu1 %4021 }
 0x618   : > { %v3683_v12 = vpop.f32.mrb[125].mxu0  ;;  %4081 = vmatpush1.bf16.msra.mxu0 %v3988_v42  ;;  %v3682_v48 = vadd.f32 %v3681_v15, %v3506_v5 }
 0x619   : > { %v3685_v52 = vpop.f32.mrb[126].mxu0  ;;  %v3794_v37 = vpop.f32.mrb[124].mxu1  ;;  %4153 = vmatprep.subr.bf16.mxu1 %v3991_v8  ;;  %v3684_v62 = vadd.f32 %v3683_v12, %v3506_v5 }
 0x61a   : > { %v3686_v14 = vadd.f32 %v3685_v52, %v3511_v13  ;;  %v3687_v45 = vpop.f32.mrb[127].mxu0  ;;  %v3796_v7 = vpop.f32.mrb[125].mxu1  ;;  %4154 = vmatpush1.bf16.msra.mxu1 %v3990_v0  ;;  %v3795_v9 = vadd.f32 %v3794_v37, %v3506_v5 }
 0x61b   : > { %v3688_v40 = vadd.f32 %v3687_v45, %v3511_v13  ;;  %v3798_v44 = vpop.f32.mrb[126].mxu1  ;;  %v3797_v46 = vadd.f32 %v3796_v7, %v3506_v5 }
 0x61c   : > { %v3992_v57 = vpack.c.bf16 %v3686_v14, %v3682_v48  ;;  %v3799_v31 = vadd.f32 %v3798_v44, %v3511_v13  ;;  %v3800_v11 = vpop.f32.mrb[127].mxu1 }
 0x61d   : > { %v3993_v58 = vpack.c.bf16 %v3688_v40, %v3684_v62  ;;  %v3801_v35 = vadd.f32 %v3800_v11, %v3511_v13 }
 0x61e   : > { %v3994_v18 = vpack.c.bf16 %v3799_v31, %v3795_v9  ;;  %v4027_v31 = vpop.permute.xlu0 %4026 }
 0x61f   : > { %4082 = vmatprep.subr.bf16.mxu0 %v3993_v58  ;;  %v3995_v25 = vpack.c.bf16 %v3801_v35, %v3797_v46 }
 0x620   : > { %4083 = vmatpush1.bf16.msra.mxu0 %v3992_v57 }
 0x621   : > { %4155 = vmatprep.subr.bf16.mxu1 %v3995_v25 }
 0x622   : > { %4156 = vmatpush1.bf16.msra.mxu1 %v3994_v18 }
 0x623   : > { %4101 = vmatmul.mubr.bf16.vlgmr.msra.gmra.mrb[128].mxu0 %v5058_v20 }
 0x624   : > { %4110 = vmatprep.mubr.bf16.mxu0 %v7134_v10 }
 0x625   : > { %4174 = vmatmul.mubr.bf16.vlgmr.msra.gmra.mrb[128].mxu1 %v5058_v20 }
 0x626   : > { %4183 = vmatprep.mubr.bf16.mxu1 %v7134_v10 }
 0x62b   : > { %4111 = vmatmul.mubr.bf16.gmra.mrb[132].mxu0 %v5059_v27 }
 0x62c   : > { %4120 = vmatprep.mubr.bf16.mxu0 %v7134_v10 }
 0x62d   : > { %4184 = vmatmul.mubr.bf16.gmra.mrb[132].mxu1 %v5059_v27 }
 0x62e   : > { %4193 = vmatprep.mubr.bf16.mxu1 %v7134_v10 }
 0x633   : > { %4121 = vmatmul.mubr.bf16.gmra.mrb[136].mxu0 %v5060_v56 }
 0x634   : > { %4130 = vmatprep.mubr.bf16.mxu0 %v7134_v10 }
 0x635   : > { %4194 = vmatmul.mubr.bf16.gmra.mrb[136].mxu1 %v5060_v56  ;;  %v4032_v56 = vpop.permute.xlu1 %4031 }
 0x636   : > { %4203 = vmatprep.mubr.bf16.mxu1 %v7134_v10 }
 0x63b   : > { %4131 = vmatmul.mubr.bf16.gmra.mrb[140].mxu0 %v5061_v51 }
 0x63c   : > { %4303 = vmatprep.mubr.bf16.mxu0 %v7134_v10 }
 0x63d   : > { %4204 = vmatmul.mubr.bf16.gmra.mrb[140].mxu1 %v5061_v51 }
 0x63e   : > { %4344 = vmatprep.mubr.bf16.mxu1 %v7134_v10 }
 0x6f6   : > { %v4102_v39 = vpop.f32.mrb[128].mxu0 }
 0x6f7   : > { %v4103_v22 = vadd.f32 %v4102_v39, %v4007_v23  ;;  %v4104_v16 = vpop.f32.mrb[129].mxu0 }
 0x6f8   : > { %v4105_v6 = vadd.f32 %v4104_v16, %v4007_v23  ;;  %v4106_v2 = vpop.f32.mrb[130].mxu0  ;;  %v4175_v17 = vpop.f32.mrb[128].mxu1 }
 0x6f9   : > { %v4107_v26 = vadd.f32 %v4106_v2, %v4012_v1  ;;  %v4108_v29 = vpop.f32.mrb[131].mxu0  ;;  %v4176_v38 = vadd.f32 %v4175_v17, %v4007_v23  ;;  %v4177_v43 = vpop.f32.mrb[129].mxu1  ;;  %v4214_v32 = vmax.f32 %v4103_v22, 0.0 }
 0x6fa   : > { %v4109_v30 = vadd.f32 %v4108_v29, %v4012_v1  ;;  %v4178_v41 = vadd.f32 %v4177_v43, %v4007_v23  ;;  %v4179_v21 = vpop.f32.mrb[130].mxu1  ;;  %v4215_v54 = vmax.f32 %v4105_v6, 0.0 }
 0x6fb   : > { %v4218_v4 = vmax.f32 %v4107_v26, 0.0  ;;  %v4180_v63 = vadd.f32 %v4179_v21, %v4012_v1  ;;  %v4181_v19 = vpop.f32.mrb[131].mxu1  ;;  %v4216_v28 = vmax.f32 %v4176_v38, 0.0 }
 0x6fc   : > { %v4219_v10 = vmax.f32 %v4109_v30, 0.0  ;;  %v4182_v24 = vadd.f32 %v4181_v19, %v4012_v1  ;;  %v4217_v42 = vmax.f32 %v4178_v41, 0.0 }
 0x6fd   : > { %v4246_v36 = vpack.c.bf16 %v4218_v4, %v4214_v32  ;;  %v4220_v49 = vmax.f32 %v4180_v63, 0.0 }
 0x6fe   : > { %v4247_v59 = vpack.c.bf16 %v4219_v10, %v4215_v54  ;;  %v4112_v61 = vpop.f32.mrb[132].mxu0  ;;  %v4221_v55 = vmax.f32 %v4182_v24, 0.0  ;;  %v4037_v10 = vpop.permute.xlu0 %4036 }
 0x6ff   : > { %v4113_v47 = vadd.f32 %v4112_v61, %v4017_v50  ;;  %v4114_v3 = vpop.f32.mrb[133].mxu0  ;;  %v4248_v53 = vpack.c.bf16 %v4220_v49, %v4216_v28 }
 0x700   : > { %v4115_v60 = vadd.f32 %v4114_v3, %v4017_v50  ;;  %v4116_v34 = vpop.f32.mrb[134].mxu0  ;;  %4271 = vmatprep.subr.bf16.mxu0 %v4247_v59  ;;  %v4249_v0 = vpack.c.bf16 %v4221_v55, %v4217_v42  ;;  %v4185_v15 = vpop.f32.mrb[132].mxu1 }
 0x701   : > { %v4117_v13 = vadd.f32 %v4116_v34, %v4022_v33  ;;  %v4118_v8 = vpop.f32.mrb[135].mxu0  ;;  %4272 = vmatpush1.bf16.msra.mxu0 %v4246_v36  ;;  %v4186_v12 = vadd.f32 %v4185_v15, %v4017_v50  ;;  %v4187_v5 = vpop.f32.mrb[133].mxu1  ;;  %v4222_v48 = vmax.f32 %v4113_v47, 0.0 }
 0x702   : > { %v4119_v52 = vadd.f32 %v4118_v8, %v4022_v33  ;;  %v4188_v37 = vadd.f32 %v4187_v5, %v4017_v50  ;;  %v4189_v45 = vpop.f32.mrb[134].mxu1  ;;  %4312 = vmatprep.subr.bf16.mxu1 %v4249_v0  ;;  %v4223_v62 = vmax.f32 %v4115_v60, 0.0  ;;  %v4042_v42 = vpop.permute.xlu1 %4041 }
 0x703   : > { %v4226_v14 = vmax.f32 %v4117_v13, 0.0  ;;  %v4190_v7 = vadd.f32 %v4189_v45, %v4022_v33  ;;  %v4191_v57 = vpop.f32.mrb[135].mxu1  ;;  %4313 = vmatpush1.bf16.msra.mxu1 %v4248_v53  ;;  %v4224_v58 = vmax.f32 %v4186_v12, 0.0 }
 0x704   : > { %v4227_v40 = vmax.f32 %v4119_v52, 0.0  ;;  %v4192_v9 = vadd.f32 %v4191_v57, %v4022_v33  ;;  %v4225_v18 = vmax.f32 %v4188_v37, 0.0 }
 0x705   : > { %v4250_v44 = vpack.c.bf16 %v4226_v14, %v4222_v48  ;;  %v4228_v11 = vmax.f32 %v4190_v7, 0.0 }
 0x706   : > { %v4251_v46 = vpack.c.bf16 %v4227_v40, %v4223_v62  ;;  %v4122_v35 = vpop.f32.mrb[136].mxu0  ;;  %v4229_v20 = vmax.f32 %v4192_v9, 0.0 }
 0x707   : > { %v4123_v25 = vadd.f32 %v4122_v35, %v4027_v31  ;;  %v4124_v27 = vpop.f32.mrb[137].mxu0  ;;  %v4252_v51 = vpack.c.bf16 %v4228_v11, %v4224_v58 }
 0x708   : > { %v4125_v23 = vadd.f32 %v4124_v27, %v4027_v31  ;;  %v4126_v39 = vpop.f32.mrb[138].mxu0  ;;  %4273 = vmatprep.subr.bf16.mxu0 %v4251_v46  ;;  %v4253_v22 = vpack.c.bf16 %v4229_v20, %v4225_v18  ;;  %v4195_v16 = vpop.f32.mrb[136].mxu1  ;;  %v4262_v46 = vld [vmem:[%s6996_s12] sm:$0x3] }
 0x709   : > { %v4127_v1 = vadd.f32 %v4126_v39, %v4032_v56  ;;  %v4128_v6 = vpop.f32.mrb[139].mxu0  ;;  %4274 = vmatpush1.bf16.msra.mxu0 %v4250_v44  ;;  %v4196_v2 = vadd.f32 %v4195_v16, %v4027_v31  ;;  %v4197_v17 = vpop.f32.mrb[137].mxu1  ;;  %v4230_v29 = vmax.f32 %v4123_v25, 0.0 }
 0x70a   : > { %v4129_v26 = vadd.f32 %v4128_v6, %v4032_v56  ;;  %v4198_v38 = vadd.f32 %v4197_v17, %v4027_v31  ;;  %v4199_v30 = vpop.f32.mrb[138].mxu1  ;;  %4314 = vmatprep.subr.bf16.mxu1 %v4253_v22  ;;  %v4231_v32 = vmax.f32 %v4125_v23, 0.0 }
 0x70b   : > { %v4234_v43 = vmax.f32 %v4127_v1, 0.0  ;;  %v4200_v41 = vadd.f32 %v4199_v30, %v4032_v56  ;;  %v4201_v21 = vpop.f32.mrb[139].mxu1  ;;  %4315 = vmatpush1.bf16.msra.mxu1 %v4252_v51  ;;  %v4232_v19 = vmax.f32 %v4196_v2, 0.0 }
 0x70c   : > { %v4235_v4 = vmax.f32 %v4129_v26, 0.0  ;;  %v4202_v63 = vadd.f32 %v4201_v21, %v4032_v56  ;;  %v4233_v28 = vmax.f32 %v4198_v38, 0.0 }
 0x70d   : > { %v4254_v54 = vpack.c.bf16 %v4234_v43, %v4230_v29  ;;  %v4236_v36 = vmax.f32 %v4200_v41, 0.0 }
 0x70e   : > { %v4255_v24 = vpack.c.bf16 %v4235_v4, %v4231_v32  ;;  %v4132_v50 = vpop.f32.mrb[140].mxu0  ;;  %v4237_v49 = vmax.f32 %v4202_v63, 0.0 }
 0x70f   : > { %v4133_v59 = vadd.f32 %v4132_v50, %v4037_v10  ;;  %v4134_v61 = vpop.f32.mrb[141].mxu0  ;;  %v4256_v55 = vpack.c.bf16 %v4236_v36, %v4232_v19 }
 0x710   : > { %v4135_v47 = vadd.f32 %v4134_v61, %v4037_v10  ;;  %v4136_v3 = vpop.f32.mrb[142].mxu0  ;;  %4275 = vmatprep.subr.bf16.mxu0 %v4255_v24  ;;  %v4257_v33 = vpack.c.bf16 %v4237_v49, %v4233_v28  ;;  %v4205_v53 = vpop.f32.mrb[140].mxu1 }
 0x711   : > { %v4137_v60 = vadd.f32 %v4136_v3, %v4042_v42  ;;  %v4138_v34 = vpop.f32.mrb[143].mxu0  ;;  %4276 = vmatpush1.bf16.msra.mxu0 %v4254_v54  ;;  %v4206_v0 = vadd.f32 %v4205_v53, %v4037_v10  ;;  %v4207_v15 = vpop.f32.mrb[141].mxu1  ;;  %v4238_v8 = vmax.f32 %v4133_v59, 0.0 }
 0x712   : > { %v4139_v13 = vadd.f32 %v4138_v34, %v4042_v42  ;;  %v4208_v12 = vadd.f32 %v4207_v15, %v4037_v10  ;;  %v4209_v52 = vpop.f32.mrb[142].mxu1  ;;  %4316 = vmatprep.subr.bf16.mxu1 %v4257_v33  ;;  %v4239_v48 = vmax.f32 %v4135_v47, 0.0 }
 0x713   : > { %v4242_v5 = vmax.f32 %v4137_v60, 0.0  ;;  %v4210_v37 = vadd.f32 %v4209_v52, %v4042_v42  ;;  %v4211_v45 = vpop.f32.mrb[143].mxu1  ;;  %4317 = vmatpush1.bf16.msra.mxu1 %v4256_v55  ;;  %v4240_v40 = vmax.f32 %v4206_v0, 0.0 }
 0x714   : > { %v4243_v14 = vmax.f32 %v4139_v13, 0.0  ;;  %v4212_v7 = vadd.f32 %v4211_v45, %v4042_v42  ;;  %v4241_v9 = vmax.f32 %v4208_v12, 0.0 }
 0x715   : > { %v4258_v62 = vpack.c.bf16 %v4242_v5, %v4238_v8  ;;  %v4244_v57 = vmax.f32 %v4210_v37, 0.0 }
 0x716   : > { %v4259_v44 = vpack.c.bf16 %v4243_v14, %v4239_v48  ;;  %v4245_v31 = vmax.f32 %v4212_v7, 0.0 }
 0x717   : > { %v4260_v58 = vpack.c.bf16 %v4244_v57, %v4240_v40 }
 0x718   : > { %4277 = vmatprep.subr.bf16.mxu0 %v4259_v44  ;;  %v4261_v11 = vpack.c.bf16 %v4245_v31, %v4241_v9 }
 0x719   : > { %4278 = vmatpush1.bf16.msra.mxu0 %v4258_v62 }
 0x71a   : > { %4318 = vmatprep.subr.bf16.mxu1 %v4261_v11 }
 0x71b   : > { %4319 = vmatpush1.bf16.msra.mxu1 %v4260_v58 }
 0x71c   : > { %4746 = vmatmul.mubr.msk.bf16.vlgmr.msra.gmra.mrb[144].mxu0 %vm912_vm2, %v4262_v46 }
 0x71e   : > { %4747 = vmatmul.mubr.msk.bf16.vlgmr.msra.gmra.mrb[144].mxu1 %vm912_vm2, %v4262_v46 }
 0x71f   : > { %5429 = shalt.err (!%p5426_p5)
}
 0x720   : > { %s5430_s2 = scalar_lea.hbm %s6926_s3, 4096  ;;  %s5434_s16 = scalar_lea.hbm %s6998_s14, 8192 }
 0x721   : > { %p5431_p6 = scmp.ne.s32.totalorder %s6926_s3, %s5430_s2  ;;  %p5435_p10 = scmp.lt.u32.totalorder %s6926_s3, %s6998_s14 }
 0x722   : > { %p5436_p11 = scmp.lt.u32.totalorder %s5434_s16, %s5430_s2  ;;  %p5438_p13 = scmp.lt.u32.totalorder %s5430_s2, %s6926_s3 }
 0x723   : > { %p5432_p7 = pnand %p5431_p6, %p5621_p4 }
 0x724   : > { %p5437_p12 = por %p5436_p11, %p5435_p10 }
 0x725   : > { %p5433_p9 = pneg %p5432_p7 }
 0x726   : > { %p5439_p0 = por %p5438_p13, %p5437_p12 }
 0x728   : > { %p5440_p1 = pnand %p5439_p0, %p5433_p9 }
 0x72a   : > { %5443 = shalt.err (!%p5440_p1)
}
 0x72b   : > { %s5499_s4 = smov 512   ;;  %s5500_s21 = smov 32   ;;  %v4266_v35 = vpop.permute.xlu0 %4265 }
 0x72c   : > { %4951 = dma.vmem_to_hbm [thread:$0]  (%p5621_p4), %s6929_s24, 4096, %s6926_s3, %s6933_s20, %s5499_s4, %s5499_s4, %s5500_s21  }
 0x72d   : > { %s7135_s29 = sshll.u32 %s5646_s27, 4 }
 0x72e   : > { %s654_s22 = scalar_lea.vmem %s6999_s15, %s7135_s29 }
 0x7ef   : > { %v4305_v18 = vpop.f32.mrb[144].mxu0 }
 0x7f0   : > { %v4306_v20 = vadd.f32 %v4305_v18, %v4266_v35  ;;  %v4307_v25 = vpop.f32.mrb[145].mxu0 }
 0x7f1   : > { %v4308_v27 = vadd.f32 %v4307_v25, %v4266_v35  ;;  %v4309_v56 = vpop.f32.mrb[146].mxu0  ;;  %v4346_v51 = vpop.f32.mrb[144].mxu1 }
 0x7f2   : > { %v4310_v23 = vpop.f32.mrb[147].mxu0  ;;  %v4347_v39 = vadd.f32 %v4346_v51, %v4266_v35  ;;  %v4348_v16 = vpop.f32.mrb[145].mxu1 }
 0x7f3   : > { %v4357_v22 = vcombine.low %v4306_v20, %v4308_v27  ;;  %v4349_v1 = vadd.f32 %v4348_v16, %v4266_v35  ;;  %v4350_v6 = vpop.f32.mrb[146].mxu1 }
 0x7f4   : > { %v4351_v2 = vpop.f32.mrb[147].mxu1 }
 0x7f5   : > { %4361 = vst [vmem:[%s654_s22] sm:$0x77] %v4357_v22  ;;  %v4358_v17 = vcombine.low %v4347_v39, %v4349_v1 }
 0x7f7   : > { %4362 = vst [vmem:[%s654_s22 + $0x8] sm:$0x77] %v4358_v17 }
 0x7f8 PF: > { %s7136_s28 = sld [smem:[#allocation5_spill]]  ;;  %p4957_p4 = scmp.ge.s32.totalorder %s5494_s23, 2 }
 0x7fa   : > { %p4954_p2 = pnand %p4957_p4, %p5628_p8 }
 0x7fe   : > { %s4407_s27 = sand.u32 1, %s7136_s28  }
 0x7ff   : > { %s4408_s3 = scalar_lea.sflag [#allocation3], %s4407_s27 }
 0x800   : > { %5469 = dma.done.wait (!%p4954_p2), %s4408_s3, 4096  }
 0x801   : > { %5471 = vsyncadd (!%p4954_p2), %s4408_s3, 4294963200  ;;  %s29_s23 = sadd.s32 1, %s5494_s23   ;;  %s7137_s24 = sld [smem:[#allocation6_spill]] }
 0x802   : > { %p26_p3 = scmp.ge.s32.totalorder %s29_s23, 4   ;;  %s7138_s20 = sld [smem:[#allocation9_spill]] }
 0x803   : > { %s7139_s21 = sld [smem:[#allocation7_spill]]  ;;  %s7140_s22 = sld [smem:[#allocation8_spill]] }
 0x804   : > { %s7141_s18 = smov %s5478_s19  ;;  %28 = sbr.rel (!%p26_p3) target bundleno = 8 (0x8), region = 132 }
 0x807   : > { %s7142_s19 = smov %s7137_s24 }
 0x80b   :  { %4425 = vsyncpa [#allocation3], 1 }
 0x80c   :  { %4427 = vsyncpa [#allocation3 + $0x1], 1 }

</bundles_post_ra>
